<compile_context>
chip_gen: v6e
topology: v6e:2x2x1
jax: 0.10.0
libtpu: 0.0.40
codegen_flags: <defaults>
</compile_context>

<pallas_src>
import functools

import jax
import jax.numpy as jnp
from jax.experimental import pallas as pl
from jax.experimental.pallas import tpu as pltpu

BN_EPS = 1e-5
LEAKY_SLOPE = 0.2
LANE = 128
VMEM_LIMIT = 48 * 1024 * 1024  # below v7x's 64 MiB physical VMEM, above 32 MiB scoped default


def _ceil_to(x, m):
    return ((x + m - 1) // m) * m


def _pad_lanes(mat, c_pad):
    c = mat.shape[-1]
    if c == c_pad:
        return mat
    pad = [(0, 0)] * (mat.ndim - 1) + [(0, c_pad - c)]
    return jnp.pad(mat, pad)


def _pad_gamma_beta(gamma, beta, c_pad):
    c = gamma.shape[0]
    g = jnp.ones((1, c_pad), jnp.float32).at[0, :c].set(gamma)   # gamma=1 in pad lanes
    b = jnp.zeros((1, c_pad), jnp.float32).at[0, :c].set(beta)   # beta=0 in pad lanes
    return g, b


# ----------------------------- Pallas kernels ------------------------------

def _bn_lrelu_kernel(p_ref, w_ref, g_ref, b_ref, o_ref, *, inv_n):
    """Fused batched-matmul -> BatchNorm(batch stats) -> LeakyReLU(0.2).

    p_ref: [G, M, K] bf16, w_ref: [G, K, C] bf16, g_ref/b_ref: [1, C] f32,
    o_ref: [G, M, C] bf16.  Per-channel stats over (G, M) use sum / sum-of-squares
    divided by the TRUE element count (inv_n), so zero-padded rows are harmless.
    """
    y = jnp.einsum('gmk,gkn->gmn', p_ref[...], w_ref[...],
                   preferred_element_type=jnp.float32)
    s = jnp.sum(y, axis=(0, 1), keepdims=True)               # [1, 1, C]
    ss = jnp.sum(y * y, axis=(0, 1), keepdims=True)          # [1, 1, C]
    mean = s * inv_n
    var = jnp.maximum(ss * inv_n - mean * mean, 0.0)         # biased var (PyTorch BN)
    scale = g_ref[...] * jax.lax.rsqrt(var + BN_EPS)         # folded BN: y*scale + shift
    shift = b_ref[...] - mean * scale
    out = y * scale + shift
    o_ref[...] = jnp.maximum(out, LEAKY_SLOPE * out).astype(o_ref.dtype)


def _bias_tanh_kernel(p_ref, w_ref, b_ref, o_ref):
    """Fused matmul -> +bias -> tanh (final ConvTranspose2d, parity classes on lanes)."""
    y = jnp.dot(p_ref[...], w_ref[...], preferred_element_type=jnp.float32)
    o_ref[...] = jnp.tanh(y + b_ref[...])


# ---------------------------- pallas_call wrappers --------------------------

def _stacked_matmul_bn_lrelu(patches, wstack, gamma_row, beta_row, n_true):
    G, M, K = patches.shape
    C = wstack.shape[-1]
    kernel = functools.partial(_bn_lrelu_kernel, inv_n=1.0 / float(n_true))
    flops = 2 * G * M * K * C + 6 * G * M * C
    bytes_accessed = (patches.size + wstack.size) * 2 + G * M * C * 2 + 2 * C * 4
    return pl.pallas_call(
        kernel,
        out_shape=jax.ShapeDtypeStruct((G, M, C), jnp.bfloat16),
        # whole-slab: BN batch statistics need the full activation slab in one shot
        grid=(1,),
        in_specs=[
            pl.BlockSpec((G, M, K), lambda i: (0, 0, 0)),
            pl.BlockSpec((G, K, C), lambda i: (0, 0, 0)),
            pl.BlockSpec((1, C), lambda i: (0, 0)),
            pl.BlockSpec((1, C), lambda i: (0, 0)),
        ],
        out_specs=pl.BlockSpec((G, M, C), lambda i: (0, 0, 0)),
        compiler_params=pltpu.CompilerParams(
            dimension_semantics=("arbitrary",),
            vmem_limit_bytes=VMEM_LIMIT),
        cost_estimate=pl.CostEstimate(flops=flops, transcendentals=C,
                                      bytes_accessed=bytes_accessed),
    )(patches, wstack, gamma_row, beta_row)


def _tiled_matmul_bias_tanh(patches, wmat, bias_row, tile_m):
    M, K = patches.shape
    C = wmat.shape[-1]
    flops = 2 * M * K * C
    bytes_accessed = patches.size * 2 + wmat.size * 2 + M * C * 4
    return pl.pallas_call(
        _bias_tanh_kernel,
        out_shape=jax.ShapeDtypeStruct((M, C), jnp.float32),
        grid=(M // tile_m,),
        in_specs=[
            pl.BlockSpec((tile_m, K), lambda i: (i, 0)),
            pl.BlockSpec((K, C), lambda i: (0, 0)),
            pl.BlockSpec((1, C), lambda i: (0, 0)),
        ],
        out_specs=pl.BlockSpec((tile_m, C), lambda i: (i, 0)),
        compiler_params=pltpu.CompilerParams(
            dimension_semantics=("parallel",),   # lets v7x shard row-tiles across both TCs
            vmem_limit_bytes=VMEM_LIMIT),
        cost_estimate=pl.CostEstimate(flops=flops, transcendentals=M * C,
                                      bytes_accessed=bytes_accessed),
    )(patches, wmat, bias_row)


# --------------------------------- module -----------------------------------

class GeneratorPallas:
    """JAX/Pallas port of the PyTorch Generator (n_classes, latent_dim, hidden_dim)."""

    def __init__(self, n_classes, latent_dim, hidden_dim, key):
        self.n_classes = n_classes
        self.latent_dim = latent_dim
        hd = hidden_dim
        self.cin0 = latent_dim + n_classes
        self.c1, self.c2, self.c3 = hd * 4, hd * 2, hd
        ks = jax.random.split(key, 12)

        def winit(k, shape, fan_in):
            return jax.random.normal(k, shape, jnp.float32) / jnp.sqrt(fan_in)

        # ConvTranspose2d weights in PyTorch layout [Cin, Cout, K, K]
        w1 = winit(ks[0], (self.cin0, self.c1, 4, 4), self.cin0 * 16)
        w2 = winit(ks[1], (self.c1, self.c2, 3, 3), self.c1 * 9)
        w3 = winit(ks[2], (self.c2, self.c3, 4, 4), self.c2 * 16)
        w4 = winit(ks[3], (self.c3, 1, 4, 4), self.c3 * 16)
        bias4 = 0.01 * jax.random.normal(ks[4], (1,), jnp.float32)
        g1 = 1.0 + 0.1 * jax.random.normal(ks[5], (self.c1,), jnp.float32)
        b1 = 0.1 * jax.random.normal(ks[6], (self.c1,), jnp.float32)
        g2 = 1.0 + 0.1 * jax.random.normal(ks[7], (self.c2,), jnp.float32)
        b2 = 0.1 * jax.random.normal(ks[8], (self.c2,), jnp.float32)
        g3 = 1.0 + 0.1 * jax.random.normal(ks[9], (self.c3,), jnp.float32)
        b3 = 0.1 * jax.random.normal(ks[10], (self.c3,), jnp.float32)
        # raw params kept for the pure-JAX reference check in __main__
        self.raw = dict(w1=w1, w2=w2, w3=w3, w4=w4, bias4=bias4,
                        g1=g1, b1=b1, g2=g2, b2=b2, g3=g3, b3=b3)

        # ---- all weight reshuffles / paddings hoisted here (perf review) ----
        self.c1p = _ceil_to(self.c1, LANE)
        self.c2p = _ceil_to(self.c2, LANE)
        self.c3p = _ceil_to(self.c3, LANE)

        # layer 1 (1x1 input): W1[oh*4+ow, ci, co] = w1[ci, co, oh, ow]
        W1 = w1.transpose(2, 3, 0, 1).reshape(16, self.cin0, self.c1)
        self.W1 = _pad_lanes(W1, self.c1p).astype(jnp.bfloat16)                 # [16, cin0, c1p]

        # layer 2: zero-dilated im2col weight, row order (kh, kw, ci), kernel flipped
        W2 = jnp.stack([w2[:, :, 2 - kh, 2 - kw] for kh in range(3) for kw in range(3)],
                       axis=0).reshape(9 * self.c1, self.c2)
        self.W2 = _pad_lanes(W2, self.c2p).astype(jnp.bfloat16)[None]           # [1, 9*c1, c2p]

        # layer 3: sub-pixel (output parity) decomposition of the 4x4 / stride-2 deconv.
        # group (ph, pw): tap (th, tw) pairs xpad[r+ph+th, c+pw+tw] with kernel
        # element (3-ph-2*th, 3-pw-2*tw).
        w3_groups = []
        for ph in range(2):
            for pw in range(2):
                taps = jnp.stack(
                    [w3[:, :, 3 - ph - 2 * th, 3 - pw - 2 * tw]
                     for th in range(2) for tw in range(2)], axis=0)            # [4, c2, c3]
                w3_groups.append(_pad_lanes(taps.reshape(4 * self.c2, self.c3), self.c3p))
        self.W3 = jnp.stack(w3_groups, axis=0).astype(jnp.bfloat16)             # [4, 4*c2, c3p]

        # final layer: 3x3 tap-union weight, one parity class per output lane (4 real lanes)
        w9 = jnp.zeros((3, 3, self.c3, 4), jnp.float32)
        for ph in range(2):
            for pw in range(2):
                for th in range(2):
                    for tw in range(2):
                        w9 = w9.at[ph + th, pw + tw, :, ph * 2 + pw].set(
                            w4[:, 0, 3 - ph - 2 * th, 3 - pw - 2 * tw])
        self.W9 = _pad_lanes(w9.reshape(9 * self.c3, 4), LANE).astype(jnp.bfloat16)
        self.bias_row = jnp.full((1, LANE), bias4[0], jnp.float32)

        # BatchNorm affine params, channel-padded (gamma=1 / beta=0 in pad lanes)
        self.g1p, self.b1p = _pad_gamma_beta(g1, b1, self.c1p)
        self.g2p, self.b2p = _pad_gamma_beta(g2, b2, self.c2p)
        self.g3p, self.b3p = _pad_gamma_beta(g3, b3, self.c3p)
        # TODO(synk): BatchNorm running-stats update (training-time buffer mutation) is not
        # modeled; normalization uses batch statistics = PyTorch train-mode forward values.

    def __call__(self, latent_vec, label):
        B = latent_vec.shape[0]
        ohe = jax.nn.one_hot(label, self.n_classes, dtype=latent_vec.dtype)
        x0 = jnp.concatenate([latent_vec, ohe], axis=1)              # [B, cin0]

        # -------- layer 1: ConvT(4x4, s=1, p=0) on a 1x1 input, -> [B, c1, 4, 4] --------
        Bp = _ceil_to(B, 8)
        x0p = jnp.pad(x0, ((0, Bp - B), (0, 0))).astype(jnp.bfloat16)
        p1 = jnp.broadcast_to(x0p[None], (16, Bp, self.cin0))        # same rows per position
        y1 = _stacked_matmul_bn_lrelu(p1, self.W1, self.g1p, self.b1p, n_true=16 * B)
        h1 = y1[:, :B, :self.c1].transpose(1, 0, 2).reshape(B, 4, 4, self.c1)   # NHWC

        # -------- layer 2: ConvT(3x3, s=2, p=1), 4x4 -> 7x7 (zero-dilated im2col) --------
        M2, M2p = B * 49, _ceil_to(B * 49, 8)
        xz = jnp.zeros((B, 9, 9, self.c1), jnp.bfloat16).at[:, 1:8:2, 1:8:2, :].set(h1)
        cols = [xz[:, kh:kh + 7, kw:kw + 7, :] for kh in range(3) for kw in range(3)]
        p2 = jnp.stack(cols, axis=3).reshape(B * 49, 9 * self.c1)
        p2 = jnp.pad(p2, ((0, M2p - M2), (0, 0)))[None]
        y2 = _stacked_matmul_bn_lrelu(p2, self.W2, self.g2p, self.b2p, n_true=M2)
        h2 = y2[0, :M2, :self.c2].reshape(B, 7, 7, self.c2)

        # -------- layer 3: ConvT(4x4, s=2, p=1), 7x7 -> 14x14 (sub-pixel parity) --------
        xp = jnp.pad(h2, ((0, 0), (1, 1), (1, 1), (0, 0)))           # [B, 9, 9, c2]
        S = [[xp[:, dh:dh + 7, dw:dw + 7, :] for dw in range(3)] for dh in range(3)]
        groups = []
        for ph in range(2):
            for pw in range(2):
                taps = jnp.stack([S[ph + th][pw + tw] for th in range(2) for tw in range(2)],
                                 axis=3)                              # [B, 7, 7, 4, c2]
                groups.append(taps.reshape(B * 49, 4 * self.c2))
        p3 = jnp.pad(jnp.stack(groups, axis=0), ((0, 0), (0, M2p - M2), (0, 0)))
        y3 = _stacked_matmul_bn_lrelu(p3, self.W3, self.g3p, self.b3p, n_true=4 * M2)
        h3 = (y3[:, :M2, :self.c3].reshape(2, 2, B, 7, 7, self.c3)
              .transpose(2, 3, 0, 4, 1, 5).reshape(B, 14, 14, self.c3))

        # -------- final: ConvT(4x4, s=2, p=1) + bias + tanh, 14x14 -> 28x28 --------
        xf = jnp.pad(h3, ((0, 0), (1, 1), (1, 1), (0, 0)))           # [B, 16, 16, c3]
        cols = [xf[:, dh:dh + 14, dw:dw + 14, :] for dh in range(3) for dw in range(3)]
        pf = jnp.stack(cols, axis=3).reshape(B * 196, 9 * self.c3)
        Mf = B * 196
        tile_m = min(512, _ceil_to(Mf, 8))
        Mfp = _ceil_to(Mf, tile_m)
        pf = jnp.pad(pf, ((0, Mfp - Mf), (0, 0)))
        yf = _tiled_matmul_bias_tanh(pf, self.W9, self.bias_row, tile_m)   # [Mfp, 128] f32
        out = (yf[:Mf, :4].reshape(B, 14, 14, 2, 2)
               .transpose(0, 1, 3, 2, 4).reshape(B, 1, 28, 28))
        return out


# --------------------- plain-JAX f32 reference (for checking) ---------------------

def _reference_forward(raw, latent_vec, label, n_classes):
    def deconv(x, w_t, K, s, p):                          # x: NCHW, w_t: [Cin, Cout, K, K]
        B, C, H, W = x.shape
        Hd, Wd = (H - 1) * s + 1, (W - 1) * s + 1
        xd = jnp.zeros((B, C, Hd, Wd), x.dtype).at[:, :, ::s, ::s].set(x)
        pd = K - 1 - p
        xpad = jnp.pad(xd, ((0, 0), (0, 0), (pd, pd), (pd, pd)))
        Ho, Wo = Hd + 2 * pd - K + 1, Wd + 2 * pd - K + 1
        wf = w_t[:, :, ::-1, ::-1]
        y = jnp.zeros((B, w_t.shape[1], Ho, Wo), jnp.float32)
        for kh in range(K):
            for kw in range(K):
                y = y + jnp.einsum('bchw,cd->bdhw',
                                   xpad[:, :, kh:kh + Ho, kw:kw + Wo], wf[:, :, kh, kw])
        return y

    def bn_lrelu(y, g, b):
        mean = y.mean(axis=(0, 2, 3), keepdims=True)
        var = ((y - mean) ** 2).mean(axis=(0, 2, 3), keepdims=True)
        out = g.reshape(1, -1, 1, 1) * (y - mean) * jax.lax.rsqrt(var + BN_EPS) \
            + b.reshape(1, -1, 1, 1)
        return jnp.maximum(out, LEAKY_SLOPE * out)

    ohe = jax.nn.one_hot(label, n_classes, dtype=latent_vec.dtype)
    x = jnp.concatenate([latent_vec, ohe], axis=1)[:, :, None, None]
    x = bn_lrelu(deconv(x, raw['w1'], 4, 1, 0), raw['g1'], raw['b1'])
    x = bn_lrelu(deconv(x, raw['w2'], 3, 2, 1), raw['g2'], raw['b2'])
    x = bn_lrelu(deconv(x, raw['w3'], 4, 2, 1), raw['g3'], raw['b3'])
    x = deconv(x, raw['w4'], 4, 2, 1) + raw['bias4'].reshape(1, 1, 1, 1)
    return jnp.tanh(x)


if __name__ == "__main__":
    n_classes, latent_dim, hidden_dim, batch = 10, 16, 32, 2
    key = jax.random.PRNGKey(0)
    k_param, k_latent, k_label = jax.random.split(key, 3)

    gen = GeneratorPallas(n_classes, latent_dim, hidden_dim, k_param)
    latent_vec = jax.random.normal(k_latent, (batch, latent_dim), jnp.float32)
    label = jax.random.randint(k_label, (batch,), 0, n_classes)

    out = jax.jit(gen.__call__)(latent_vec, label)
    out = jax.block_until_ready(out)

    assert out.shape == (batch, 1, 28, 28), out.shape
    assert out.dtype == jnp.float32
    assert bool(jnp.all(jnp.isfinite(out)))
    assert bool(jnp.all(jnp.abs(out) <= 1.0))  # tanh range

    # cross-check against a plain-JAX f32 reference; loose tol because the Pallas path
    # intentionally runs bf16 matmul operands (f32 accumulation).
    ref = _reference_forward(gen.raw, latent_vec, label, n_classes)
    max_err = float(jnp.max(jnp.abs(out - ref)))
    assert max_err < 0.2, f"mismatch vs reference: max abs err {max_err}"

    print("KERNEL_OK")
</pallas_src>

<mosaic_0001>
module attributes {stable_mosaic.version = 11 : i64} {
  func.func @_bn_lrelu_kernel(%arg0: i32, %arg1: memref<16x8x26xbf16, #tpu.memory_space<vmem>>, %arg2: memref<16x26x128xbf16, #tpu.memory_space<vmem>>, %arg3: memref<1x128xf32, #tpu.memory_space<vmem>>, %arg4: memref<1x128xf32, #tpu.memory_space<vmem>>, %arg5: memref<16x8x128xbf16, #tpu.memory_space<vmem>>) attributes {dimension_semantics = [#tpu.dimension_semantics<arbitrary>], iteration_bounds = array<i64: 1>, scalar_prefetch = 0 : i64, scratch_operands = 0 : i64, tpu.core_type = #tpu.core_type<tc>, window_params = [{pipeline_mode = #tpu.pipeline_mode<synchronous>, transform_indices = @transform_0, window_bounds = array<i64: 16, 8, 26>}, {pipeline_mode = #tpu.pipeline_mode<synchronous>, transform_indices = @transform_1, window_bounds = array<i64: 16, 26, 128>}, {pipeline_mode = #tpu.pipeline_mode<synchronous>, transform_indices = @transform_2, window_bounds = array<i64: 1, 128>}, {pipeline_mode = #tpu.pipeline_mode<synchronous>, transform_indices = @transform_3, window_bounds = array<i64: 1, 128>}, {pipeline_mode = #tpu.pipeline_mode<synchronous>, transform_indices = @transform_4, window_bounds = array<i64: 16, 8, 128>}]} {
    %c0 = arith.constant 0 : index
    %c0_0 = arith.constant 0 : index
    %c0_1 = arith.constant 0 : index
    %0 = vector.load %arg1[%c0, %c0_0, %c0_1] : memref<16x8x26xbf16, #tpu.memory_space<vmem>>, vector<16x8x26xbf16>
    %c0_2 = arith.constant 0 : index
    %c0_3 = arith.constant 0 : index
    %c0_4 = arith.constant 0 : index
    %1 = vector.load %arg2[%c0_2, %c0_3, %c0_4] : memref<16x26x128xbf16, #tpu.memory_space<vmem>>, vector<16x26x128xbf16>
    "tpu.trace_start"() <{level = 10 : i32, message = "gmk,gkn->gmn"}> : () -> ()
    %cst = arith.constant dense<0.000000e+00> : vector<16x8x128xf32>
    %2 = tpu.matmul %0, %1, %cst {dimension_numbers = #tpu.dot_dimension_numbers<[2], [1], [1], [2], [0, 0, 0, 1, 1, 2], [0], [0]>} : vector<16x8x26xbf16>, vector<16x26x128xbf16>, vector<16x8x128xf32> -> vector<16x8x128xf32>
    "tpu.trace_stop"() : () -> ()
    %cst_5 = arith.constant dense<0.000000e+00> : vector<128xf32>
    %3 = vector.multi_reduction <add>, %2, %cst_5 [0, 1] : vector<16x8x128xf32> to vector<128xf32>
    %4 = vector.shape_cast %3 : vector<128xf32> to vector<1x1x128xf32>
    %5 = arith.mulf %2, %2 : vector<16x8x128xf32>
    %cst_6 = arith.constant dense<0.000000e+00> : vector<128xf32>
    %6 = vector.multi_reduction <add>, %5, %cst_6 [0, 1] : vector<16x8x128xf32> to vector<128xf32>
    %7 = vector.shape_cast %6 : vector<128xf32> to vector<1x1x128xf32>
    %cst_7 = arith.constant 3.125000e-02 : f32
    %8 = vector.broadcast %cst_7 : f32 to vector<1x1x128xf32>
    %9 = arith.mulf %4, %8 : vector<1x1x128xf32>
    %cst_8 = arith.constant 3.125000e-02 : f32
    %10 = vector.broadcast %cst_8 : f32 to vector<1x1x128xf32>
    %11 = arith.mulf %7, %10 : vector<1x1x128xf32>
    %12 = arith.mulf %9, %9 : vector<1x1x128xf32>
    %13 = arith.subf %11, %12 : vector<1x1x128xf32>
    %cst_9 = arith.constant 0.000000e+00 : f32
    %14 = vector.broadcast %cst_9 : f32 to vector<1x1x128xf32>
    %15 = arith.maximumf %13, %14 : vector<1x1x128xf32>
    %c0_10 = arith.constant 0 : index
    %c0_11 = arith.constant 0 : index
    %16 = vector.load %arg3[%c0_10, %c0_11] : memref<1x128xf32, #tpu.memory_space<vmem>>, vector<1x128xf32>
    %cst_12 = arith.constant 9.99999974E-6 : f32
    %17 = vector.broadcast %cst_12 : f32 to vector<1x1x128xf32>
    %18 = arith.addf %15, %17 : vector<1x1x128xf32>
    %19 = math.rsqrt %18 : vector<1x1x128xf32>
    %20 = vector.shape_cast %16 : vector<1x128xf32> to vector<1x1x128xf32>
    %21 = arith.mulf %20, %19 : vector<1x1x128xf32>
    %c0_13 = arith.constant 0 : index
    %c0_14 = arith.constant 0 : index
    %22 = vector.load %arg4[%c0_13, %c0_14] : memref<1x128xf32, #tpu.memory_space<vmem>>, vector<1x128xf32>
    %23 = arith.mulf %9, %21 : vector<1x1x128xf32>
    %24 = vector.shape_cast %22 : vector<1x128xf32> to vector<1x1x128xf32>
    %25 = arith.subf %24, %23 : vector<1x1x128xf32>
    %26 = vector.broadcast %21 : vector<1x1x128xf32> to vector<16x8x128xf32>
    %27 = arith.mulf %2, %26 : vector<16x8x128xf32>
    %28 = vector.broadcast %25 : vector<1x1x128xf32> to vector<16x8x128xf32>
    %29 = arith.addf %27, %28 : vector<16x8x128xf32>
    %cst_15 = arith.constant 2.000000e-01 : f32
    %30 = vector.broadcast %cst_15 : f32 to vector<16x8x128xf32>
    %31 = arith.mulf %30, %29 : vector<16x8x128xf32>
    %32 = arith.maximumf %29, %31 : vector<16x8x128xf32>
    %33 = arith.truncf %32 : vector<16x8x128xf32> to vector<16x8x128xbf16>
    %c0_16 = arith.constant 0 : index
    %c0_17 = arith.constant 0 : index
    %c0_18 = arith.constant 0 : index
    %34 = vector.load %arg5[%c0_16, %c0_17, %c0_18] : memref<16x8x128xbf16, #tpu.memory_space<vmem>>, vector<16x8x128xbf16>
    tpu.vector_store %arg5[%c0_16, %c0_17, %c0_18], %33 {strides = array<i32>} : memref<16x8x128xbf16, #tpu.memory_space<vmem>>, vector<16x8x128xbf16>,
    return
  }
  func.func @transform_0(%arg0: i32) -> (i32, i32, i32) {
    %c0_i32 = arith.constant 0 : i32
    %c0_i32_0 = arith.constant 0 : i32
    %c0_i32_1 = arith.constant 0 : i32
    %c0_i32_2 = arith.constant 0 : i32
    return %c0_i32, %c0_i32_0, %c0_i32_1 : i32, i32, i32
  }
  func.func @transform_1(%arg0: i32) -> (i32, i32, i32) {
    %c0_i32 = arith.constant 0 : i32
    %c0_i32_0 = arith.constant 0 : i32
    %c0_i32_1 = arith.constant 0 : i32
    %c0_i32_2 = arith.constant 0 : i32
    return %c0_i32, %c0_i32_0, %c0_i32_1 : i32, i32, i32
  }
  func.func @transform_2(%arg0: i32) -> (i32, i32) {
    %c0_i32 = arith.constant 0 : i32
    %c0_i32_0 = arith.constant 0 : i32
    %c0_i32_1 = arith.constant 0 : i32
    return %c0_i32, %c0_i32_0 : i32, i32
  }
  func.func @transform_3(%arg0: i32) -> (i32, i32) {
    %c0_i32 = arith.constant 0 : i32
    %c0_i32_0 = arith.constant 0 : i32
    %c0_i32_1 = arith.constant 0 : i32
    return %c0_i32, %c0_i32_0 : i32, i32
  }
  func.func @transform_4(%arg0: i32) -> (i32, i32, i32) {
    %c0_i32 = arith.constant 0 : i32
    %c0_i32_0 = arith.constant 0 : i32
    %c0_i32_1 = arith.constant 0 : i32
    %c0_i32_2 = arith.constant 0 : i32
    return %c0_i32, %c0_i32_0, %c0_i32_1 : i32, i32, i32
  }
}

module attributes {stable_mosaic.version = 11 : i64} {
  func.func @_bn_lrelu_kernel(%arg0: i32, %arg1: memref<1x104x1152xbf16, #tpu.memory_space<vmem>>, %arg2: memref<1x1152x128xbf16, #tpu.memory_space<vmem>>, %arg3: memref<1x128xf32, #tpu.memory_space<vmem>>, %arg4: memref<1x128xf32, #tpu.memory_space<vmem>>, %arg5: memref<1x104x128xbf16, #tpu.memory_space<vmem>>) attributes {dimension_semantics = [#tpu.dimension_semantics<arbitrary>], iteration_bounds = array<i64: 1>, scalar_prefetch = 0 : i64, scratch_operands = 0 : i64, tpu.core_type = #tpu.core_type<tc>, window_params = [{pipeline_mode = #tpu.pipeline_mode<synchronous>, transform_indices = @transform_0, window_bounds = array<i64: 1, 104, 1152>}, {pipeline_mode = #tpu.pipeline_mode<synchronous>, transform_indices = @transform_1, window_bounds = array<i64: 1, 1152, 128>}, {pipeline_mode = #tpu.pipeline_mode<synchronous>, transform_indices = @transform_2, window_bounds = array<i64: 1, 128>}, {pipeline_mode = #tpu.pipeline_mode<synchronous>, transform_indices = @transform_3, window_bounds = array<i64: 1, 128>}, {pipeline_mode = #tpu.pipeline_mode<synchronous>, transform_indices = @transform_4, window_bounds = array<i64: 1, 104, 128>}]} {
    %c0 = arith.constant 0 : index
    %c0_0 = arith.constant 0 : index
    %c0_1 = arith.constant 0 : index
    %0 = vector.load %arg1[%c0, %c0_0, %c0_1] : memref<1x104x1152xbf16, #tpu.memory_space<vmem>>, vector<1x104x1152xbf16>
    %c0_2 = arith.constant 0 : index
    %c0_3 = arith.constant 0 : index
    %c0_4 = arith.constant 0 : index
    %1 = vector.load %arg2[%c0_2, %c0_3, %c0_4] : memref<1x1152x128xbf16, #tpu.memory_space<vmem>>, vector<1x1152x128xbf16>
    "tpu.trace_start"() <{level = 10 : i32, message = "gmk,gkn->gmn"}> : () -> ()
    %cst = arith.constant dense<0.000000e+00> : vector<1x104x128xf32>
    %2 = tpu.matmul %0, %1, %cst {dimension_numbers = #tpu.dot_dimension_numbers<[2], [1], [1], [2], [0, 0, 0, 1, 1, 2], [0], [0]>} : vector<1x104x1152xbf16>, vector<1x1152x128xbf16>, vector<1x104x128xf32> -> vector<1x104x128xf32>
    "tpu.trace_stop"() : () -> ()
    %cst_5 = arith.constant dense<0.000000e+00> : vector<128xf32>
    %3 = vector.multi_reduction <add>, %2, %cst_5 [0, 1] : vector<1x104x128xf32> to vector<128xf32>
    %4 = vector.shape_cast %3 : vector<128xf32> to vector<1x1x128xf32>
    %5 = arith.mulf %2, %2 : vector<1x104x128xf32>
    %cst_6 = arith.constant dense<0.000000e+00> : vector<128xf32>
    %6 = vector.multi_reduction <add>, %5, %cst_6 [0, 1] : vector<1x104x128xf32> to vector<128xf32>
    %7 = vector.shape_cast %6 : vector<128xf32> to vector<1x1x128xf32>
    %cst_7 = arith.constant 0.0102040814 : f32
    %8 = vector.broadcast %cst_7 : f32 to vector<1x1x128xf32>
    %9 = arith.mulf %4, %8 : vector<1x1x128xf32>
    %cst_8 = arith.constant 0.0102040814 : f32
    %10 = vector.broadcast %cst_8 : f32 to vector<1x1x128xf32>
    %11 = arith.mulf %7, %10 : vector<1x1x128xf32>
    %12 = arith.mulf %9, %9 : vector<1x1x128xf32>
    %13 = arith.subf %11, %12 : vector<1x1x128xf32>
    %cst_9 = arith.constant 0.000000e+00 : f32
    %14 = vector.broadcast %cst_9 : f32 to vector<1x1x128xf32>
    %15 = arith.maximumf %13, %14 : vector<1x1x128xf32>
    %c0_10 = arith.constant 0 : index
    %c0_11 = arith.constant 0 : index
    %16 = vector.load %arg3[%c0_10, %c0_11] : memref<1x128xf32, #tpu.memory_space<vmem>>, vector<1x128xf32>
    %cst_12 = arith.constant 9.99999974E-6 : f32
    %17 = vector.broadcast %cst_12 : f32 to vector<1x1x128xf32>
    %18 = arith.addf %15, %17 : vector<1x1x128xf32>
    %19 = math.rsqrt %18 : vector<1x1x128xf32>
    %20 = vector.shape_cast %16 : vector<1x128xf32> to vector<1x1x128xf32>
    %21 = arith.mulf %20, %19 : vector<1x1x128xf32>
    %c0_13 = arith.constant 0 : index
    %c0_14 = arith.constant 0 : index
    %22 = vector.load %arg4[%c0_13, %c0_14] : memref<1x128xf32, #tpu.memory_space<vmem>>, vector<1x128xf32>
    %23 = arith.mulf %9, %21 : vector<1x1x128xf32>
    %24 = vector.shape_cast %22 : vector<1x128xf32> to vector<1x1x128xf32>
    %25 = arith.subf %24, %23 : vector<1x1x128xf32>
    %26 = vector.broadcast %21 : vector<1x1x128xf32> to vector<1x104x128xf32>
    %27 = arith.mulf %2, %26 : vector<1x104x128xf32>
    %28 = vector.broadcast %25 : vector<1x1x128xf32> to vector<1x104x128xf32>
    %29 = arith.addf %27, %28 : vector<1x104x128xf32>
    %cst_15 = arith.constant 2.000000e-01 : f32
    %30 = vector.broadcast %cst_15 : f32 to vector<1x104x128xf32>
    %31 = arith.mulf %30, %29 : vector<1x104x128xf32>
    %32 = arith.maximumf %29, %31 : vector<1x104x128xf32>
    %33 = arith.truncf %32 : vector<1x104x128xf32> to vector<1x104x128xbf16>
    %c0_16 = arith.constant 0 : index
    %c0_17 = arith.constant 0 : index
    %c0_18 = arith.constant 0 : index
    %34 = vector.load %arg5[%c0_16, %c0_17, %c0_18] : memref<1x104x128xbf16, #tpu.memory_space<vmem>>, vector<1x104x128xbf16>
    tpu.vector_store %arg5[%c0_16, %c0_17, %c0_18], %33 {strides = array<i32>} : memref<1x104x128xbf16, #tpu.memory_space<vmem>>, vector<1x104x128xbf16>,
    return
  }
  func.func @transform_0(%arg0: i32) -> (i32, i32, i32) {
    %c0_i32 = arith.constant 0 : i32
    %c0_i32_0 = arith.constant 0 : i32
    %c0_i32_1 = arith.constant 0 : i32
    %c0_i32_2 = arith.constant 0 : i32
    return %c0_i32, %c0_i32_0, %c0_i32_1 : i32, i32, i32
  }
  func.func @transform_1(%arg0: i32) -> (i32, i32, i32) {
    %c0_i32 = arith.constant 0 : i32
    %c0_i32_0 = arith.constant 0 : i32
    %c0_i32_1 = arith.constant 0 : i32
    %c0_i32_2 = arith.constant 0 : i32
    return %c0_i32, %c0_i32_0, %c0_i32_1 : i32, i32, i32
  }
  func.func @transform_2(%arg0: i32) -> (i32, i32) {
    %c0_i32 = arith.constant 0 : i32
    %c0_i32_0 = arith.constant 0 : i32
    %c0_i32_1 = arith.constant 0 : i32
    return %c0_i32, %c0_i32_0 : i32, i32
  }
  func.func @transform_3(%arg0: i32) -> (i32, i32) {
    %c0_i32 = arith.constant 0 : i32
    %c0_i32_0 = arith.constant 0 : i32
    %c0_i32_1 = arith.constant 0 : i32
    return %c0_i32, %c0_i32_0 : i32, i32
  }
  func.func @transform_4(%arg0: i32) -> (i32, i32, i32) {
    %c0_i32 = arith.constant 0 : i32
    %c0_i32_0 = arith.constant 0 : i32
    %c0_i32_1 = arith.constant 0 : i32
    %c0_i32_2 = arith.constant 0 : i32
    return %c0_i32, %c0_i32_0, %c0_i32_1 : i32, i32, i32
  }
}

module attributes {stable_mosaic.version = 11 : i64} {
  func.func @_bn_lrelu_kernel(%arg0: i32, %arg1: memref<4x104x256xbf16, #tpu.memory_space<vmem>>, %arg2: memref<4x256x128xbf16, #tpu.memory_space<vmem>>, %arg3: memref<1x128xf32, #tpu.memory_space<vmem>>, %arg4: memref<1x128xf32, #tpu.memory_space<vmem>>, %arg5: memref<4x104x128xbf16, #tpu.memory_space<vmem>>) attributes {dimension_semantics = [#tpu.dimension_semantics<arbitrary>], iteration_bounds = array<i64: 1>, scalar_prefetch = 0 : i64, scratch_operands = 0 : i64, tpu.core_type = #tpu.core_type<tc>, window_params = [{pipeline_mode = #tpu.pipeline_mode<synchronous>, transform_indices = @transform_0, window_bounds = array<i64: 4, 104, 256>}, {pipeline_mode = #tpu.pipeline_mode<synchronous>, transform_indices = @transform_1, window_bounds = array<i64: 4, 256, 128>}, {pipeline_mode = #tpu.pipeline_mode<synchronous>, transform_indices = @transform_2, window_bounds = array<i64: 1, 128>}, {pipeline_mode = #tpu.pipeline_mode<synchronous>, transform_indices = @transform_3, window_bounds = array<i64: 1, 128>}, {pipeline_mode = #tpu.pipeline_mode<synchronous>, transform_indices = @transform_4, window_bounds = array<i64: 4, 104, 128>}]} {
    %c0 = arith.constant 0 : index
    %c0_0 = arith.constant 0 : index
    %c0_1 = arith.constant 0 : index
    %0 = vector.load %arg1[%c0, %c0_0, %c0_1] : memref<4x104x256xbf16, #tpu.memory_space<vmem>>, vector<4x104x256xbf16>
    %c0_2 = arith.constant 0 : index
    %c0_3 = arith.constant 0 : index
    %c0_4 = arith.constant 0 : index
    %1 = vector.load %arg2[%c0_2, %c0_3, %c0_4] : memref<4x256x128xbf16, #tpu.memory_space<vmem>>, vector<4x256x128xbf16>
    "tpu.trace_start"() <{level = 10 : i32, message = "gmk,gkn->gmn"}> : () -> ()
    %cst = arith.constant dense<0.000000e+00> : vector<4x104x128xf32>
    %2 = tpu.matmul %0, %1, %cst {dimension_numbers = #tpu.dot_dimension_numbers<[2], [1], [1], [2], [0, 0, 0, 1, 1, 2], [0], [0]>} : vector<4x104x256xbf16>, vector<4x256x128xbf16>, vector<4x104x128xf32> -> vector<4x104x128xf32>
    "tpu.trace_stop"() : () -> ()
    %cst_5 = arith.constant dense<0.000000e+00> : vector<128xf32>
    %3 = vector.multi_reduction <add>, %2, %cst_5 [0, 1] : vector<4x104x128xf32> to vector<128xf32>
    %4 = vector.shape_cast %3 : vector<128xf32> to vector<1x1x128xf32>
    %5 = arith.mulf %2, %2 : vector<4x104x128xf32>
    %cst_6 = arith.constant dense<0.000000e+00> : vector<128xf32>
    %6 = vector.multi_reduction <add>, %5, %cst_6 [0, 1] : vector<4x104x128xf32> to vector<128xf32>
    %7 = vector.shape_cast %6 : vector<128xf32> to vector<1x1x128xf32>
    %cst_7 = arith.constant 0.00255102036 : f32
    %8 = vector.broadcast %cst_7 : f32 to vector<1x1x128xf32>
    %9 = arith.mulf %4, %8 : vector<1x1x128xf32>
    %cst_8 = arith.constant 0.00255102036 : f32
    %10 = vector.broadcast %cst_8 : f32 to vector<1x1x128xf32>
    %11 = arith.mulf %7, %10 : vector<1x1x128xf32>
    %12 = arith.mulf %9, %9 : vector<1x1x128xf32>
    %13 = arith.subf %11, %12 : vector<1x1x128xf32>
    %cst_9 = arith.constant 0.000000e+00 : f32
    %14 = vector.broadcast %cst_9 : f32 to vector<1x1x128xf32>
    %15 = arith.maximumf %13, %14 : vector<1x1x128xf32>
    %c0_10 = arith.constant 0 : index
    %c0_11 = arith.constant 0 : index
    %16 = vector.load %arg3[%c0_10, %c0_11] : memref<1x128xf32, #tpu.memory_space<vmem>>, vector<1x128xf32>
    %cst_12 = arith.constant 9.99999974E-6 : f32
    %17 = vector.broadcast %cst_12 : f32 to vector<1x1x128xf32>
    %18 = arith.addf %15, %17 : vector<1x1x128xf32>
    %19 = math.rsqrt %18 : vector<1x1x128xf32>
    %20 = vector.shape_cast %16 : vector<1x128xf32> to vector<1x1x128xf32>
    %21 = arith.mulf %20, %19 : vector<1x1x128xf32>
    %c0_13 = arith.constant 0 : index
    %c0_14 = arith.constant 0 : index
    %22 = vector.load %arg4[%c0_13, %c0_14] : memref<1x128xf32, #tpu.memory_space<vmem>>, vector<1x128xf32>
    %23 = arith.mulf %9, %21 : vector<1x1x128xf32>
    %24 = vector.shape_cast %22 : vector<1x128xf32> to vector<1x1x128xf32>
    %25 = arith.subf %24, %23 : vector<1x1x128xf32>
    %26 = vector.broadcast %21 : vector<1x1x128xf32> to vector<4x104x128xf32>
    %27 = arith.mulf %2, %26 : vector<4x104x128xf32>
    %28 = vector.broadcast %25 : vector<1x1x128xf32> to vector<4x104x128xf32>
    %29 = arith.addf %27, %28 : vector<4x104x128xf32>
    %cst_15 = arith.constant 2.000000e-01 : f32
    %30 = vector.broadcast %cst_15 : f32 to vector<4x104x128xf32>
    %31 = arith.mulf %30, %29 : vector<4x104x128xf32>
    %32 = arith.maximumf %29, %31 : vector<4x104x128xf32>
    %33 = arith.truncf %32 : vector<4x104x128xf32> to vector<4x104x128xbf16>
    %c0_16 = arith.constant 0 : index
    %c0_17 = arith.constant 0 : index
    %c0_18 = arith.constant 0 : index
    %34 = vector.load %arg5[%c0_16, %c0_17, %c0_18] : memref<4x104x128xbf16, #tpu.memory_space<vmem>>, vector<4x104x128xbf16>
    tpu.vector_store %arg5[%c0_16, %c0_17, %c0_18], %33 {strides = array<i32>} : memref<4x104x128xbf16, #tpu.memory_space<vmem>>, vector<4x104x128xbf16>,
    return
  }
  func.func @transform_0(%arg0: i32) -> (i32, i32, i32) {
    %c0_i32 = arith.constant 0 : i32
    %c0_i32_0 = arith.constant 0 : i32
    %c0_i32_1 = arith.constant 0 : i32
    %c0_i32_2 = arith.constant 0 : i32
    return %c0_i32, %c0_i32_0, %c0_i32_1 : i32, i32, i32
  }
  func.func @transform_1(%arg0: i32) -> (i32, i32, i32) {
    %c0_i32 = arith.constant 0 : i32
    %c0_i32_0 = arith.constant 0 : i32
    %c0_i32_1 = arith.constant 0 : i32
    %c0_i32_2 = arith.constant 0 : i32
    return %c0_i32, %c0_i32_0, %c0_i32_1 : i32, i32, i32
  }
  func.func @transform_2(%arg0: i32) -> (i32, i32) {
    %c0_i32 = arith.constant 0 : i32
    %c0_i32_0 = arith.constant 0 : i32
    %c0_i32_1 = arith.constant 0 : i32
    return %c0_i32, %c0_i32_0 : i32, i32
  }
  func.func @transform_3(%arg0: i32) -> (i32, i32) {
    %c0_i32 = arith.constant 0 : i32
    %c0_i32_0 = arith.constant 0 : i32
    %c0_i32_1 = arith.constant 0 : i32
    return %c0_i32, %c0_i32_0 : i32, i32
  }
  func.func @transform_4(%arg0: i32) -> (i32, i32, i32) {
    %c0_i32 = arith.constant 0 : i32
    %c0_i32_0 = arith.constant 0 : i32
    %c0_i32_1 = arith.constant 0 : i32
    %c0_i32_2 = arith.constant 0 : i32
    return %c0_i32, %c0_i32_0, %c0_i32_1 : i32, i32, i32
  }
}

module attributes {stable_mosaic.version = 11 : i64} {
  func.func @_bias_tanh_kernel(%arg0: i32, %arg1: memref<392x288xbf16, #tpu.memory_space<vmem>>, %arg2: memref<288x128xbf16, #tpu.memory_space<vmem>>, %arg3: memref<1x128xf32, #tpu.memory_space<vmem>>, %arg4: memref<392x128xf32, #tpu.memory_space<vmem>>) attributes {dimension_semantics = [#tpu.dimension_semantics<parallel>], iteration_bounds = array<i64: 1>, scalar_prefetch = 0 : i64, scratch_operands = 0 : i64, tpu.core_type = #tpu.core_type<tc>, window_params = [{transform_indices = @transform_0, window_bounds = array<i64: 392, 288>}, {pipeline_mode = #tpu.pipeline_mode<synchronous>, transform_indices = @transform_1, window_bounds = array<i64: 288, 128>}, {pipeline_mode = #tpu.pipeline_mode<synchronous>, transform_indices = @transform_2, window_bounds = array<i64: 1, 128>}, {transform_indices = @transform_3, window_bounds = array<i64: 392, 128>}]} {
    %c0 = arith.constant 0 : index
    %c0_0 = arith.constant 0 : index
    %0 = vector.load %arg1[%c0, %c0_0] : memref<392x288xbf16, #tpu.memory_space<vmem>>, vector<392x288xbf16>
    %c0_1 = arith.constant 0 : index
    %c0_2 = arith.constant 0 : index
    %1 = vector.load %arg2[%c0_1, %c0_2] : memref<288x128xbf16, #tpu.memory_space<vmem>>, vector<288x128xbf16>
    %cst = arith.constant dense<0.000000e+00> : vector<392x128xf32>
    %2 = tpu.matmul %0, %1, %cst {dimension_numbers = #tpu.dot_dimension_numbers<[1], [0], [0], [1], [0, 0, 1, 1], [], []>} : vector<392x288xbf16>, vector<288x128xbf16>, vector<392x128xf32> -> vector<392x128xf32>
    %c0_3 = arith.constant 0 : index
    %c0_4 = arith.constant 0 : index
    %3 = vector.load %arg3[%c0_3, %c0_4] : memref<1x128xf32, #tpu.memory_space<vmem>>, vector<1x128xf32>
    %4 = vector.broadcast %3 : vector<1x128xf32> to vector<392x128xf32>
    %5 = arith.addf %2, %4 : vector<392x128xf32>
    %6 = math.tanh %5 : vector<392x128xf32>
    %c0_5 = arith.constant 0 : index
    %c0_6 = arith.constant 0 : index
    %7 = vector.load %arg4[%c0_5, %c0_6] : memref<392x128xf32, #tpu.memory_space<vmem>>, vector<392x128xf32>
    tpu.vector_store %arg4[%c0_5, %c0_6], %6 {strides = array<i32>} : memref<392x128xf32, #tpu.memory_space<vmem>>, vector<392x128xf32>,
    return
  }
  func.func @transform_0(%arg0: i32) -> (i32, i32) {
    %c0_i32 = arith.constant 0 : i32
    %c0_i32_0 = arith.constant 0 : i32
    return %arg0, %c0_i32 : i32, i32
  }
  func.func @transform_1(%arg0: i32) -> (i32, i32) {
    %c0_i32 = arith.constant 0 : i32
    %c0_i32_0 = arith.constant 0 : i32
    %c0_i32_1 = arith.constant 0 : i32
    return %c0_i32, %c0_i32_0 : i32, i32
  }
  func.func @transform_2(%arg0: i32) -> (i32, i32) {
    %c0_i32 = arith.constant 0 : i32
    %c0_i32_0 = arith.constant 0 : i32
    %c0_i32_1 = arith.constant 0 : i32
    return %c0_i32, %c0_i32_0 : i32, i32
  }
  func.func @transform_3(%arg0: i32) -> (i32, i32) {
    %c0_i32 = arith.constant 0 : i32
    %c0_i32_0 = arith.constant 0 : i32
    return %arg0, %c0_i32 : i32, i32
  }
}

</mosaic_0001>

<bundles_post_ra>
// kernel: squeeze.1
= control target key start
LH: loop header
LB: loop body
LE: loop exit
PB: predicated region body
PF: predicated region fallthrough
CT: control target
= control target key end

     0   :  { %vm211_vm0 = vcmask 523264   ;;  %s605_s0 = inlined_call_operand.vmem [shape: bf16[1,98,64], index: 0, kind: input, shape index: {}]   ;;  %s606_s1 = inlined_call_operand.vmem [shape: bf16[2,7,7,64], index: 1, kind: output, shape index: {}]  }
   0x1   :  { %v433_v0 = vld [vmem:[%s605_s0 + $0x30] sm:$0xf]  ;;  %v517_v1 = vld [vmem:[%s605_s0 + $0x28] sm:$0xff]   ;;  %v518_v2 = vld [vmem:[%s605_s0 + $0x20] sm:$0xff]  }
   0x2   :  { %v18_v3 = vunpack.c.l.bf16 %v433_v0  ;;  %v460_v4 = vunpack.c.l.bf16 %v517_v1  ;;  %v461_v5 = vunpack.c.h.bf16 %v517_v1  ;;  %v464_v6 = vunpack.c.l.bf16 %v518_v2  ;;  %v519_v7 = vld [vmem:[%s605_s0 + $0x18] sm:$0xff]   ;;  %v520_v8 = vld [vmem:[%s605_s0 + $0x10] sm:$0xff]   ;;  %v521_v9 = vld [vmem:[%s605_s0 + $0x8] sm:$0xff]  }
   0x3   :  { %v465_v10 = vunpack.c.h.bf16 %v518_v2  ;;  %v468_v11 = vunpack.c.l.bf16 %v519_v7  ;;  %v469_v12 = vunpack.c.h.bf16 %v519_v7  ;;  %v472_v13 = vunpack.c.l.bf16 %v520_v8  ;;  %v479_v14 = vld [vmem:[%s605_s0] sm:$0xff]  }
   0x4   :  { %21 = vst [vmem:[#allocation1 + $0x30] sm:$0xff] %v18_v3  ;;  %v473_v15 = vunpack.c.h.bf16 %v520_v8  ;;  %v476_v16 = vunpack.c.l.bf16 %v521_v9  ;;  %v477_v17 = vunpack.c.h.bf16 %v521_v9  ;;  %v480_v18 = vunpack.c.l.bf16 %v479_v14  ;;  %268 = vst.msk [vmem:[#allocation0 + $0x49] sm:$0x3f] %vm211_vm0, %v464_v6  }
   0x5   :  { %270 = vst.msk [vmem:[#allocation0 + $0x4a] sm:$0xc0] %vm211_vm0, %v464_v6   ;;  %282 = vst.msk [vmem:[#allocation0 + $0x5b] sm:$0xf] %vm211_vm0, %v460_v4   ;;  %v481_v19 = vunpack.c.h.bf16 %v479_v14 }
   0x6   :  { %284 = vst.msk [vmem:[#allocation0 + $0x5c] sm:$0xf0] %vm211_vm0, %v460_v4   ;;  %289 = vst.msk [vmem:[#allocation0 + $0x64] sm:$0x7] %vm211_vm0, %v461_v5  }
   0x7   :  { %291 = vst.msk [vmem:[#allocation0 + $0x65] sm:$0xf8] %vm211_vm0, %v461_v5   ;;  %240 = vst.msk [vmem:[#allocation0 + $0x24] sm:$0x7] %vm211_vm0, %v472_v13  }
   0x8   :  { %242 = vst.msk [vmem:[#allocation0 + $0x25] sm:$0xf8] %vm211_vm0, %v472_v13   ;;  %254 = vst.msk [vmem:[#allocation0 + $0x36] ss:$2 sm:$0x3] %vm211_vm0, %v468_v11  }
   0x9   :  { %256 = vst.msk [vmem:[#allocation0 + $0x37] sm:$0xfc] %vm211_vm0, %v468_v11   ;;  %261 = vst.msk [vmem:[#allocation0 + $0x40] sm:$0x7f] %vm211_vm0, %v469_v12  }
   0xa   :  { %263 = vst.msk [vmem:[#allocation0 + $0x41] sm:$0x80] %vm211_vm0, %v469_v12   ;;  %275 = vst.msk [vmem:[#allocation0 + $0x52] sm:$0x1f] %vm211_vm0, %v465_v10  }
   0xb   :  { %277 = vst.msk [vmem:[#allocation0 + $0x53] sm:$0xe0] %vm211_vm0, %v465_v10   ;;  %212 = vst.msk [vmem:[#allocation0] sm:$0x7f] %vm211_vm0, %v480_v18   ;;  %v293_v20 = vld [vmem:[#allocation1 + $0x30] sm:$0x3]  }
   0xc   :  { %214 = vst.msk [vmem:[#allocation0 + $0x1] sm:$0x80] %vm211_vm0, %v480_v18   ;;  %226 = vst.msk [vmem:[#allocation0 + $0x12] sm:$0x1f] %vm211_vm0, %v476_v16  }
   0xd   :  { %228 = vst.msk [vmem:[#allocation0 + $0x13] sm:$0xe0] %vm211_vm0, %v476_v16   ;;  %233 = vst.msk [vmem:[#allocation0 + $0x1b] sm:$0xf] %vm211_vm0, %v477_v17   ;;  %v395_v39 = vld [vmem:[#allocation0 + $0x60] sm:$0xff] }
   0xe   :  { %235 = vst.msk [vmem:[#allocation0 + $0x1c] sm:$0xf0] %vm211_vm0, %v477_v17   ;;  %247 = vst.msk [vmem:[#allocation0 + $0x2d] sm:$0x3] %vm211_vm0, %v473_v15  }
   0xf   :  { %249 = vst.msk [vmem:[#allocation0 + $0x2e] sm:$0xfc] %vm211_vm0, %v473_v15   ;;  %219 = vst.msk [vmem:[#allocation0 + $0x9] sm:$0x3f] %vm211_vm0, %v481_v19  }
  0x10   :  { %221 = vst.msk [vmem:[#allocation0 + $0xa] sm:$0xc0] %vm211_vm0, %v481_v19   ;;  %296 = vst.msk [vmem:[#allocation0 + $0x6d] sm:$0x3] %vm211_vm0, %v293_v20   ;;  %v355_v21 = vld [vmem:[#allocation0 + $0x38] sm:$0xff]  ;;  %v363_v22 = vld [vmem:[#allocation0 + $0x40] sm:$0xff] }
  0x11   :  { %v371_v23 = vld [vmem:[#allocation0 + $0x48] sm:$0xff]  ;;  %v379_v35 = vld [vmem:[#allocation0 + $0x50] sm:$0xff] }
  0x12   :  { %v302_v24 = vld [vmem:[#allocation0] sm:$0xff]  ;;  %v505_v27 = vpack.c.bf16 %v371_v23, %v363_v22  ;;  %v387_v36 = vld [vmem:[#allocation0 + $0x58] sm:$0xff] }
  0x13   :  { %v510_v38 = vpack.c.bf16 %v387_v36, %v379_v35 }
  0x14   :  { %v323_v25 = vld [vmem:[#allocation0 + $0x18] sm:$0xff]  ;;  %525 = vst [vmem:[%s606_s1 + $0x20] sm:$0xff] %v505_v27  }
  0x15   :  { %v331_v26 = vld [vmem:[#allocation0 + $0x20] sm:$0xff]  ;;  %v339_v30 = vld [vmem:[#allocation0 + $0x28] sm:$0xff]  ;;  %526 = vst [vmem:[%s606_s1 + $0x28] sm:$0xff] %v510_v38  }
  0x16   :  { %v308_v28 = vld [vmem:[#allocation0 + $0x8] sm:$0xff]  ;;  %v495_v33 = vpack.c.bf16 %v339_v30, %v331_v26  ;;  %v347_v34 = vld [vmem:[#allocation0 + $0x30] sm:$0xff] }
  0x17   :  { %v315_v29 = vld [vmem:[#allocation0 + $0x10] sm:$0xff]  ;;  %v485_v31 = vpack.c.bf16 %v308_v28, %v302_v24  ;;  %v500_v37 = vpack.c.bf16 %v355_v21, %v347_v34  ;;  %v403_v40 = vld [vmem:[#allocation0 + $0x68] sm:$0xff] }
  0x18   :  { %v490_v32 = vpack.c.bf16 %v323_v25, %v315_v29  ;;  %523 = vst [vmem:[%s606_s1 + $0x10] sm:$0xff] %v495_v33   ;;  %v515_v41 = vpack.c.bf16 %v403_v40, %v395_v39 }
  0x19   :  { %486 = vst [vmem:[%s606_s1] sm:$0xff] %v485_v31   ;;  %524 = vst [vmem:[%s606_s1 + $0x18] sm:$0xff] %v500_v37  }
  0x1a   :  { %522 = vst [vmem:[%s606_s1 + $0x8] sm:$0xff] %v490_v32   ;;  %527 = vst [vmem:[%s606_s1 + $0x30] sm:$0xff] %v515_v41  }

// kernel: a_call__.4
= control target key start
LH: loop header
LB: loop body
LE: loop exit
PB: predicated region body
PF: predicated region fallthrough
CT: control target
= control target key end

     0   :  { %9 = vsyncpa [#allocation3], 0  ;;  %s1902_s0 = inlined_call_operand.vmem [shape: bf16[16,8,26], index: 0, kind: input, shape index: {}]   ;;  %s1903_s1 = inlined_call_operand.hbm [shape: bf16[16,26,128], index: 1, kind: input, shape index: {}]   ;;  %s1904_s2 = inlined_call_operand.hbm [shape: f32[1,128], index: 2, kind: input, shape index: {}]   ;;  %s1905_s3 = inlined_call_operand.hbm [shape: f32[1,128], index: 3, kind: input, shape index: {}]   ;;  %s1906_s4 = inlined_call_operand.vmem [shape: bf16[16,8,128], index: 4, kind: output, shape index: {}]  }
   0x1   :  { %10 = vsyncpa [#allocation5], 0  ;;  %s1609_s15 = smov [#allocation4]   ;;  %s1610_s17 = smov [#allocation2]  }
   0x2   :  { %s31_s16 = sshll.u32 %s1609_s15, 4  ;;  %s18_s18 = sshll.u32 %s1610_s17, 4  ;;  %s32_s16 = int_to_ptr.vmem [resolvable:$true] %s31_s16  ;;  %s19_s18 = int_to_ptr.vmem [resolvable:$true] %s18_s18 }
   0x3   :  { %s1553_s19 = scalar_lea.vmem %s32_s16, 16  ;;  %s1557_s20 = scalar_lea.vmem %s32_s16, 32 }
   0x4   :  { %p1554_p0 = scmp.ne.s32.totalorder %s32_s16, %s1553_s19  ;;  %p1558_p1 = scmp.lt.s32.totalorder %s32_s16, %s32_s16 }
   0x5   :  { %p1559_p2 = scmp.lt.s32.totalorder %s1557_s20, %s1553_s19 }
   0x7   :  { %p1560_p3 = por %p1559_p2, %p1558_p1 }
   0x9   :  { %p1561_p4 = pnand %p1560_p3, %p1554_p0 }
   0xb   :  { %1564 = shalt.err (!%p1561_p4)
}
   0xc   :  { %34 = dma.hbm_to_vmem [thread:$0]  %s1904_s2, 16, %s32_s16, [#allocation5]  }
   0xd   :  { %s1573_s23 = scalar_lea.vmem %s19_s18, 4096  ;;  %p1578_p6 = scmp.lt.s32.totalorder %s19_s18, %s19_s18 }
   0xe   :  { %p1574_p5 = scmp.ne.s32.totalorder %s19_s18, %s1573_s23  ;;  %p1579_p7 = scmp.lt.s32.totalorder %s1573_s23, %s1573_s23 }
  0x10   :  { %p1580_p8 = por %p1579_p7, %p1578_p6 }
  0x12   :  { %p1581_p9 = pnand %p1580_p8, %p1574_p5 }
  0x14   :  { %1584 = shalt.err (!%p1581_p9)
}
  0x15   :  { %s1611_s24 = smov 64   ;;  %s1612_s25 = smov 4  }
  0x16   :  { %24 = dma.hbm_to_vmem [thread:$0]  %s1903_s1, 4096, %s19_s18, [#allocation3], %s1611_s24, %s1611_s24, %s1612_s25  }
  0x17   :  { %s1613_s28 = smov [#allocation6]  }
  0x18   :  { %s41_s29 = sshll.u32 %s1613_s28, 4  ;;  %s42_s29 = int_to_ptr.vmem [resolvable:$true] %s41_s29 }
  0x19   :  { %s1593_s30 = scalar_lea.vmem %s42_s29, 16  ;;  %s1597_s5 = scalar_lea.vmem %s42_s29, 32 }
  0x1a   :  { %p1594_p10 = scmp.ne.s32.totalorder %s42_s29, %s1593_s30  ;;  %p1598_p11 = scmp.lt.s32.totalorder %s42_s29, %s42_s29 }
  0x1b   :  { %p1599_p12 = scmp.lt.s32.totalorder %s1597_s5, %s1593_s30 }
  0x1d   :  { %p1600_p13 = por %p1599_p12, %p1598_p11 }
  0x1f   :  { %p1601_p0 = pnand %p1600_p13, %p1594_p10 }
  0x21   :  { %1604 = shalt.err (!%p1601_p0)
}
  0x22   :  { %44 = dma.hbm_to_vmem [thread:$0]  %s1905_s3, 16, %s42_s29, [#allocation5]  }
  0x23   :  { %1605 = dma.done.wait [#allocation3], 4096  }
  0x24   :  { %1606 = vsyncadd [#allocation3], 4294963200 }
  0x25   :  { %1607 = dma.done.wait [#allocation5], 32  }
  0x26   :  { %1608 = vsyncadd [#allocation5], 4294967264  ;;  %v1614_v0 = vmov 0.0   ;;  %vm1615_vm0 = vmmov 0   ;;  %vm150_vm1 = vcmask 1044480   ;;  %v1513_v5 = vld [vmem:[#allocation2] sm:$0xff]  }
  0x27   :  { %1376 = vmatprep.subr.bf16.mxu0 %v1614_v0  ;;  %1384 = vmatprep.subr.bf16.mxu1 %v1614_v0  ;;  %v1511_v1 = vld [vmem:[#allocation2 + $0x8] sm:$0x1f]   ;;  %v1512_v2 = vld [vmem:[#allocation2 + $0x18] sm:$0x1f]   ;;  %v1514_v6 = vld [vmem:[#allocation2 + $0x10] sm:$0xff]   ;;  %vm146_vm2 = vcmask 211968  }
  0x28   :  { %1380 = vmatprep.mubr.msk.bf16.mxu0 %vm1615_vm0, %v1614_v0  ;;  %1388 = vmatprep.mubr.msk.bf16.mxu1 %vm1615_vm0, %v1614_v0  ;;  %v152_v3 = vsel %vm150_vm1, %v1511_v1, 0  ;;  %v209_v4 = vsel %vm150_vm1, %v1512_v2, 0  ;;  %v1515_v7 = vld [vmem:[#allocation2 + $0x28] sm:$0x1f]   ;;  %v1516_v8 = vld [vmem:[#allocation2 + $0x38] sm:$0x1f]  }
  0x29   :  { %1377 = vmatpush3.bf16.msra.mxu0 %v152_v3  ;;  %1385 = vmatpush3.bf16.msra.mxu1 %v209_v4  ;;  %v55_v9 = vld [vmem:[%s1902_s0] sm:$0xf]  ;;  %v56_v10 = vld [vmem:[%s1902_s0 + $0x4] sm:$0xf]  ;;  %v266_v11 = vsel %vm150_vm1, %v1515_v7, 0  ;;  %v323_v12 = vsel %vm150_vm1, %v1516_v8, 0 }
  0x2a   :  { %1378 = vmatprep.subr.bf16.mxu0 %v1614_v0  ;;  %1386 = vmatprep.subr.bf16.mxu1 %v1614_v0  ;;  %v1517_v13 = vld [vmem:[#allocation2 + $0x20] sm:$0xff]   ;;  %v1518_v14 = vld [vmem:[#allocation2 + $0x30] sm:$0xff]   ;;  %v1519_v15 = vld [vmem:[#allocation2 + $0x48] sm:$0x1f]  }
  0x2b   :  { %v1520_v16 = vld [vmem:[#allocation2 + $0x58] sm:$0x1f]   ;;  %v57_v17 = vld [vmem:[%s1902_s0 + $0x8] sm:$0xf]  ;;  %v58_v18 = vld [vmem:[%s1902_s0 + $0xc] sm:$0xf] }
  0x2c   :  { %v380_v19 = vsel %vm150_vm1, %v1519_v15, 0  ;;  %v437_v20 = vsel %vm150_vm1, %v1520_v16, 0  ;;  %v1521_v21 = vld [vmem:[#allocation2 + $0x40] sm:$0xff]   ;;  %v1522_v22 = vld [vmem:[#allocation2 + $0x50] sm:$0xff]   ;;  %v1523_v23 = vld [vmem:[#allocation2 + $0x68] sm:$0x1f]  }
  0x2d   :  { %1379 = vmatpush3.bf16.msra.mxu0 %v1513_v5  ;;  %1387 = vmatpush3.bf16.msra.mxu1 %v1514_v6  ;;  %v1524_v24 = vld [vmem:[#allocation2 + $0x78] sm:$0x1f]   ;;  %v59_v25 = vld [vmem:[%s1902_s0 + $0x10] sm:$0xf]  ;;  %v60_v26 = vld [vmem:[%s1902_s0 + $0x14] sm:$0xf] }
  0x2e   :  { %1392 = vmatprep.subr.bf16.mxu0 %v1614_v0  ;;  %1400 = vmatprep.subr.bf16.mxu1 %v1614_v0  ;;  %v494_v27 = vsel %vm150_vm1, %v1523_v23, 0  ;;  %v551_v28 = vsel %vm150_vm1, %v1524_v24, 0  ;;  %v1525_v29 = vld [vmem:[#allocation2 + $0x60] sm:$0xff]   ;;  %v1526_v30 = vld [vmem:[#allocation2 + $0x70] sm:$0xff]   ;;  %v1527_v31 = vld [vmem:[#allocation2 + $0x88] sm:$0x1f]  }
  0x2f   :  { %v1528_v32 = vld [vmem:[#allocation2 + $0x98] sm:$0x1f]   ;;  %v608_v35 = vsel %vm150_vm1, %v1527_v31, 0  ;;  %v1529_v37 = vld [vmem:[#allocation2 + $0x80] sm:$0xff]   ;;  %v1530_v38 = vld [vmem:[#allocation2 + $0x90] sm:$0xff]  }
  0x30   :  { %1381 = vmatmul.mubr.msk.bf16.vlgmr.msra.gmra.mxu0 %vm146_vm2, %v55_v9  ;;  %1389 = vmatmul.mubr.msk.bf16.vlgmr.msra.gmra.mxu1 %vm146_vm2, %v56_v10  ;;  %v61_v33 = vld [vmem:[%s1902_s0 + $0x18] sm:$0xf]  ;;  %v62_v34 = vld [vmem:[%s1902_s0 + $0x1c] sm:$0xf]  ;;  %v665_v36 = vsel %vm150_vm1, %v1528_v32, 0  ;;  %v1533_v45 = vld [vmem:[#allocation2 + $0xa0] sm:$0xff]  }
  0x31   :  { %1393 = vmatpush3.bf16.msra.mxu0 %v266_v11  ;;  %1401 = vmatpush3.bf16.msra.mxu1 %v323_v12  ;;  %v1531_v39 = vld [vmem:[#allocation2 + $0xa8] sm:$0x1f]   ;;  %v1532_v40 = vld [vmem:[#allocation2 + $0xb8] sm:$0x1f]   ;;  %v63_v41 = vld [vmem:[%s1902_s0 + $0x20] sm:$0xf] }
  0x32   :  { %1394 = vmatprep.subr.bf16.mxu0 %v1614_v0  ;;  %1402 = vmatprep.subr.bf16.mxu1 %v1614_v0  ;;  %v64_v42 = vld [vmem:[%s1902_s0 + $0x24] sm:$0xf]  ;;  %v722_v43 = vsel %vm150_vm1, %v1531_v39, 0  ;;  %v779_v44 = vsel %vm150_vm1, %v1532_v40, 0  ;;  %v1534_v46 = vld [vmem:[#allocation2 + $0xb0] sm:$0xff]  }
  0x33   :  { %1396 = vmatprep.mubr.msk.bf16.mxu0 %vm1615_vm0, %v1614_v0  ;;  %1404 = vmatprep.mubr.msk.bf16.mxu1 %vm1615_vm0, %v1614_v0  ;;  %v1535_v47 = vld [vmem:[#allocation2 + $0xc8] sm:$0x1f]   ;;  %v1536_v48 = vld [vmem:[#allocation2 + $0xd8] sm:$0x1f]   ;;  %v1537_v53 = vld [vmem:[#allocation2 + $0xc0] sm:$0xff]  }
  0x34   :  { %v65_v49 = vld [vmem:[%s1902_s0 + $0x28] sm:$0xf]  ;;  %v66_v50 = vld [vmem:[%s1902_s0 + $0x2c] sm:$0xf]  ;;  %v836_v51 = vsel %vm150_vm1, %v1535_v47, 0  ;;  %v893_v52 = vsel %vm150_vm1, %v1536_v48, 0 }
  0x35   :  { %1395 = vmatpush3.bf16.msra.mxu0 %v1517_v13  ;;  %1403 = vmatpush3.bf16.msra.mxu1 %v1518_v14  ;;  %v1538_v54 = vld [vmem:[#allocation2 + $0xd0] sm:$0xff]   ;;  %v1539_v55 = vld [vmem:[#allocation2 + $0xe8] sm:$0x1f]   ;;  %v1540_v56 = vld [vmem:[#allocation2 + $0xf8] sm:$0x1f]  }
  0x36   :  { %1408 = vmatprep.subr.bf16.mxu0 %v1614_v0  ;;  %1416 = vmatprep.subr.bf16.mxu1 %v1614_v0  ;;  %v67_v57 = vld [vmem:[%s1902_s0 + $0x30] sm:$0xf]  ;;  %v68_v58 = vld [vmem:[%s1902_s0 + $0x34] sm:$0xf]  ;;  %v950_v59 = vsel %vm150_vm1, %v1539_v55, 0  ;;  %v1007_v60 = vsel %vm150_vm1, %v1540_v56, 0 }
  0x37   :  { %v1541_v61 = vld [vmem:[#allocation2 + $0xe0] sm:$0xff]   ;;  %v1542_v62 = vld [vmem:[#allocation2 + $0xf0] sm:$0xff]   ;;  %v69_v63 = vld [vmem:[%s1902_s0 + $0x38] sm:$0xf] }
  0x38   :  { %1397 = vmatmul.mubr.msk.bf16.vlgmr.msra.gmra.mxu0 %vm146_vm2, %v57_v17  ;;  %1405 = vmatmul.mubr.msk.bf16.vlgmr.msra.gmra.mxu1 %vm146_vm2, %v58_v18  ;;  %v70_v1 = vld [vmem:[%s1902_s0 + $0x3c] sm:$0xf] }
  0x39   :  { %1409 = vmatpush3.bf16.msra.mxu0 %v380_v19  ;;  %1417 = vmatpush3.bf16.msra.mxu1 %v437_v20 }
  0x3a   :  { %1410 = vmatprep.subr.bf16.mxu0 %v1614_v0  ;;  %1418 = vmatprep.subr.bf16.mxu1 %v1614_v0 }
  0x3b   :  { %1412 = vmatprep.mubr.msk.bf16.mxu0 %vm1615_vm0, %v1614_v0  ;;  %1420 = vmatprep.mubr.msk.bf16.mxu1 %vm1615_vm0, %v1614_v0 }
  0x3d   :  { %1411 = vmatpush3.bf16.msra.mxu0 %v1521_v21  ;;  %1419 = vmatpush3.bf16.msra.mxu1 %v1522_v22 }
  0x3e   :  { %1424 = vmatprep.subr.bf16.mxu0 %v1614_v0  ;;  %1432 = vmatprep.subr.bf16.mxu1 %v1614_v0 }
  0x40   :  { %1413 = vmatmul.mubr.msk.bf16.vlgmr.msra.gmra.mxu0 %vm146_vm2, %v59_v25  ;;  %1421 = vmatmul.mubr.msk.bf16.vlgmr.msra.gmra.mxu1 %vm146_vm2, %v60_v26 }
  0x41   :  { %1425 = vmatpush3.bf16.msra.mxu0 %v494_v27  ;;  %1433 = vmatpush3.bf16.msra.mxu1 %v551_v28 }
  0x42   :  { %1426 = vmatprep.subr.bf16.mxu0 %v1614_v0  ;;  %1434 = vmatprep.subr.bf16.mxu1 %v1614_v0 }
  0x43   :  { %1428 = vmatprep.mubr.msk.bf16.mxu0 %vm1615_vm0, %v1614_v0  ;;  %1436 = vmatprep.mubr.msk.bf16.mxu1 %vm1615_vm0, %v1614_v0 }
  0x45   :  { %1427 = vmatpush3.bf16.msra.mxu0 %v1525_v29  ;;  %1435 = vmatpush3.bf16.msra.mxu1 %v1526_v30 }
  0x46   :  { %1440 = vmatprep.subr.bf16.mxu0 %v1614_v0  ;;  %1448 = vmatprep.subr.bf16.mxu1 %v1614_v0 }
  0x48   :  { %1429 = vmatmul.mubr.msk.bf16.vlgmr.msra.gmra.mxu0 %vm146_vm2, %v61_v33  ;;  %1437 = vmatmul.mubr.msk.bf16.vlgmr.msra.gmra.mxu1 %vm146_vm2, %v62_v34 }
  0x49   :  { %1441 = vmatpush3.bf16.msra.mxu0 %v608_v35  ;;  %1449 = vmatpush3.bf16.msra.mxu1 %v665_v36 }
  0x4a   :  { %1442 = vmatprep.subr.bf16.mxu0 %v1614_v0  ;;  %1450 = vmatprep.subr.bf16.mxu1 %v1614_v0 }
  0x4b   :  { %1444 = vmatprep.mubr.msk.bf16.mxu0 %vm1615_vm0, %v1614_v0  ;;  %1452 = vmatprep.mubr.msk.bf16.mxu1 %vm1615_vm0, %v1614_v0 }
  0x4d   :  { %1443 = vmatpush3.bf16.msra.mxu0 %v1529_v37  ;;  %1451 = vmatpush3.bf16.msra.mxu1 %v1530_v38 }
  0x4e   :  { %1456 = vmatprep.subr.bf16.mxu0 %v1614_v0  ;;  %1464 = vmatprep.subr.bf16.mxu1 %v1614_v0 }
  0x50   :  { %1445 = vmatmul.mubr.msk.bf16.vlgmr.msra.gmra.mxu0 %vm146_vm2, %v63_v41  ;;  %1453 = vmatmul.mubr.msk.bf16.vlgmr.msra.gmra.mxu1 %vm146_vm2, %v64_v42 }
  0x51   :  { %1457 = vmatpush3.bf16.msra.mxu0 %v722_v43  ;;  %1465 = vmatpush3.bf16.msra.mxu1 %v779_v44 }
  0x52   :  { %1458 = vmatprep.subr.bf16.mxu0 %v1614_v0  ;;  %1466 = vmatprep.subr.bf16.mxu1 %v1614_v0 }
  0x53   :  { %1460 = vmatprep.mubr.msk.bf16.mxu0 %vm1615_vm0, %v1614_v0  ;;  %1468 = vmatprep.mubr.msk.bf16.mxu1 %vm1615_vm0, %v1614_v0 }
  0x55   :  { %1459 = vmatpush3.bf16.msra.mxu0 %v1533_v45  ;;  %1467 = vmatpush3.bf16.msra.mxu1 %v1534_v46 }
  0x56   :  { %1472 = vmatprep.subr.bf16.mxu0 %v1614_v0  ;;  %1480 = vmatprep.subr.bf16.mxu1 %v1614_v0 }
  0x58   :  { %1461 = vmatmul.mubr.msk.bf16.vlgmr.msra.gmra.mxu0 %vm146_vm2, %v65_v49  ;;  %1469 = vmatmul.mubr.msk.bf16.vlgmr.msra.gmra.mxu1 %vm146_vm2, %v66_v50 }
  0x59   :  { %1473 = vmatpush3.bf16.msra.mxu0 %v836_v51  ;;  %1481 = vmatpush3.bf16.msra.mxu1 %v893_v52 }
  0x5a   :  { %1474 = vmatprep.subr.bf16.mxu0 %v1614_v0  ;;  %1482 = vmatprep.subr.bf16.mxu1 %v1614_v0 }
  0x5b   :  { %1476 = vmatprep.mubr.msk.bf16.mxu0 %vm1615_vm0, %v1614_v0  ;;  %1484 = vmatprep.mubr.msk.bf16.mxu1 %vm1615_vm0, %v1614_v0 }
  0x5d   :  { %1475 = vmatpush3.bf16.msra.mxu0 %v1537_v53  ;;  %1483 = vmatpush3.bf16.msra.mxu1 %v1538_v54 }
  0x5e   :  { %1488 = vmatprep.subr.bf16.mxu0 %v1614_v0  ;;  %1496 = vmatprep.subr.bf16.mxu1 %v1614_v0 }
  0x60   :  { %1477 = vmatmul.mubr.msk.bf16.vlgmr.msra.gmra.mxu0 %vm146_vm2, %v67_v57  ;;  %1485 = vmatmul.mubr.msk.bf16.vlgmr.msra.gmra.mxu1 %vm146_vm2, %v68_v58 }
  0x61   :  { %1489 = vmatpush3.bf16.msra.mxu0 %v950_v59  ;;  %1497 = vmatpush3.bf16.msra.mxu1 %v1007_v60 }
  0x62   :  { %1490 = vmatprep.subr.bf16.mxu0 %v1614_v0  ;;  %1498 = vmatprep.subr.bf16.mxu1 %v1614_v0 }
  0x63   :  { %1492 = vmatprep.mubr.msk.bf16.mxu0 %vm1615_vm0, %v1614_v0  ;;  %1500 = vmatprep.mubr.msk.bf16.mxu1 %vm1615_vm0, %v1614_v0 }
  0x65   :  { %1491 = vmatpush3.bf16.msra.mxu0 %v1541_v61  ;;  %1499 = vmatpush3.bf16.msra.mxu1 %v1542_v62 }
  0x68   :  { %1493 = vmatmul.mubr.msk.bf16.vlgmr.msra.gmra.mxu0 %vm146_vm2, %v69_v63  ;;  %1501 = vmatmul.mubr.msk.bf16.vlgmr.msra.gmra.mxu1 %vm146_vm2, %v70_v1 }
  0xf0   :  { %v1794_v2 = vpop.f32.mrf.mxu0  ;;  %v1796_v3 = vpop.f32.mrf.mxu1 }
  0xf1   :  { %v1070_v18 = vmul.f32 %v1794_v2, %v1794_v2  ;;  %v1071_v19 = vmul.f32 %v1796_v3, %v1796_v3  ;;  %v1049_v22 = vadd.f32 %v1796_v3, %v1794_v2 }
  0xf2   :  { %v1382_v4 = vpop.f32.mrf.mxu0  ;;  %v1390_v0 = vpop.f32.mrf.mxu1 }
  0xf3   :  { %v1086_v26 = vadd.f32 %v1071_v19, %v1070_v18 }
  0xf4   :  { %v191_v5 = vpop.f32.mrf.mxu0  ;;  %v248_v6 = vpop.f32.mrf.mxu1 }
  0xf6   :  { %v1383_v7 = vpop.f32.mrf.mxu0  ;;  %v1391_v8 = vpop.f32.mrf.mxu1 }
  0xf8   :  { %v1798_v9 = vpop.f32.mrf.mxu0  ;;  %v1800_v10 = vpop.f32.mrf.mxu1 }
  0xf9   :  { %v1072_v23 = vmul.f32 %v1798_v9, %v1798_v9  ;;  %v1050_v27 = vadd.f32 %v1049_v22, %v1798_v9  ;;  %v1073_v31 = vmul.f32 %v1800_v10, %v1800_v10 }
  0xfa   :  { %v1398_v11 = vpop.f32.mrf.mxu0  ;;  %v1406_v12 = vpop.f32.mrf.mxu1 }
  0xfb   :  { %v1087_v30 = vadd.f32 %v1086_v26, %v1072_v23  ;;  %v1051_v34 = vadd.f32 %v1050_v27, %v1800_v10 }
  0xfc   :  { %v305_v13 = vpop.f32.mrf.mxu0  ;;  %v362_v14 = vpop.f32.mrf.mxu1 }
  0xfd   :  { %v1088_v38 = vadd.f32 %v1087_v30, %v1073_v31 }
  0xfe   :  { %v1399_v15 = vpop.f32.mrf.mxu0  ;;  %v1407_v16 = vpop.f32.mrf.mxu1 }
 0x100   :  { %v1802_v17 = vpop.f32.mrf.mxu0  ;;  %v1808_v20 = vpop.f32.mrf.mxu1 }
 0x101   :  { %v1074_v35 = vmul.f32 %v1802_v17, %v1802_v17  ;;  %v1052_v39 = vadd.f32 %v1051_v34, %v1802_v17  ;;  %v1075_v43 = vmul.f32 %v1808_v20, %v1808_v20 }
 0x102   :  { %v1414_v21 = vpop.f32.mrf.mxu0  ;;  %v1422_v24 = vpop.f32.mrf.mxu1 }
 0x103   :  { %v1089_v42 = vadd.f32 %v1088_v38, %v1074_v35  ;;  %v1053_v46 = vadd.f32 %v1052_v39, %v1808_v20 }
 0x104   :  { %v419_v25 = vpop.f32.mrf.mxu0  ;;  %v476_v28 = vpop.f32.mrf.mxu1 }
 0x105   :  { %v1090_v50 = vadd.f32 %v1089_v42, %v1075_v43 }
 0x106   :  { %v1415_v29 = vpop.f32.mrf.mxu0  ;;  %v1423_v32 = vpop.f32.mrf.mxu1 }
 0x108   :  { %v1817_v33 = vpop.f32.mrf.mxu0  ;;  %v1822_v36 = vpop.f32.mrf.mxu1 }
 0x109   :  { %v1076_v47 = vmul.f32 %v1817_v33, %v1817_v33  ;;  %v1054_v51 = vadd.f32 %v1053_v46, %v1817_v33  ;;  %v1077_v55 = vmul.f32 %v1822_v36, %v1822_v36 }
 0x10a   :  { %v1430_v37 = vpop.f32.mrf.mxu0  ;;  %v1438_v40 = vpop.f32.mrf.mxu1 }
 0x10b   :  { %v1091_v54 = vadd.f32 %v1090_v50, %v1076_v47  ;;  %v1055_v58 = vadd.f32 %v1054_v51, %v1822_v36 }
 0x10c   :  { %v533_v41 = vpop.f32.mrf.mxu0  ;;  %v590_v44 = vpop.f32.mrf.mxu1 }
 0x10d   :  { %v1092_v62 = vadd.f32 %v1091_v54, %v1077_v55 }
 0x10e   :  { %v1431_v45 = vpop.f32.mrf.mxu0  ;;  %v1439_v48 = vpop.f32.mrf.mxu1 }
 0x110   :  { %v1830_v49 = vpop.f32.mrf.mxu0  ;;  %v1833_v52 = vpop.f32.mrf.mxu1 }
 0x111   :  { %v1078_v59 = vmul.f32 %v1830_v49, %v1830_v49  ;;  %v1056_v63 = vadd.f32 %v1055_v58, %v1830_v49  ;;  %v1079_v5 = vmul.f32 %v1833_v52, %v1833_v52 }
 0x112   :  { %v1446_v53 = vpop.f32.mrf.mxu0  ;;  %v1454_v56 = vpop.f32.mrf.mxu1 }
 0x113   :  { %v1093_v0 = vadd.f32 %v1092_v62, %v1078_v59  ;;  %v1057_v8 = vadd.f32 %v1056_v63, %v1833_v52 }
 0x114   :  { %v647_v57 = vpop.f32.mrf.mxu0  ;;  %v704_v60 = vpop.f32.mrf.mxu1 }
 0x115   :  { %v1094_v14 = vadd.f32 %v1093_v0, %v1079_v5 }
 0x116   :  { %v1447_v61 = vpop.f32.mrf.mxu0  ;;  %v1455_v1 = vpop.f32.mrf.mxu1 }
 0x118   :  { %v1841_v4 = vpop.f32.mrf.mxu0  ;;  %v1845_v6 = vpop.f32.mrf.mxu1 }
 0x119   :  { %v1080_v11 = vmul.f32 %v1841_v4, %v1841_v4  ;;  %v1058_v15 = vadd.f32 %v1057_v8, %v1841_v4  ;;  %v1081_v21 = vmul.f32 %v1845_v6, %v1845_v6 }
 0x11a   :  { %v1462_v7 = vpop.f32.mrf.mxu0  ;;  %v1470_v12 = vpop.f32.mrf.mxu1 }
 0x11b   :  { %v1095_v19 = vadd.f32 %v1094_v14, %v1080_v11  ;;  %v1059_v24 = vadd.f32 %v1058_v15, %v1845_v6 }
 0x11c   :  { %v761_v13 = vpop.f32.mrf.mxu0  ;;  %v818_v16 = vpop.f32.mrf.mxu1 }
 0x11d   :  { %v1096_v28 = vadd.f32 %v1095_v19, %v1081_v21  ;;  %v1112_v21 = vld [vmem:[#allocation4] sm:$0x1] }
 0x11e   :  { %v1463_v18 = vpop.f32.mrf.mxu0  ;;  %v1471_v22 = vpop.f32.mrf.mxu1 }
 0x11f   :  { %v1120_v18 = vlaneseq }
 0x120   :  { %v1853_v23 = vpop.f32.mrf.mxu0  ;;  %v1858_v26 = vpop.f32.mrf.mxu1 }
 0x121   :  { %v1082_v25 = vmul.f32 %v1853_v23, %v1853_v23  ;;  %v1060_v29 = vadd.f32 %v1059_v24, %v1853_v23  ;;  %v1083_v34 = vmul.f32 %v1858_v26, %v1858_v26  ;;  %v1121_v19 = vshrl.u32 %v1120_v18, 7 }
 0x122   :  { %v1478_v27 = vpop.f32.mrf.mxu0  ;;  %v1486_v30 = vpop.f32.mrf.mxu1 }
 0x123   :  { %v1097_v32 = vadd.f32 %v1096_v28, %v1082_v25  ;;  %v1061_v38 = vadd.f32 %v1060_v29, %v1858_v26  ;;  %v1122_v22 = vsub.s32 0, %v1121_v19  ;;  %v1116_v27 = vld [vmem:[#allocation6] sm:$0x1] }
 0x124   :  { %v875_v31 = vpop.f32.mrf.mxu0  ;;  %v932_v35 = vpop.f32.mrf.mxu1 }
 0x125   :  { %v1098_v41 = vadd.f32 %v1097_v32, %v1083_v34 }
 0x126   :  { %v1479_v37 = vpop.f32.mrf.mxu0  ;;  %v1487_v39 = vpop.f32.mrf.mxu1 }
 0x128   :  { %v986_v40 = vpop.f32.mrf.mxu0  ;;  %v1043_v44 = vpop.f32.mrf.mxu1 }
 0x129   :  { %v1062_v42 = vadd.f32 %v1061_v38, %v986_v40  ;;  %v1084_v43 = vmul.f32 %v986_v40, %v986_v40  ;;  %v1085_v45 = vmul.f32 %v1043_v44, %v1043_v44 }
 0x12a   :  { %v1494_v46 = vpop.f32.mrf.mxu0  ;;  %v1502_v50 = vpop.f32.mrf.mxu1 }
 0x12b   :  { %v1099_v47 = vadd.f32 %v1098_v41, %v1084_v43  ;;  %v1063_v48 = vadd.f32 %v1062_v42, %v1043_v44 }
 0x12c   :  { %v989_v51 = vpop.f32.mrf.mxu0  ;;  %v1046_v55 = vpop.f32.mrf.mxu1 }
 0x12d   :  { %v1064_v53 = vrot.slane %v1063_v48, 4  ;;  %v1100_v54 = vadd.f32 %v1099_v47, %v1085_v45 }
 0x12e   :  { %v1495_v56 = vpop.f32.mrf.mxu0  ;;  %v1503_v59 = vpop.f32.mrf.mxu1 }
 0x12f   :  { %v1065_v57 = vadd.f32 %v1064_v53, %v1063_v48  ;;  %v1101_v58 = vrot.slane %v1100_v54, 4 }
 0x131   :  { %v1066_v60 = vrot.slane %v1065_v57, 2  ;;  %v1102_v61 = vadd.f32 %v1101_v58, %v1100_v54 }
 0x133   :  { %v1067_v62 = vadd.f32 %v1066_v60, %v1065_v57  ;;  %v1103_v63 = vrot.slane %v1102_v61, 2 }
 0x135   :  { %v1068_v1 = vrot.slane %v1067_v62, 1  ;;  %v1104_v0 = vadd.f32 %v1103_v63, %v1102_v61 }
 0x137   :  { %v1069_v5 = vadd.f32 %v1068_v1, %v1067_v62  ;;  %v1105_v7 = vrot.slane %v1104_v0, 1 }
 0x139   :  { %v1106_v8 = vadd.f32 %v1105_v7, %v1104_v0  ;;  %v1107_v11 = vmul.f32 0.03125, %v1069_v5 }
 0x13b   :  { %v1108_v12 = vmul.f32 0.03125, %v1106_v8  ;;  %v1109_v13 = vmul.f32 %v1107_v11, %v1107_v11 }
 0x13d   :  { %v1110_v14 = vsub.f32 %v1108_v12, %v1109_v13 }
 0x13f   :  { %v1111_v15 = vmax.f32 %v1110_v14, 0.0 }
 0x141   :  { %v1113_v16 = vadd.f32 1e-05, %v1111_v15 }
 0x143   :  { %1543 = vrsqrt.f32 %v1113_v16 }
 0x150   :  { %v1544_v24 = vpop.eup %1543 }
 0x151   :  { %v1115_v25 = vmul.f32 %v1544_v24, %v1112_v21 }
 0x153   :  { %v1117_v28 = vmul.f32 %v1115_v25, %v1107_v11  ;;  %v1123_v29 = vrot.slane %v1115_v25, %v1122_v22 }
 0x155   :  { %v1118_v30 = vsub.f32 %v1116_v27, %v1117_v28  ;;  %v1125_v31 = vmul.f32 %v1123_v29, %v1794_v2  ;;  %v1126_v32 = vmul.f32 %v1123_v29, %v1796_v3  ;;  %v1127_v34 = vmul.f32 %v1123_v29, %v1798_v9 }
 0x156   :  { %v1128_v35 = vmul.f32 %v1123_v29, %v1800_v10  ;;  %v1129_v37 = vmul.f32 %v1123_v29, %v1802_v17  ;;  %v1130_v38 = vmul.f32 %v1123_v29, %v1808_v20  ;;  %v1131_v39 = vmul.f32 %v1123_v29, %v1817_v33 }
 0x157   :  { %v1132_v41 = vmul.f32 %v1123_v29, %v1822_v36  ;;  %v1133_v42 = vmul.f32 %v1123_v29, %v1830_v49  ;;  %v1134_v43 = vmul.f32 %v1123_v29, %v1833_v52  ;;  %v1145_v45 = vrot.slane %v1118_v30, %v1122_v22 }
 0x158   :  { %v1135_v2 = vmul.f32 %v1123_v29, %v1841_v4  ;;  %v1136_v3 = vmul.f32 %v1123_v29, %v1845_v6  ;;  %v1137_v9 = vmul.f32 %v1123_v29, %v1853_v23  ;;  %v1138_v10 = vmul.f32 %v1123_v29, %v1858_v26 }
 0x159   :  { %v1139_v17 = vmul.f32 %v1123_v29, %v986_v40  ;;  %v1147_v46 = vadd.f32 %v1145_v45, %v1125_v31  ;;  %v1148_v20 = vadd.f32 %v1145_v45, %v1126_v32  ;;  %v1149_v47 = vadd.f32 %v1145_v45, %v1127_v34 }
 0x15a   :  { %v1140_v33 = vmul.f32 %v1123_v29, %v1043_v44  ;;  %v1150_v48 = vadd.f32 %v1145_v45, %v1128_v35  ;;  %v1151_v36 = vadd.f32 %v1145_v45, %v1129_v37  ;;  %v1152_v50 = vadd.f32 %v1145_v45, %v1130_v38 }
 0x15b   :  { %v1153_v49 = vadd.f32 %v1145_v45, %v1131_v39  ;;  %v1154_v51 = vadd.f32 %v1145_v45, %v1132_v41  ;;  %v1155_v52 = vadd.f32 %v1145_v45, %v1133_v42  ;;  %v1156_v53 = vadd.f32 %v1145_v45, %v1134_v43 }
 0x15c   :  { %v1157_v54 = vadd.f32 %v1145_v45, %v1135_v2  ;;  %v1158_v4 = vadd.f32 %v1145_v45, %v1136_v3  ;;  %v1159_v55 = vadd.f32 %v1145_v45, %v1137_v9  ;;  %v1160_v6 = vadd.f32 %v1145_v45, %v1138_v10 }
 0x15d   :  { %v1161_v56 = vadd.f32 %v1145_v45, %v1139_v17  ;;  %v1163_v23 = vmul.f32 0.2, %v1147_v46  ;;  %v1164_v57 = vmul.f32 0.2, %v1148_v20  ;;  %v1165_v26 = vmul.f32 0.2, %v1149_v47 }
 0x15e   :  { %v1162_v40 = vadd.f32 %v1145_v45, %v1140_v33  ;;  %v1166_v58 = vmul.f32 0.2, %v1150_v48  ;;  %v1167_v59 = vmul.f32 0.2, %v1151_v36  ;;  %v1168_v60 = vmul.f32 0.2, %v1152_v50 }
 0x15f   :  { %v1169_v44 = vmul.f32 0.2, %v1153_v49  ;;  %v1170_v61 = vmul.f32 0.2, %v1154_v51  ;;  %v1171_v62 = vmul.f32 0.2, %v1155_v52  ;;  %v1179_v63 = vmax.f32 %v1147_v46, %v1163_v23 }
 0x160   :  { %v1172_v1 = vmul.f32 0.2, %v1156_v53  ;;  %v1173_v0 = vmul.f32 0.2, %v1157_v54  ;;  %v1174_v5 = vmul.f32 0.2, %v1158_v4  ;;  %v1180_v7 = vmax.f32 %v1148_v20, %v1164_v57 }
 0x161   :  { %v1175_v8 = vmul.f32 0.2, %v1159_v55  ;;  %v1176_v11 = vmul.f32 0.2, %v1160_v6  ;;  %v1177_v12 = vmul.f32 0.2, %v1161_v56  ;;  %v1181_v13 = vmax.f32 %v1149_v47, %v1165_v26 }
 0x162   :  { %v1178_v14 = vmul.f32 0.2, %v1162_v40  ;;  %v1182_v15 = vmax.f32 %v1150_v48, %v1166_v58  ;;  %v1183_v16 = vmax.f32 %v1151_v36, %v1167_v59  ;;  %v1184_v18 = vmax.f32 %v1152_v50, %v1168_v60 }
 0x163   :  { %v1185_v19 = vmax.f32 %v1153_v49, %v1169_v44  ;;  %v1186_v21 = vmax.f32 %v1154_v51, %v1170_v61  ;;  %v1187_v22 = vmax.f32 %v1155_v52, %v1171_v62  ;;  %v1188_v24 = vmax.f32 %v1156_v53, %v1172_v1 }
 0x164   :  { %v1189_v25 = vmax.f32 %v1157_v54, %v1173_v0  ;;  %v1190_v27 = vmax.f32 %v1158_v4, %v1174_v5  ;;  %v1191_v28 = vmax.f32 %v1159_v55, %v1175_v8  ;;  %v1192_v29 = vmax.f32 %v1160_v6, %v1176_v11 }
 0x165   :  { %v1193_v30 = vmax.f32 %v1161_v56, %v1177_v12  ;;  %v1194_v31 = vmax.f32 %v1162_v40, %v1178_v14  ;;  %v1284_v32 = vpack.c.bf16 %v1180_v7, %v1179_v63  ;;  %v1289_v34 = vpack.c.bf16 %v1182_v15, %v1181_v13 }
 0x166   :  { %v1294_v35 = vpack.c.bf16 %v1184_v18, %v1183_v16  ;;  %v1299_v37 = vpack.c.bf16 %v1186_v21, %v1185_v19  ;;  %v1304_v38 = vpack.c.bf16 %v1188_v24, %v1187_v22  ;;  %v1309_v39 = vpack.c.bf16 %v1190_v27, %v1189_v25 }
 0x167   :  { %1285 = vst [vmem:[%s1906_s4] sm:$0xff] %v1284_v32   ;;  %1321 = vst [vmem:[%s1906_s4 + $0x8] sm:$0xff] %v1289_v34   ;;  %v1314_v41 = vpack.c.bf16 %v1192_v29, %v1191_v28  ;;  %v1319_v42 = vpack.c.bf16 %v1194_v31, %v1193_v30 }
 0x168   :  { %1322 = vst [vmem:[%s1906_s4 + $0x10] sm:$0xff] %v1294_v35   ;;  %1323 = vst [vmem:[%s1906_s4 + $0x18] sm:$0xff] %v1299_v37  }
 0x169   :  { %1324 = vst [vmem:[%s1906_s4 + $0x20] sm:$0xff] %v1304_v38   ;;  %1325 = vst [vmem:[%s1906_s4 + $0x28] sm:$0xff] %v1309_v39  }
 0x16a   :  { %1326 = vst [vmem:[%s1906_s4 + $0x30] sm:$0xff] %v1314_v41   ;;  %1327 = vst [vmem:[%s1906_s4 + $0x38] sm:$0xff] %v1319_v42  }
 0x16b   :  { %1231 = vsyncpa [#allocation3], 1 }
 0x16c   :  { %1232 = vsyncpa [#allocation5], 1 }

// kernel: a_call__.5
= control target key start
LH: loop header
LB: loop body
LE: loop exit
PB: predicated region body
PF: predicated region fallthrough
CT: control target
= control target key end

     0   :  { %vm2269_vm0 = vmmov 0   ;;  %s2878_s1 = inlined_call_operand.vmem [shape: bf16[1,1152,128], index: 1, kind: input, shape index: {}]   ;;  %s2879_s0 = inlined_call_operand.vmem [shape: bf16[1,104,1152], index: 0, kind: input, shape index: {}]   ;;  %s2880_s2 = inlined_call_operand.vmem [shape: f32[1,128], index: 2, kind: input, shape index: {}]   ;;  %s2881_s3 = inlined_call_operand.vmem [shape: f32[1,128], index: 3, kind: input, shape index: {}]   ;;  %s2882_s4 = inlined_call_operand.vmem [shape: bf16[1,104,128], index: 4, kind: output, shape index: {}]  }
   0x1   :  { %v2107_v0 = vld [vmem:[%s2878_s1 + $0x78] sm:$0xff]   ;;  %v2109_v2 = vld [vmem:[%s2878_s1 + $0x70] sm:$0xff]   ;;  %v2111_v4 = vld [vmem:[%s2878_s1 + $0x68] sm:$0xff]  }
   0x2   :  { %v2108_v1 = vld [vmem:[%s2878_s1 + $0x38] sm:$0xff]   ;;  %2089 = vmatprep.subr.bf16.mxu1 %v2107_v0  ;;  %1798 = vmatprep.subr.bf16.mxu0 %v2107_v0  ;;  %v2110_v3 = vld [vmem:[%s2878_s1 + $0x30] sm:$0xff]   ;;  %v2112_v5 = vld [vmem:[%s2878_s1 + $0x28] sm:$0xff]  }
   0x3   :  { %2097 = vmatpush3.bf16.msra.mxu1 %v2108_v1  ;;  %1799 = vmatpush3.bf16.msra.mxu0 %v2108_v1  ;;  %v2113_v6 = vld [vmem:[%s2878_s1 + $0x60] sm:$0xff]   ;;  %v2115_v8 = vld [vmem:[%s2878_s1 + $0x58] sm:$0xff]   ;;  %v2117_v10 = vld [vmem:[%s2878_s1 + $0x50] sm:$0xff]  }
   0x4   :  { %2090 = vmatprep.subr.bf16.mxu1 %v2109_v2  ;;  %1800 = vmatprep.subr.bf16.mxu0 %v2109_v2  ;;  %v2114_v7 = vld [vmem:[%s2878_s1 + $0x20] sm:$0xff]   ;;  %v2116_v9 = vld [vmem:[%s2878_s1 + $0x18] sm:$0xff]   ;;  %v2118_v13 = vld [vmem:[%s2878_s1 + $0x10] sm:$0xff]  }
   0x5   :  { %v2125_v11 = vld [vmem:[%s2879_s0 + $0x124] ss:$36 sps:$4 sm:$0xff]   ;;  %v2129_v20 = vld [vmem:[%s2878_s1 + $0xf8] sm:$0xff]   ;;  %v2133_v24 = vld [vmem:[%s2878_s1 + $0xf0] sm:$0xff]  }
   0x6   :  { %v2128_v12 = vld [vmem:[%s2879_s0 + $0x4] ss:$36 sps:$4 sm:$0xff]   ;;  %1031 = vmatprep.mubr.bf16.mxu1 %v2125_v11  ;;  %v2131_v21 = vld [vmem:[%s2878_s1 + $0x178] sm:$0xff]   ;;  %v2135_v25 = vld [vmem:[%s2878_s1 + $0x170] sm:$0xff]  }
   0x7   :  { %2098 = vmatpush3.bf16.msra.mxu1 %v2110_v3  ;;  %1801 = vmatpush3.bf16.msra.mxu0 %v2110_v3  ;;  %v2119_v14 = vld [vmem:[%s2878_s1 + $0x48] sm:$0xff]   ;;  %v2121_v16 = vld [vmem:[%s2878_s1 + $0x40] sm:$0xff]   ;;  %v2130_v22 = vld [vmem:[%s2878_s1 + $0xb8] sm:$0xff]  }
   0x8   :  { %2091 = vmatprep.subr.bf16.mxu1 %v2111_v4  ;;  %1802 = vmatprep.subr.bf16.mxu0 %v2111_v4  ;;  %v2120_v15 = vld [vmem:[%s2878_s1 + $0x8] sm:$0xff]   ;;  %v2122_v17 = vld [vmem:[%s2878_s1] sm:$0xff]   ;;  %v2132_v23 = vld [vmem:[%s2878_s1 + $0x138] sm:$0xff]  }
   0x9   :  { %999 = vmatprep.mubr.bf16.mxu0 %v2128_v12  ;;  %v2123_v18 = vld [vmem:[%s2879_s0 + $0x120] ss:$36 sps:$4 sm:$0xff]   ;;  %v2137_v26 = vld [vmem:[%s2879_s0 + $0x4c] ss:$36 sps:$4 sm:$0xff]   ;;  %v2151_v39 = vld [vmem:[%s2879_s0 + $0x94] ss:$36 sps:$4 sm:$0xff]  }
   0xa   :  { %v2126_v19 = vld [vmem:[%s2879_s0] ss:$36 sps:$4 sm:$0xff]   ;;  %v2134_v27 = vld [vmem:[%s2878_s1 + $0xb0] sm:$0xff]   ;;  %v2139_v30 = vld [vmem:[%s2878_s1 + $0xe8] sm:$0xff]  }
   0xb   :  { %2099 = vmatpush3.bf16.msra.mxu1 %v2112_v5  ;;  %1803 = vmatpush3.bf16.msra.mxu0 %v2112_v5  ;;  %v2143_v28 = vld [vmem:[%s2879_s0 + $0x16c] ss:$36 sps:$4 sm:$0xff]   ;;  %v2147_v36 = vld [vmem:[%s2878_s1 + $0xe0] sm:$0xff]   ;;  %v2153_v43 = vld [vmem:[%s2878_s1 + $0xd8] sm:$0xff]  }
   0xc   :  { %2092 = vmatprep.subr.bf16.mxu1 %v2113_v6  ;;  %1804 = vmatprep.subr.bf16.mxu0 %v2113_v6  ;;  %v2136_v29 = vld [vmem:[%s2878_s1 + $0x130] sm:$0xff]   ;;  %v2140_v31 = vld [vmem:[%s2879_s0 + $0x48] ss:$36 sps:$4 sm:$0xff]   ;;  %v2149_v37 = vld [vmem:[%s2878_s1 + $0x160] sm:$0xff]  }
   0xd   :  { %v2142_v32 = vld [vmem:[%s2878_s1 + $0x168] sm:$0xff]   ;;  %v2148_v38 = vld [vmem:[%s2878_s1 + $0xa0] sm:$0xff]   ;;  %v78_v40 = vld [vmem:[%s2879_s0 + $0x1b0] sm:$0xff] }
   0xe   :  { %v2141_v33 = vld [vmem:[%s2878_s1 + $0xa8] sm:$0xff]   ;;  %v2150_v41 = vld [vmem:[%s2878_s1 + $0x120] sm:$0xff]   ;;  %v1657_v42 = vcombine.high %v78_v40, %v78_v40  ;;  %v2154_v44 = vld [vmem:[%s2879_s0 + $0x90] ss:$36 sps:$4 sm:$0xff]   ;;  %v1656_v48 = vcombine.low %v78_v40, %v78_v40 }
   0xf   :  { %2100 = vmatpush3.bf16.msra.mxu1 %v2114_v7  ;;  %1805 = vmatpush3.bf16.msra.mxu0 %v2114_v7  ;;  %v2146_v34 = vld [vmem:[%s2879_s0 + $0x168] ss:$36 sps:$4 sm:$0xff]   ;;  %v2156_v45 = vld [vmem:[%s2878_s1 + $0x158] sm:$0xff]   ;;  %v2160_v49 = vld [vmem:[%s2878_s1 + $0xd0] sm:$0xff]   ;;  %v2268_v7 = vmov 0.0  }
  0x10   :  { %2093 = vmatprep.subr.bf16.mxu1 %v2115_v8  ;;  %1806 = vmatprep.subr.bf16.mxu0 %v2115_v8  ;;  %v2145_v35 = vld [vmem:[%s2878_s1 + $0x128] sm:$0xff]   ;;  %v2155_v46 = vld [vmem:[%s2878_s1 + $0x98] sm:$0xff]   ;;  %v2162_v50 = vld [vmem:[%s2878_s1 + $0x150] sm:$0xff]  }
  0x11   :  { %v2158_v47 = vld [vmem:[%s2878_s1 + $0x118] sm:$0xff]   ;;  %v2161_v51 = vld [vmem:[%s2878_s1 + $0x90] sm:$0xff]   ;;  %v2166_v54 = vld [vmem:[%s2878_s1 + $0xc8] sm:$0xff]  }
  0x12   :  { %v2164_v52 = vld [vmem:[%s2879_s0 + $0xdc] ss:$36 sps:$4 sm:$0xff]   ;;  %v2163_v53 = vld [vmem:[%s2878_s1 + $0x110] sm:$0xff]   ;;  %v2169_v56 = vld [vmem:[%s2878_s1 + $0x148] sm:$0xff]  }
  0x13   :  { %2101 = vmatpush3.bf16.msra.mxu1 %v2116_v9  ;;  %1807 = vmatpush3.bf16.msra.mxu0 %v2116_v9  ;;  %v2167_v55 = vld [vmem:[%s2879_s0 + $0xd8] ss:$36 sps:$4 sm:$0xff]   ;;  %v2168_v57 = vld [vmem:[%s2878_s1 + $0x88] sm:$0xff]   ;;  %v2171_v59 = vld [vmem:[%s2878_s1 + $0xc0] sm:$0xff]  }
  0x14   :  { %2094 = vmatprep.subr.bf16.mxu1 %v2117_v10  ;;  %1808 = vmatprep.subr.bf16.mxu0 %v2117_v10  ;;  %v2170_v58 = vld [vmem:[%s2878_s1 + $0x108] sm:$0xff]   ;;  %v2173_v60 = vld [vmem:[%s2878_s1 + $0x140] sm:$0xff]   ;;  %v2180_v63 = vld [vmem:[%s2879_s0 + $0x14] ss:$36 sps:$4 sm:$0xff]  }
  0x15   :  { %v2177_v61 = vld [vmem:[%s2879_s0 + $0xc] ss:$36 sps:$4 sm:$0xff]   ;;  %v2172_v62 = vld [vmem:[%s2878_s1 + $0x80] sm:$0xff]   ;;  %v2181_v3 = vld [vmem:[%s2878_s1 + $0x1f8] sm:$0xff]  }
  0x16   :  { %v2174_v0 = vld [vmem:[%s2878_s1 + $0x100] sm:$0xff]   ;;  %v2175_v1 = vld [vmem:[%s2879_s0 + $0x8] ss:$36 sps:$4 sm:$0xff]   ;;  %v2178_v2 = vld [vmem:[%s2879_s0 + $0x10] ss:$36 sps:$4 sm:$0xff]  }
  0x17   :  { %2102 = vmatpush3.bf16.msra.mxu1 %v2118_v13  ;;  %1809 = vmatpush3.bf16.msra.mxu0 %v2118_v13  ;;  %v2182_v4 = vld [vmem:[%s2878_s1 + $0x1b8] sm:$0xff]   ;;  %v2185_v6 = vld [vmem:[%s2878_s1 + $0x1f0] sm:$0xff]   ;;  %v2192_v11 = vld [vmem:[%s2878_s1 + $0x1e8] sm:$0xff]  }
  0x18   :  { %2095 = vmatprep.subr.bf16.mxu1 %v2119_v14  ;;  %1810 = vmatprep.subr.bf16.mxu0 %v2119_v14  ;;  %v2183_v5 = vld [vmem:[%s2879_s0 + $0x54] ss:$36 sps:$4 sm:$0xff]   ;;  %v2188_v9 = vld [vmem:[%s2879_s0 + $0x5c] ss:$36 sps:$4 sm:$0xff]  }
  0x19   :  { %v2186_v8 = vld [vmem:[%s2878_s1 + $0x238] sm:$0xff]   ;;  %v2190_v10 = vld [vmem:[%s2878_s1 + $0x1b0] sm:$0xff]  }
  0x1a   :  { %v2193_v12 = vld [vmem:[%s2878_s1 + $0x230] sm:$0xff]   ;;  %v2191_v14 = vld [vmem:[%s2879_s0 + $0x58] ss:$36 sps:$4 sm:$0xff]  }
  0x1b   :  { %2103 = vmatpush3.bf16.msra.mxu1 %v2120_v15  ;;  %1811 = vmatpush3.bf16.msra.mxu0 %v2120_v15  ;;  %v2187_v13 = vld [vmem:[%s2879_s0 + $0x50] ss:$36 sps:$4 sm:$0xff]   ;;  %v2194_v15 = vld [vmem:[%s2879_s0 + $0x9c] ss:$36 sps:$4 sm:$0xff]  }
  0x1c   :  { %2096 = vmatprep.subr.bf16.mxu1 %v2121_v16  ;;  %1812 = vmatprep.subr.bf16.mxu0 %v2121_v16  ;;  %v2196_v16 = vld [vmem:[%s2878_s1 + $0x1a8] sm:$0xff]   ;;  %v2222_v40 = vld [vmem:[%s2879_s0 + $0x174] ss:$36 sps:$4 sm:$0xff]  }
  0x1f   :  { %2104 = vmatpush3.bf16.msra.mxu1 %v2122_v17  ;;  %1813 = vmatpush3.bf16.msra.mxu0 %v2122_v17  ;;  %v2198_v17 = vld [vmem:[%s2879_s0 + $0xa4] ss:$36 sps:$4 sm:$0xff]  }
  0x20   :  { %1856 = vmatprep.subr.bf16.mxu1 %v2129_v20  ;;  %1914 = vmatprep.subr.bf16.mxu0 %v2131_v21  ;;  %v2203_v20 = vld [vmem:[%s2878_s1 + $0x1a0] sm:$0xff]   ;;  %v2197_v21 = vld [vmem:[%s2879_s0 + $0x98] ss:$36 sps:$4 sm:$0xff]  }
  0x22   :  { %1032 = vmatmul.mubr.bf16.vlgmr.msra.gmra.mxu1 %v2123_v18  ;;  %1000 = vmatmul.mubr.bf16.vlgmr.msra.gmra.mxu0 %v2126_v19  ;;  %v2201_v18 = vld [vmem:[%s2878_s1 + $0x1e0] sm:$0xff]   ;;  %v2202_v19 = vld [vmem:[%s2878_s1 + $0x228] sm:$0xff]  }
  0x23   :  { %1857 = vmatpush3.bf16.msra.mxu1 %v2130_v22  ;;  %1915 = vmatpush3.bf16.msra.mxu0 %v2132_v23  ;;  %v2200_v22 = vld [vmem:[%s2879_s0 + $0xa0] ss:$36 sps:$4 sm:$0xff]  }
  0x24   :  { %1858 = vmatprep.subr.bf16.mxu1 %v2133_v24  ;;  %1916 = vmatprep.subr.bf16.mxu0 %v2135_v25  ;;  %v2204_v23 = vld [vmem:[%s2879_s0 + $0xe4] ss:$36 sps:$4 sm:$0xff]   ;;  %v2207_v24 = vld [vmem:[%s2879_s0 + $0xec] ss:$36 sps:$4 sm:$0xff]   ;;  %v2210_v25 = vld [vmem:[%s2878_s1 + $0x1d8] sm:$0xff]  }
  0x25   :  { %1007 = vmatprep.mubr.bf16.mxu0 %v2137_v26  ;;  %1039 = vmatprep.mubr.bf16.mxu1 %v2143_v28  ;;  %v2211_v26 = vld [vmem:[%s2878_s1 + $0x220] sm:$0xff]  }
  0x26   :  { %v2206_v28 = vld [vmem:[%s2879_s0 + $0xe0] ss:$36 sps:$4 sm:$0xff]  }
  0x27   :  { %1859 = vmatpush3.bf16.msra.mxu1 %v2134_v27  ;;  %1917 = vmatpush3.bf16.msra.mxu0 %v2136_v29  ;;  %v2212_v27 = vld [vmem:[%s2878_s1 + $0x198] sm:$0xff]   ;;  %v2209_v29 = vld [vmem:[%s2879_s0 + $0xe8] ss:$36 sps:$4 sm:$0xff]  }
  0x28   :  { %1860 = vmatprep.subr.bf16.mxu1 %v2139_v30  ;;  %1918 = vmatprep.subr.bf16.mxu0 %v2142_v32  ;;  %v2219_v30 = vld [vmem:[%s2878_s1 + $0x1d0] sm:$0xff]  }
  0x29   :  { %v2221_v32 = vld [vmem:[%s2878_s1 + $0x190] sm:$0xff]  }
  0x2a   :  { %1008 = vmatmul.mubr.bf16.gmra.mxu0 %v2140_v31  ;;  %1040 = vmatmul.mubr.bf16.gmra.mxu1 %v2146_v34  ;;  %v2220_v31 = vld [vmem:[%s2878_s1 + $0x218] sm:$0xff]  }
  0x2b   :  { %1861 = vmatpush3.bf16.msra.mxu1 %v2141_v33  ;;  %1919 = vmatpush3.bf16.msra.mxu0 %v2145_v35  ;;  %v2213_v33 = vld [vmem:[%s2879_s0 + $0x12c] ss:$36 sps:$4 sm:$0xff]   ;;  %v2216_v34 = vld [vmem:[%s2879_s0 + $0x134] ss:$36 sps:$4 sm:$0xff]  }
  0x2c   :  { %1862 = vmatprep.subr.bf16.mxu1 %v2147_v36  ;;  %1920 = vmatprep.subr.bf16.mxu0 %v2149_v37  ;;  %v2228_v35 = vld [vmem:[%s2878_s1 + $0x1c8] sm:$0xff]   ;;  %v2229_v36 = vld [vmem:[%s2878_s1 + $0x210] sm:$0xff]  }
  0x2d   :  { %1015 = vmatprep.mubr.bf16.mxu0 %v2151_v39  ;;  %1047 = vmatprep.mubr.bf16.mxu1 %v1657_v42  ;;  %v2215_v37 = vld [vmem:[%s2879_s0 + $0x128] ss:$36 sps:$4 sm:$0xff]  }
  0x2e   :  { %v2230_v39 = vld [vmem:[%s2878_s1 + $0x188] sm:$0xff]  }
  0x2f   :  { %1863 = vmatpush3.bf16.msra.mxu1 %v2148_v38  ;;  %1921 = vmatpush3.bf16.msra.mxu0 %v2150_v41  ;;  %v2218_v38 = vld [vmem:[%s2879_s0 + $0x130] ss:$36 sps:$4 sm:$0xff]   ;;  %v2235_v41 = vld [vmem:[%s2878_s1 + $0x1c0] sm:$0xff]   ;;  %v2236_v42 = vld [vmem:[%s2878_s1 + $0x208] sm:$0xff]  }
  0x30   :  { %1864 = vmatprep.subr.bf16.mxu1 %v2153_v43  ;;  %1922 = vmatprep.subr.bf16.mxu0 %v2156_v45  ;;  %v2225_v43 = vld [vmem:[%s2879_s0 + $0x17c] ss:$36 sps:$4 sm:$0xff]  }
  0x31   :  { %v2238_v45 = vld [vmem:[%s2878_s1 + $0x200] sm:$0xff]  }
  0x32   :  { %1016 = vmatmul.mubr.bf16.gmra.mxu0 %v2154_v44  ;;  %1048 = vmatmul.mubr.bf16.gmra.mxu1 %v1656_v48  ;;  %v2237_v44 = vld [vmem:[%s2878_s1 + $0x180] sm:$0xff]   ;;  %v2224_v48 = vld [vmem:[%s2879_s0 + $0x170] ss:$36 sps:$4 sm:$0xff]  }
  0x33   :  { %1865 = vmatpush3.bf16.msra.mxu1 %v2155_v46  ;;  %1923 = vmatpush3.bf16.msra.mxu0 %v2158_v47  ;;  %v79_v46 = vld [vmem:[%s2879_s0 + $0x1b8] sm:$0xff]  ;;  %v80_v47 = vld [vmem:[%s2879_s0 + $0x1c0] sm:$0xff] }
  0x34   :  { %1866 = vmatprep.subr.bf16.mxu1 %v2160_v49  ;;  %1924 = vmatprep.subr.bf16.mxu0 %v2162_v50  ;;  %v2227_v49 = vld [vmem:[%s2879_s0 + $0x178] ss:$36 sps:$4 sm:$0xff]   ;;  %v1659_v50 = vcombine.high %v79_v46, %v79_v46 }
  0x35   :  { %1023 = vmatprep.mubr.bf16.mxu0 %v2164_v52  ;;  %1087 = vmatprep.mubr.bf16.mxu1 %v2177_v61  ;;  %v1658_v52 = vcombine.low %v79_v46, %v79_v46  ;;  %v2249_v61 = vld [vmem:[%s2879_s0 + $0xa8] ss:$36 sps:$4 sm:$0xff]  }
  0x37   :  { %1867 = vmatpush3.bf16.msra.mxu1 %v2161_v51  ;;  %1925 = vmatpush3.bf16.msra.mxu0 %v2163_v53  ;;  %v1661_v51 = vcombine.high %v80_v47, %v80_v47  ;;  %v1660_v53 = vcombine.low %v80_v47, %v80_v47 }
  0x38   :  { %1868 = vmatprep.subr.bf16.mxu1 %v2166_v54  ;;  %1926 = vmatprep.subr.bf16.mxu0 %v2169_v56  ;;  %v2241_v54 = vld [vmem:[%s2879_s0 + $0x1c] ss:$36 sps:$4 sm:$0xff]  }
  0x39   :  { %v2242_v56 = vld [vmem:[%s2879_s0 + $0x20] ss:$36 sps:$4 sm:$0xff]  }
  0x3a   :  { %1024 = vmatmul.mubr.bf16.gmra.mxu0 %v2167_v55  ;;  %v2239_v55 = vld [vmem:[%s2879_s0 + $0x18] ss:$36 sps:$4 sm:$0xff]  }
  0x3b   :  { %1869 = vmatpush3.bf16.msra.mxu1 %v2168_v57  ;;  %1927 = vmatpush3.bf16.msra.mxu0 %v2170_v58  ;;  %v2243_v57 = vld [vmem:[%s2879_s0 + $0x64] ss:$36 sps:$4 sm:$0xff]  }
  0x3c   :  { %1870 = vmatprep.subr.bf16.mxu1 %v2171_v59  ;;  %1928 = vmatprep.subr.bf16.mxu0 %v2173_v60  ;;  %v2245_v58 = vld [vmem:[%s2879_s0 + $0x60] ss:$36 sps:$4 sm:$0xff]   ;;  %v2246_v59 = vld [vmem:[%s2879_s0 + $0x68] ss:$36 sps:$4 sm:$0xff]  }
  0x3d   :  { %1175 = vmatprep.mubr.bf16.mxu0 %v2180_v63  ;;  %v2247_v60 = vld [vmem:[%s2879_s0 + $0xac] ss:$36 sps:$4 sm:$0xff]   ;;  %v2251_v63 = vld [vmem:[%s2879_s0 + $0xf4] ss:$36 sps:$4 sm:$0xff]  }
  0x3f   :  { %1871 = vmatpush3.bf16.msra.mxu1 %v2172_v62  ;;  %1929 = vmatpush3.bf16.msra.mxu0 %v2174_v0  ;;  %v2250_v62 = vld [vmem:[%s2879_s0 + $0xb0] ss:$36 sps:$4 sm:$0xff]  }
  0x40   :  { %1972 = vmatprep.subr.bf16.mxu1 %v2181_v3  ;;  %2045 = vmatprep.subr.bf16.mxu0 %v2268_v7  ;;  %v2253_v0 = vld [vmem:[%s2879_s0 + $0xf0] ss:$36 sps:$4 sm:$0xff]   ;;  %v2257_v3 = vld [vmem:[%s2879_s0 + $0x138] ss:$36 sps:$4 sm:$0xff]  }
  0x42   :  { %1088 = vmatmul.mubr.bf16.vlgmr.msra.gmra.mxu1 %v2175_v1  ;;  %1176 = vmatmul.mubr.bf16.vlgmr.msra.gmra.mxu0 %v2178_v2  ;;  %v2254_v1 = vld [vmem:[%s2879_s0 + $0xf8] ss:$36 sps:$4 sm:$0xff]  }
  0x43   :  { %1973 = vmatpush3.bf16.msra.mxu1 %v2182_v4  ;;  %1095 = vmatprep.mubr.bf16.mxu1 %v2183_v5  ;;  %v2255_v2 = vld [vmem:[%s2879_s0 + $0x13c] ss:$36 sps:$4 sm:$0xff]   ;;  %v2259_v5 = vld [vmem:[%s2879_s0 + $0x184] ss:$36 sps:$4 sm:$0xff]  }
  0x44   :  { %1974 = vmatprep.subr.bf16.mxu1 %v2185_v6  ;;  %2046 = vmatpush3.bf16.msra.mxu0 %v2186_v8  ;;  %v2258_v4 = vld [vmem:[%s2879_s0 + $0x140] ss:$36 sps:$4 sm:$0xff]   ;;  %v81_v6 = vld [vmem:[%s2879_s0 + $0x1c8] sm:$0xff] }
  0x45   :  { %1183 = vmatprep.mubr.bf16.mxu0 %v2188_v9  ;;  %2047 = vmatprep.subr.bf16.mxu0 %v2268_v7  ;;  %v2261_v8 = vld [vmem:[%s2879_s0 + $0x180] ss:$36 sps:$4 sm:$0xff]   ;;  %v2262_v9 = vld [vmem:[%s2879_s0 + $0x188] ss:$36 sps:$4 sm:$0xff]  }
  0x47   :  { %1975 = vmatpush3.bf16.msra.mxu1 %v2190_v10  ;;  %v1663_v10 = vcombine.high %v81_v6, %v81_v6 }
  0x48   :  { %1976 = vmatprep.subr.bf16.mxu1 %v2192_v11  ;;  %2048 = vmatpush3.bf16.msra.mxu0 %v2193_v12  ;;  %v1662_v11 = vcombine.low %v81_v6, %v81_v6  ;;  %v2265_v12 = vld [vmem:[%s2879_s0 + $0x1d0] ss:$0 sps:$4 sm:$0xff]  }
  0x49   :  { %2049 = vmatprep.subr.bf16.mxu0 %v2268_v7 }
  0x4a   :  { %1096 = vmatmul.mubr.bf16.gmra.mxu1 %v2187_v13  ;;  %1184 = vmatmul.mubr.bf16.gmra.mxu0 %v2191_v14 }
  0x4b   :  { %1103 = vmatprep.mubr.bf16.mxu1 %v2194_v15  ;;  %1977 = vmatpush3.bf16.msra.mxu1 %v2196_v16 }
  0x4c   :  { %1191 = vmatprep.mubr.bf16.mxu0 %v2198_v17  ;;  %1978 = vmatprep.subr.bf16.mxu1 %v2201_v18 }
  0x4d   :  { %2050 = vmatpush3.bf16.msra.mxu0 %v2202_v19 }
  0x4e   :  { %2051 = vmatprep.subr.bf16.mxu0 %v2268_v7 }
  0x4f   :  { %1979 = vmatpush3.bf16.msra.mxu1 %v2203_v20 }
  0x50   :  { %1980 = vmatprep.subr.bf16.mxu1 %v2210_v25 }
  0x51   :  { %2052 = vmatpush3.bf16.msra.mxu0 %v2211_v26 }
  0x52   :  { %1104 = vmatmul.mubr.bf16.gmra.mxu1 %v2197_v21  ;;  %1192 = vmatmul.mubr.bf16.gmra.mxu0 %v2200_v22 }
  0x53   :  { %1111 = vmatprep.mubr.bf16.mxu1 %v2204_v23  ;;  %1199 = vmatprep.mubr.bf16.mxu0 %v2207_v24 }
  0x54   :  { %1981 = vmatpush3.bf16.msra.mxu1 %v2212_v27  ;;  %2053 = vmatprep.subr.bf16.mxu0 %v2268_v7 }
  0x55   :  { %1982 = vmatprep.subr.bf16.mxu1 %v2219_v30  ;;  %2054 = vmatpush3.bf16.msra.mxu0 %v2220_v31 }
  0x56   :  { %2055 = vmatprep.subr.bf16.mxu0 %v2268_v7 }
  0x58   :  { %1983 = vmatpush3.bf16.msra.mxu1 %v2221_v32 }
  0x59   :  { %1984 = vmatprep.subr.bf16.mxu1 %v2228_v35  ;;  %2056 = vmatpush3.bf16.msra.mxu0 %v2229_v36 }
  0x5a   :  { %1112 = vmatmul.mubr.bf16.gmra.mxu1 %v2206_v28  ;;  %1200 = vmatmul.mubr.bf16.gmra.mxu0 %v2209_v29 }
  0x5b   :  { %1119 = vmatprep.mubr.bf16.mxu1 %v2213_v33  ;;  %1207 = vmatprep.mubr.bf16.mxu0 %v2216_v34 }
  0x5c   :  { %1985 = vmatpush3.bf16.msra.mxu1 %v2230_v39  ;;  %2057 = vmatprep.subr.bf16.mxu0 %v2268_v7 }
  0x5d   :  { %1986 = vmatprep.subr.bf16.mxu1 %v2235_v41  ;;  %2058 = vmatpush3.bf16.msra.mxu0 %v2236_v42 }
  0x5e   :  { %2059 = vmatprep.subr.bf16.mxu0 %v2268_v7 }
  0x60   :  { %1987 = vmatpush3.bf16.msra.mxu1 %v2237_v44 }
  0x61   :  { %2060 = vmatpush3.bf16.msra.mxu0 %v2238_v45 }
  0x62   :  { %1120 = vmatmul.mubr.bf16.gmra.mxu1 %v2215_v37  ;;  %1208 = vmatmul.mubr.bf16.gmra.mxu0 %v2218_v38 }
  0x63   :  { %1127 = vmatprep.mubr.bf16.mxu1 %v2222_v40  ;;  %1215 = vmatprep.mubr.bf16.mxu0 %v2225_v43 }
  0x6a   :  { %1128 = vmatmul.mubr.bf16.gmra.mxu1 %v2224_v48  ;;  %1216 = vmatmul.mubr.bf16.gmra.mxu0 %v2227_v49 }
  0x6b   :  { %1135 = vmatprep.mubr.bf16.mxu1 %v1659_v50  ;;  %1223 = vmatprep.mubr.bf16.mxu0 %v1661_v51 }
  0x72   :  { %1136 = vmatmul.mubr.bf16.gmra.mxu1 %v1658_v52  ;;  %1224 = vmatmul.mubr.bf16.gmra.mxu0 %v1660_v53 }
  0x73   :  { %1263 = vmatprep.mubr.bf16.mxu1 %v2241_v54  ;;  %2061 = vmatprep.mubr.msk.bf16.mxu0 %vm2269_vm0, %v2268_v7 }
  0x7a   :  { %1264 = vmatmul.mubr.bf16.vlgmr.msra.gmra.mxu1 %v2239_v55  ;;  %2062 = vmatmul.mubr.bf16.vlgmr.msra.gmra.mxu0 %v2242_v56 }
  0x7b   :  { %1271 = vmatprep.mubr.bf16.mxu1 %v2243_v57  ;;  %2065 = vmatprep.mubr.msk.bf16.mxu0 %vm2269_vm0, %v2268_v7 }
  0x82   :  { %1272 = vmatmul.mubr.bf16.gmra.mxu1 %v2245_v58  ;;  %2066 = vmatmul.mubr.bf16.gmra.mxu0 %v2246_v59 }
  0x83   :  { %1279 = vmatprep.mubr.bf16.mxu1 %v2247_v60  ;;  %2069 = vmatprep.mubr.msk.bf16.mxu0 %vm2269_vm0, %v2268_v7 }
  0x8a   :  { %1280 = vmatmul.mubr.bf16.gmra.mxu1 %v2249_v61  ;;  %2070 = vmatmul.mubr.bf16.gmra.mxu0 %v2250_v62 }
  0x8b   :  { %1287 = vmatprep.mubr.bf16.mxu1 %v2251_v63  ;;  %2073 = vmatprep.mubr.msk.bf16.mxu0 %vm2269_vm0, %v2268_v7 }
  0x92   :  { %1288 = vmatmul.mubr.bf16.gmra.mxu1 %v2253_v0  ;;  %2074 = vmatmul.mubr.bf16.gmra.mxu0 %v2254_v1 }
  0x93   :  { %1295 = vmatprep.mubr.bf16.mxu1 %v2255_v2  ;;  %2077 = vmatprep.mubr.msk.bf16.mxu0 %vm2269_vm0, %v2268_v7 }
  0x9a   :  { %1296 = vmatmul.mubr.bf16.gmra.mxu1 %v2257_v3  ;;  %2078 = vmatmul.mubr.bf16.gmra.mxu0 %v2258_v4 }
  0x9b   :  { %1303 = vmatprep.mubr.bf16.mxu1 %v2259_v5  ;;  %2081 = vmatprep.mubr.msk.bf16.mxu0 %vm2269_vm0, %v2268_v7 }
  0xa2   :  { %1304 = vmatmul.mubr.bf16.gmra.mxu1 %v2261_v8  ;;  %2082 = vmatmul.mubr.bf16.gmra.mxu0 %v2262_v9 }
  0xa3   :  { %1311 = vmatprep.mubr.bf16.mxu1 %v1663_v10  ;;  %2085 = vmatprep.mubr.msk.bf16.mxu0 %vm2269_vm0, %v2268_v7 }
  0xaa   :  { %1312 = vmatmul.mubr.bf16.gmra.mxu1 %v1662_v11  ;;  %2086 = vmatmul.mubr.bf16.gmra.mxu0 %v2265_v12 }
  0xe2   :  { %v1838_v13 = vpop.f32.mrf.mxu1  ;;  %v1814_v14 = vpop.f32.mrf.mxu0 }
  0xe4   :  { %v1839_v15 = vpop.f32.mrf.mxu1  ;;  %v1815_v16 = vpop.f32.mrf.mxu0 }
  0xe5   :  { %v2710_v17 = vadd.f32 %v1839_v15, %v1838_v13  ;;  %v1816_v18 = vadd.f32 %v1815_v16, %v1814_v14 }
  0xe6   :  { %v1841_v19 = vpop.f32.mrf.mxu1  ;;  %v1817_v20 = vpop.f32.mrf.mxu0 }
  0xe8   :  { %v1842_v21 = vpop.f32.mrf.mxu1  ;;  %v1818_v22 = vpop.f32.mrf.mxu0 }
  0xe9   :  { %v2712_v23 = vadd.f32 %v1842_v21, %v1841_v19  ;;  %v1819_v7 = vadd.f32 %v1818_v22, %v1817_v20 }
  0xea   :  { %v1820_v24 = vpop.f32.mrf.mxu0  ;;  %v1844_v25 = vpop.f32.mrf.mxu1 }
  0xec   :  { %v1821_v26 = vpop.f32.mrf.mxu0  ;;  %v1845_v27 = vpop.f32.mrf.mxu1 }
  0xed   :  { %v1822_v28 = vadd.f32 %v1821_v26, %v1820_v24  ;;  %v2714_v29 = vadd.f32 %v1845_v27, %v1844_v25 }
  0xee   :  { %v1823_v30 = vpop.f32.mrf.mxu0  ;;  %v1847_v31 = vpop.f32.mrf.mxu1 }
  0xf0   :  { %v1824_v32 = vpop.f32.mrf.mxu0  ;;  %v1848_v33 = vpop.f32.mrf.mxu1 }
  0xf1   :  { %v1825_v34 = vadd.f32 %v1824_v32, %v1823_v30  ;;  %v2716_v35 = vadd.f32 %v1848_v33, %v1847_v31 }
  0xf2   :  { %v1826_v36 = vpop.f32.mrf.mxu0  ;;  %v1850_v37 = vpop.f32.mrf.mxu1 }
  0xf4   :  { %v1827_v38 = vpop.f32.mrf.mxu0  ;;  %v1851_v39 = vpop.f32.mrf.mxu1 }
  0xf5   :  { %v1828_v40 = vadd.f32 %v1827_v38, %v1826_v36  ;;  %v2718_v41 = vadd.f32 %v1851_v39, %v1850_v37 }
  0xf6   :  { %v1829_v42 = vpop.f32.mrf.mxu0  ;;  %v1853_v43 = vpop.f32.mrf.mxu1 }
  0xf8   :  { %v1830_v44 = vpop.f32.mrf.mxu0  ;;  %v1854_v45 = vpop.f32.mrf.mxu1 }
  0xf9   :  { %v1831_v46 = vadd.f32 %v1830_v44, %v1829_v42 }
  0xfa   :  { %v1832_v47 = vpop.f32.mrf.mxu0 }
  0xfc   :  { %v1833_v48 = vpop.f32.mrf.mxu0 }
  0xfd   :  { %v1834_v49 = vadd.f32 %v1833_v48, %v1832_v47 }
  0xfe   :  { %v1835_v50 = vpop.f32.mrf.mxu0 }
 0x100   :  { %v1836_v51 = vpop.f32.mrf.mxu0 }
 0x101   :  { %v2720_v52 = vadd.f32 %v1836_v51, %v1835_v50 }
 0x102   :  { %v1872_v53 = vpop.f32.mrf.mxu1  ;;  %v1930_v54 = vpop.f32.mrf.mxu0 }
 0x104   :  { %v1873_v55 = vpop.f32.mrf.mxu1  ;;  %v1931_v56 = vpop.f32.mrf.mxu0 }
 0x105   :  { %v1874_v57 = vadd.f32 %v1873_v55, %v1872_v53  ;;  %v1932_v58 = vadd.f32 %v1931_v56, %v1930_v54 }
 0x106   :  { %v1875_v59 = vpop.f32.mrf.mxu1  ;;  %v1933_v60 = vpop.f32.mrf.mxu0 }
 0x107   :  { %v1090_v61 = vadd.f32 %v1874_v57, %v1816_v18 }
 0x108   :  { %v1876_v62 = vpop.f32.mrf.mxu1  ;;  %v1934_v63 = vpop.f32.mrf.mxu0 }
 0x109   :  { %v2722_v0 = vadd.f32 %v1932_v58, %v1090_v61  ;;  %v1877_v1 = vadd.f32 %v1876_v62, %v1875_v59  ;;  %v1935_v2 = vadd.f32 %v1934_v63, %v1933_v60 }
 0x10a   :  { %v1878_v3 = vpop.f32.mrf.mxu1  ;;  %v1936_v4 = vpop.f32.mrf.mxu0 }
 0x10b   :  { %v1093_v5 = vadd.f32 %v1877_v1, %v1819_v7 }
 0x10c   :  { %v1879_v6 = vpop.f32.mrf.mxu1  ;;  %v1937_v8 = vpop.f32.mrf.mxu0 }
 0x10d   :  { %v2724_v9 = vadd.f32 %v1935_v2, %v1093_v5  ;;  %v1880_v10 = vadd.f32 %v1879_v6, %v1878_v3  ;;  %v1938_v11 = vadd.f32 %v1937_v8, %v1936_v4 }
 0x10e   :  { %v1881_v12 = vpop.f32.mrf.mxu1  ;;  %v1939_v13 = vpop.f32.mrf.mxu0 }
 0x10f   :  { %v1098_v14 = vadd.f32 %v1880_v10, %v1822_v28 }
 0x110   :  { %v1882_v15 = vpop.f32.mrf.mxu1  ;;  %v1940_v16 = vpop.f32.mrf.mxu0 }
 0x111   :  { %v2726_v18 = vadd.f32 %v1938_v11, %v1098_v14  ;;  %v1883_v19 = vadd.f32 %v1882_v15, %v1881_v12  ;;  %v1941_v20 = vadd.f32 %v1940_v16, %v1939_v13 }
 0x112   :  { %v1884_v21 = vpop.f32.mrf.mxu1  ;;  %v1942_v22 = vpop.f32.mrf.mxu0 }
 0x113   :  { %v1101_v24 = vadd.f32 %v1883_v19, %v1825_v34 }
 0x114   :  { %v1885_v25 = vpop.f32.mrf.mxu1  ;;  %v1943_v7 = vpop.f32.mrf.mxu0 }
 0x115   :  { %v2728_v26 = vadd.f32 %v1941_v20, %v1101_v24  ;;  %v1886_v27 = vadd.f32 %v1885_v25, %v1884_v21  ;;  %v1944_v30 = vadd.f32 %v1943_v7, %v1942_v22 }
 0x116   :  { %v1887_v31 = vpop.f32.mrf.mxu1  ;;  %v1945_v32 = vpop.f32.mrf.mxu0 }
 0x117   :  { %v1106_v33 = vadd.f32 %v1886_v27, %v1828_v40 }
 0x118   :  { %v1888_v36 = vpop.f32.mrf.mxu1  ;;  %v1946_v28 = vpop.f32.mrf.mxu0 }
 0x119   :  { %v2730_v37 = vadd.f32 %v1944_v30, %v1106_v33  ;;  %v1889_v38 = vadd.f32 %v1888_v36, %v1887_v31  ;;  %v1947_v39 = vadd.f32 %v1946_v28, %v1945_v32 }
 0x11a   :  { %v1890_v42 = vpop.f32.mrf.mxu1  ;;  %v1948_v43 = vpop.f32.mrf.mxu0 }
 0x11b   :  { %v1109_v44 = vadd.f32 %v1889_v38, %v1831_v46 }
 0x11c   :  { %v1891_v45 = vpop.f32.mrf.mxu1  ;;  %v1949_v34 = vpop.f32.mrf.mxu0 }
 0x11d   :  { %v2732_v47 = vadd.f32 %v1947_v39, %v1109_v44  ;;  %v1892_v48 = vadd.f32 %v1891_v45, %v1890_v42  ;;  %v1950_v50 = vadd.f32 %v1949_v34, %v1948_v43 }
 0x11e   :  { %v1893_v51 = vpop.f32.mrf.mxu1  ;;  %v1951_v53 = vpop.f32.mrf.mxu0 }
 0x11f   :  { %v1114_v54 = vadd.f32 %v1892_v48, %v1834_v49 }
 0x120   :  { %v1894_v55 = vpop.f32.mrf.mxu1  ;;  %v1952_v40 = vpop.f32.mrf.mxu0 }
 0x121   :  { %v2734_v56 = vadd.f32 %v1950_v50, %v1114_v54  ;;  %v1895_v57 = vadd.f32 %v1894_v55, %v1893_v51  ;;  %v1953_v58 = vadd.f32 %v1952_v40, %v1951_v53 }
 0x122   :  { %v1896_v59 = vpop.f32.mrf.mxu1  ;;  %v1954_v60 = vpop.f32.mrf.mxu0 }
 0x123   :  { %v1117_v61 = vadd.f32 %v1895_v57, %v2720_v52 }
 0x124   :  { %v1897_v46 = vpop.f32.mrf.mxu1  ;;  %v1955_v62 = vpop.f32.mrf.mxu0 }
 0x125   :  { %v2737_v63 = vadd.f32 %v1953_v58, %v1117_v61  ;;  %v1898_v1 = vadd.f32 %v1897_v46, %v1896_v59  ;;  %v1956_v2 = vadd.f32 %v1955_v62, %v1954_v60 }
 0x126   :  { %v1899_v3 = vpop.f32.mrf.mxu1  ;;  %v1957_v4 = vpop.f32.mrf.mxu0 }
 0x127   :  { %v1122_v49 = vadd.f32 %v1898_v1, %v2710_v17 }
 0x128   :  { %v1900_v5 = vpop.f32.mrf.mxu1  ;;  %v1958_v6 = vpop.f32.mrf.mxu0 }
 0x129   :  { %v2740_v8 = vadd.f32 %v1956_v2, %v1122_v49  ;;  %v1901_v10 = vadd.f32 %v1900_v5, %v1899_v3  ;;  %v1959_v11 = vadd.f32 %v1958_v6, %v1957_v4 }
 0x12a   :  { %v1902_v12 = vpop.f32.mrf.mxu1  ;;  %v1960_v13 = vpop.f32.mrf.mxu0 }
 0x12b   :  { %v1125_v52 = vadd.f32 %v1901_v10, %v2712_v23 }
 0x12c   :  { %v1903_v14 = vpop.f32.mrf.mxu1  ;;  %v1961_v15 = vpop.f32.mrf.mxu0 }
 0x12d   :  { %v2743_v16 = vadd.f32 %v1959_v11, %v1125_v52  ;;  %v1904_v19 = vadd.f32 %v1903_v14, %v1902_v12  ;;  %v1962_v20 = vadd.f32 %v1961_v15, %v1960_v13 }
 0x12e   :  { %v2745_v21 = vpop.f32.mrf.mxu1  ;;  %v2747_v22 = vpop.f32.mrf.mxu0 }
 0x12f   :  { %v1130_v17 = vadd.f32 %v1904_v19, %v2714_v29 }
 0x130   :  { %v2750_v24 = vpop.f32.mrf.mxu1  ;;  %v2752_v25 = vpop.f32.mrf.mxu0 }
 0x131   :  { %v2754_v7 = vadd.f32 %v1962_v20, %v1130_v17 }
 0x132   :  { %v2756_v27 = vpop.f32.mrf.mxu1  ;;  %v2758_v23 = vpop.f32.mrf.mxu0 }
 0x134   :  { %v2760_v30 = vpop.f32.mrf.mxu1  ;;  %v2762_v31 = vpop.f32.mrf.mxu0 }
 0x136   :  { %v1911_v32 = vpop.f32.mrf.mxu1  ;;  %v1969_v33 = vpop.f32.mrf.mxu0 }
 0x138   :  { %v1912_v36 = vpop.f32.mrf.mxu1  ;;  %v1970_v28 = vpop.f32.mrf.mxu0 }
 0x13a   :  { %v1988_v38 = vpop.f32.mrf.mxu1  ;;  %v1353_v29 = vpop.f32.mrf.mxu0 }
 0x13c   :  { %v1989_v39 = vpop.f32.mrf.mxu1  ;;  %v2063_v42 = vpop.f32.mrf.mxu0 }
 0x13d   :  { %v1990_v45 = vadd.f32 %v1989_v39, %v1988_v38 }
 0x13e   :  { %v1991_v43 = vpop.f32.mrf.mxu1  ;;  %v1356_v44 = vpop.f32.mrf.mxu0 }
 0x13f   :  { %v1266_v54 = vadd.f32 %v1990_v45, %v2722_v0 }
 0x140   :  { %v1992_v34 = vpop.f32.mrf.mxu1  ;;  %v2064_v48 = vpop.f32.mrf.mxu0 }
 0x141   :  { %v1993_v50 = vadd.f32 %v1992_v34, %v1991_v43  ;;  %v2768_v46 = vadd.f32 %v1353_v29, %v1266_v54 }
 0x142   :  { %v1994_v51 = vpop.f32.mrf.mxu1  ;;  %v1361_v53 = vpop.f32.mrf.mxu0 }
 0x143   :  { %v1269_v55 = vadd.f32 %v1993_v50, %v2724_v9  ;;  %v1425_v5 = vmul.f32 %v2768_v46, %v2768_v46 }
 0x144   :  { %v1995_v40 = vpop.f32.mrf.mxu1  ;;  %v2067_v57 = vpop.f32.mrf.mxu0 }
 0x145   :  { %v2766_v58 = vadd.f32 %v1356_v44, %v1269_v55  ;;  %v1996_v59 = vadd.f32 %v1995_v40, %v1994_v51 }
 0x146   :  { %v1997_v60 = vpop.f32.mrf.mxu1  ;;  %v1364_v61 = vpop.f32.mrf.mxu0 }
 0x147   :  { %v1274_v62 = vadd.f32 %v1996_v59, %v2726_v18  ;;  %v1426_v3 = vmul.f32 %v2766_v58, %v2766_v58  ;;  %v1407_v6 = vadd.f32 %v2766_v58, %v2768_v46 }
 0x148   :  { %v1998_v1 = vpop.f32.mrf.mxu1  ;;  %v2068_v2 = vpop.f32.mrf.mxu0 }
 0x149   :  { %v2773_v4 = vadd.f32 %v1361_v53, %v1274_v62  ;;  %v1999_v0 = vadd.f32 %v1998_v1, %v1997_v60  ;;  %v1438_v13 = vadd.f32 %v1426_v3, %v1425_v5 }
 0x14a   :  { %v2000_v9 = vpop.f32.mrf.mxu1  ;;  %v1369_v49 = vpop.f32.mrf.mxu0 }
 0x14b   :  { %v1427_v10 = vmul.f32 %v2773_v4, %v2773_v4  ;;  %v1277_v18 = vadd.f32 %v1999_v0, %v2728_v26  ;;  %v1408_v52 = vadd.f32 %v1407_v6, %v2773_v4 }
 0x14c   :  { %v2001_v11 = vpop.f32.mrf.mxu1  ;;  %v2071_v12 = vpop.f32.mrf.mxu0 }
 0x14d   :  { %v2783_v14 = vadd.f32 %v1364_v61, %v1277_v18  ;;  %v2002_v15 = vadd.f32 %v2001_v11, %v2000_v9  ;;  %v1439_v17 = vadd.f32 %v1438_v13, %v1427_v10 }
 0x14e   :  { %v2003_v19 = vpop.f32.mrf.mxu1  ;;  %v1372_v20 = vpop.f32.mrf.mxu0 }
 0x14f   :  { %v1409_v32 = vadd.f32 %v1408_v52, %v2783_v14  ;;  %v1428_v33 = vmul.f32 %v2783_v14, %v2783_v14  ;;  %v1282_v36 = vadd.f32 %v2002_v15, %v2730_v37 }
 0x150   :  { %v2004_v28 = vpop.f32.mrf.mxu1  ;;  %v2072_v26 = vpop.f32.mrf.mxu0 }
 0x151   :  { %v1440_v38 = vadd.f32 %v1439_v17, %v1428_v33  ;;  %v2789_v29 = vadd.f32 %v1369_v49, %v1282_v36  ;;  %v2005_v39 = vadd.f32 %v2004_v28, %v2003_v19  ;;  %v1907_v19 = vadd.f32 %v2750_v24, %v2745_v21 }
 0x152   :  { %v2006_v42 = vpop.f32.mrf.mxu1  ;;  %v1377_v43 = vpop.f32.mrf.mxu0  ;;  %v1910_v21 = vadd.f32 %v2760_v30, %v2756_v27  ;;  %v1968_v27 = vadd.f32 %v2762_v31, %v2758_v23 }
 0x153   :  { %v1410_v44 = vadd.f32 %v1409_v32, %v2789_v29  ;;  %v1429_v45 = vmul.f32 %v2789_v29, %v2789_v29  ;;  %v1285_v34 = vadd.f32 %v2005_v39, %v2732_v47 }
 0x154   :  { %v2007_v48 = vpop.f32.mrf.mxu1  ;;  %v2075_v50 = vpop.f32.mrf.mxu0 }
 0x155   :  { %v1441_v51 = vadd.f32 %v1440_v38, %v1429_v45  ;;  %v2795_v53 = vadd.f32 %v1372_v20, %v1285_v34  ;;  %v2008_v37 = vadd.f32 %v2007_v48, %v2006_v42  ;;  %v1965_v34 = vadd.f32 %v2752_v25, %v2747_v22 }
 0x156   :  { %v2009_v54 = vpop.f32.mrf.mxu1  ;;  %v1380_v55 = vpop.f32.mrf.mxu0 }
 0x157   :  { %v1411_v40 = vadd.f32 %v1410_v44, %v2795_v53  ;;  %v1430_v57 = vmul.f32 %v2795_v53, %v2795_v53  ;;  %v1290_v59 = vadd.f32 %v2008_v37, %v2734_v56 }
 0x158   :  { %v2010_v60 = vpop.f32.mrf.mxu1  ;;  %v2076_v61 = vpop.f32.mrf.mxu0 }
 0x159   :  { %v1442_v62 = vadd.f32 %v1441_v51, %v1430_v57  ;;  %v2801_v1 = vadd.f32 %v1377_v43, %v1290_v59  ;;  %v2011_v47 = vadd.f32 %v2010_v60, %v2009_v54 }
 0x15a   :  { %v2012_v2 = vpop.f32.mrf.mxu1  ;;  %v1385_v3 = vpop.f32.mrf.mxu0 }
 0x15b   :  { %v1412_v0 = vadd.f32 %v1411_v40, %v2801_v1  ;;  %v1431_v9 = vmul.f32 %v2801_v1, %v2801_v1  ;;  %v1293_v49 = vadd.f32 %v2011_v47, %v2737_v63 }
 0x15c   :  { %v2013_v5 = vpop.f32.mrf.mxu1  ;;  %v2079_v6 = vpop.f32.mrf.mxu0 }
 0x15d   :  { %v1443_v10 = vadd.f32 %v1442_v62, %v1431_v9  ;;  %v2807_v18 = vadd.f32 %v1380_v55, %v1293_v49  ;;  %v2014_v56 = vadd.f32 %v2013_v5, %v2012_v2  ;;  %v1138_v55 = vadd.f32 %v1910_v21, %v2718_v41 }
 0x15e   :  { %v2015_v11 = vpop.f32.mrf.mxu1  ;;  %v1388_v12 = vpop.f32.mrf.mxu0 }
 0x15f   :  { %v1413_v13 = vadd.f32 %v1412_v0, %v2807_v18  ;;  %v1432_v52 = vmul.f32 %v2807_v18, %v2807_v18  ;;  %v1298_v15 = vadd.f32 %v2014_v56, %v2740_v8  ;;  %v1133_v8 = vadd.f32 %v1907_v19, %v2716_v35 }
 0x160   :  { %v2016_v20 = vpop.f32.mrf.mxu1  ;;  %v2080_v63 = vpop.f32.mrf.mxu0  ;;  %v1226_v2 = vadd.f32 %v1968_v27, %v1138_v55  ;;  %v1465_v27 = vld [vmem:[%s2881_s3] sm:$0x1] }
 0x161   :  { %v1444_v17 = vadd.f32 %v1443_v10, %v1432_v52  ;;  %v2815_v32 = vadd.f32 %v1385_v3, %v1298_v15  ;;  %v2017_v33 = vadd.f32 %v2016_v20, %v2015_v11  ;;  %v1221_v37 = vadd.f32 %v1965_v34, %v1133_v8 }
 0x162   :  { %v2018_v36 = vpop.f32.mrf.mxu1  ;;  %v1393_v28 = vpop.f32.mrf.mxu0 }
 0x163   :  { %v1414_v26 = vadd.f32 %v1413_v13, %v2815_v32  ;;  %v1433_v38 = vmul.f32 %v2815_v32, %v2815_v32  ;;  %v1301_v39 = vadd.f32 %v2017_v33, %v2743_v16 }
 0x164   :  { %v2019_v42 = vpop.f32.mrf.mxu1  ;;  %v2083_v43 = vpop.f32.mrf.mxu0 }
 0x165   :  { %v1445_v24 = vadd.f32 %v1444_v17, %v1433_v38  ;;  %v2824_v44 = vadd.f32 %v1388_v12, %v1301_v39  ;;  %v2020_v45 = vadd.f32 %v2019_v42, %v2018_v36 }
 0x166   :  { %v2021_v48 = vpop.f32.mrf.mxu1  ;;  %v1396_v50 = vpop.f32.mrf.mxu0 }
 0x167   :  { %v1415_v51 = vadd.f32 %v1414_v26, %v2824_v44  ;;  %v1434_v16 = vmul.f32 %v2824_v44, %v2824_v44  ;;  %v1306_v35 = vadd.f32 %v2020_v45, %v2754_v7 }
 0x168   :  { %v2022_v30 = vpop.f32.mrf.mxu1  ;;  %v2084_v54 = vpop.f32.mrf.mxu0 }
 0x169   :  { %v1446_v40 = vadd.f32 %v1445_v24, %v1434_v16  ;;  %v2835_v57 = vadd.f32 %v1393_v28, %v1306_v35  ;;  %v2023_v22 = vadd.f32 %v2022_v30, %v2021_v48  ;;  %v1469_v48 = vlaneseq }
 0x16a   :  { %v2024_v25 = vpop.f32.mrf.mxu1  ;;  %v1401_v59 = vpop.f32.mrf.mxu0 }
 0x16b   :  { %v1416_v60 = vadd.f32 %v1415_v51, %v2835_v57  ;;  %v1435_v61 = vmul.f32 %v2835_v57, %v2835_v57  ;;  %v1309_v7 = vadd.f32 %v2023_v22, %v1221_v37  ;;  %v1461_v51 = vld [vmem:[%s2880_s2] sm:$0x1] }
 0x16c   :  { %v2025_v62 = vpop.f32.mrf.mxu1  ;;  %v2087_v47 = vpop.f32.mrf.mxu0 }
 0x16d   :  { %v1447_v23 = vadd.f32 %v1446_v40, %v1435_v61  ;;  %v1397_v31 = vadd.f32 %v1396_v50, %v1309_v7  ;;  %v2026_v3 = vadd.f32 %v2025_v62, %v2024_v25  ;;  %v1470_v50 = vshrl.u32 %v1469_v48, 7 }
 0x16e   :  { %v2027_v0 = vpop.f32.mrf.mxu1  ;;  %v1404_v41 = vpop.f32.mrf.mxu0 }
 0x16f   :  { %v1417_v9 = vadd.f32 %v1416_v60, %v1397_v31  ;;  %v1436_v49 = vmul.f32 %v1397_v31, %v1397_v31  ;;  %v1314_v5 = vadd.f32 %v2026_v3, %v1226_v2  ;;  %v1471_v16 = vsub.s32 0, %v1470_v50 }
 0x170   :  { %v2028_v6 = vpop.f32.mrf.mxu1  ;;  %v2088_v10 = vpop.f32.mrf.mxu0 }
 0x171   :  { %v1448_v56 = vadd.f32 %v1447_v23, %v1436_v49  ;;  %v1402_v11 = vadd.f32 %v1401_v59, %v1314_v5 }
 0x173   :  { %v1418_v12 = vadd.f32 %v1417_v9, %v1402_v11  ;;  %v1437_v13 = vmul.f32 %v1402_v11, %v1402_v11 }
 0x175   :  { %v1419_v52 = vrot.slane %v1418_v12, 4  ;;  %v1449_v15 = vadd.f32 %v1448_v56, %v1437_v13 }
 0x177   :  { %v1420_v19 = vadd.f32 %v1419_v52, %v1418_v12  ;;  %v1450_v20 = vrot.slane %v1449_v15, 4 }
 0x179   :  { %v1421_v63 = vrot.slane %v1420_v19, 2  ;;  %v1451_v17 = vadd.f32 %v1450_v20, %v1449_v15 }
 0x17b   :  { %v1422_v33 = vadd.f32 %v1421_v63, %v1420_v19  ;;  %v1452_v36 = vrot.slane %v1451_v17, 2 }
 0x17d   :  { %v1423_v28 = vrot.slane %v1422_v33, 1  ;;  %v1453_v26 = vadd.f32 %v1452_v36, %v1451_v17 }
 0x17f   :  { %v1424_v38 = vadd.f32 %v1423_v28, %v1422_v33  ;;  %v1454_v39 = vrot.slane %v1453_v26, 1 }
 0x181   :  { %v1455_v8 = vadd.f32 %v1454_v39, %v1453_v26  ;;  %v1456_v42 = vmul.f32 0.010204081, %v1424_v38 }
 0x183   :  { %v1457_v43 = vmul.f32 0.010204081, %v1455_v8  ;;  %v1458_v21 = vmul.f32 %v1456_v42, %v1456_v42 }
 0x185   :  { %v1459_v24 = vsub.f32 %v1457_v43, %v1458_v21 }
 0x187   :  { %v1460_v45 = vmax.f32 %v1459_v24, 0.0 }
 0x189   :  { %v1462_v34 = vadd.f32 1e-05, %v1460_v45 }
 0x18b   :  { %2266 = vrsqrt.f32 %v1462_v34 }
 0x198   :  { %v2267_v35 = vpop.eup %2266 }
 0x199   :  { %v1464_v37 = vmul.f32 %v2267_v35, %v1461_v51 }
 0x19b   :  { %v1466_v30 = vmul.f32 %v1464_v37, %v1456_v42  ;;  %v1472_v54 = vrot.slane %v1464_v37, %v1471_v16 }
 0x19d   :  { %v1467_v55 = vsub.f32 %v1465_v27, %v1466_v30  ;;  %v1474_v40 = vmul.f32 %v1472_v54, %v2768_v46  ;;  %v1476_v22 = vmul.f32 %v1472_v54, %v2773_v4  ;;  %v1477_v25 = vmul.f32 %v1472_v54, %v2783_v14 }
 0x19e   :  { %v1478_v59 = vmul.f32 %v1472_v54, %v2789_v29  ;;  %v1479_v60 = vmul.f32 %v1472_v54, %v2795_v53  ;;  %v1480_v61 = vmul.f32 %v1472_v54, %v2801_v1  ;;  %v1481_v7 = vmul.f32 %v1472_v54, %v2807_v18 }
 0x19f   :  { %v1482_v62 = vmul.f32 %v1472_v54, %v2815_v32  ;;  %v1483_v47 = vmul.f32 %v1472_v54, %v2824_v44  ;;  %v1484_v2 = vmul.f32 %v1472_v54, %v2835_v57  ;;  %v1475_v46 = vmul.f32 %v1472_v54, %v2766_v58 }
 0x1a0   :  { %v1485_v23 = vmul.f32 %v1472_v54, %v1397_v31  ;;  %v1486_v4 = vmul.f32 %v1472_v54, %v1402_v11  ;;  %v1491_v3 = vrot.slane %v1467_v55, %v1471_v16 }
 0x1a2   :  { %v1493_v14 = vadd.f32 %v1491_v3, %v1474_v40  ;;  %v1494_v0 = vadd.f32 %v1491_v3, %v1475_v46  ;;  %v1495_v29 = vadd.f32 %v1491_v3, %v1476_v22  ;;  %v1496_v41 = vadd.f32 %v1491_v3, %v1477_v25 }
 0x1a3   :  { %v1497_v53 = vadd.f32 %v1491_v3, %v1478_v59  ;;  %v1498_v9 = vadd.f32 %v1491_v3, %v1479_v60  ;;  %v1499_v1 = vadd.f32 %v1491_v3, %v1480_v61  ;;  %v1500_v49 = vadd.f32 %v1491_v3, %v1481_v7 }
 0x1a4   :  { %v1501_v18 = vadd.f32 %v1491_v3, %v1482_v62  ;;  %v1502_v5 = vadd.f32 %v1491_v3, %v1483_v47  ;;  %v1503_v32 = vadd.f32 %v1491_v3, %v1484_v2  ;;  %v1504_v6 = vadd.f32 %v1491_v3, %v1485_v23 }
 0x1a5   :  { %v1505_v44 = vadd.f32 %v1491_v3, %v1486_v4  ;;  %v1506_v10 = vmul.f32 0.2, %v1493_v14  ;;  %v1507_v57 = vmul.f32 0.2, %v1494_v0  ;;  %v1508_v56 = vmul.f32 0.2, %v1495_v29 }
 0x1a6   :  { %v1509_v58 = vmul.f32 0.2, %v1496_v41  ;;  %v1510_v31 = vmul.f32 0.2, %v1497_v53  ;;  %v1511_v11 = vmul.f32 0.2, %v1498_v9 }
 0x1a7   :  { %v1512_v12 = vmul.f32 0.2, %v1499_v1  ;;  %v1513_v13 = vmul.f32 0.2, %v1500_v49  ;;  %v1514_v52 = vmul.f32 0.2, %v1501_v18  ;;  %v1519_v15 = vmax.f32 %v1493_v14, %v1506_v10 }
 0x1a8   :  { %v1515_v19 = vmul.f32 0.2, %v1502_v5  ;;  %v1516_v20 = vmul.f32 0.2, %v1503_v32  ;;  %v1517_v63 = vmul.f32 0.2, %v1504_v6  ;;  %v1520_v17 = vmax.f32 %v1494_v0, %v1507_v57 }
 0x1a9   :  { %v1518_v33 = vmul.f32 0.2, %v1505_v44  ;;  %v1521_v36 = vmax.f32 %v1495_v29, %v1508_v56  ;;  %v1522_v28 = vmax.f32 %v1496_v41, %v1509_v58  ;;  %v1523_v26 = vmax.f32 %v1497_v53, %v1510_v31 }
 0x1aa   :  { %v1524_v38 = vmax.f32 %v1498_v9, %v1511_v11  ;;  %v1525_v39 = vmax.f32 %v1499_v1, %v1512_v12  ;;  %v1526_v8 = vmax.f32 %v1500_v49, %v1513_v13  ;;  %v1527_v42 = vmax.f32 %v1501_v18, %v1514_v52 }
 0x1ab   :  { %v1528_v43 = vmax.f32 %v1502_v5, %v1515_v19  ;;  %v1529_v21 = vmax.f32 %v1503_v32, %v1516_v20  ;;  %v1530_v24 = vmax.f32 %v1504_v6, %v1517_v63  ;;  %v1531_v45 = vmax.f32 %v1505_v44, %v1518_v33 }
 0x1ac   :  { %v1766_v34 = vpack.c.bf16 %v1520_v17, %v1519_v15  ;;  %v1771_v48 = vpack.c.bf16 %v1522_v28, %v1521_v36  ;;  %v1776_v50 = vpack.c.bf16 %v1524_v38, %v1523_v26  ;;  %v1781_v51 = vpack.c.bf16 %v1526_v8, %v1525_v39 }
 0x1ad   :  { %v1762_v16 = vpack.c.bf16 %v1531_v45, %v1531_v45  ;;  %v1786_v35 = vpack.c.bf16 %v1528_v43, %v1527_v42  ;;  %v1791_v37 = vpack.c.bf16 %v1530_v24, %v1529_v21 }
 0x1ae   :  { %1767 = vst [vmem:[%s2882_s4] sm:$0xff] %v1766_v34   ;;  %1793 = vst [vmem:[%s2882_s4 + $0x8] sm:$0xff] %v1771_v48  }
 0x1af   :  { %1794 = vst [vmem:[%s2882_s4 + $0x10] sm:$0xff] %v1776_v50   ;;  %1795 = vst [vmem:[%s2882_s4 + $0x18] sm:$0xff] %v1781_v51  }
 0x1b0   :  { %1796 = vst [vmem:[%s2882_s4 + $0x20] sm:$0xff] %v1786_v35   ;;  %1797 = vst [vmem:[%s2882_s4 + $0x28] sm:$0xff] %v1791_v37  }
 0x1b1   :  { %1597 = vst [vmem:[%s2882_s4 + $0x30] sm:$0xf] %v1762_v16 }

// kernel: a_call__.6
= control target key start
LH: loop header
LB: loop body
LE: loop exit
PB: predicated region body
PF: predicated region fallthrough
CT: control target
= control target key end

     0   :  { %s3788_s1 = inlined_call_operand.vmem [shape: bf16[4,256,128], index: 1, kind: input, shape index: {}]   ;;  %s3789_s0 = inlined_call_operand.vmem [shape: bf16[4,104,256], index: 0, kind: input, shape index: {}]   ;;  %s3790_s2 = inlined_call_operand.vmem [shape: f32[1,128], index: 2, kind: input, shape index: {}]   ;;  %s3791_s3 = inlined_call_operand.vmem [shape: f32[1,128], index: 3, kind: input, shape index: {}]   ;;  %s3792_s4 = inlined_call_operand.vmem [shape: bf16[4,104,128], index: 4, kind: output, shape index: {}]  }
   0x1   :  { %v2479_v0 = vld [vmem:[%s3788_s1 + $0x78] sm:$0xff]   ;;  %v2481_v2 = vld [vmem:[%s3788_s1 + $0x70] sm:$0xff]   ;;  %v2483_v4 = vld [vmem:[%s3788_s1 + $0x68] sm:$0xff]  }
   0x2   :  { %v2480_v1 = vld [vmem:[%s3788_s1 + $0x38] sm:$0xff]   ;;  %2247 = vmatprep.subr.bf16.mxu0 %v2479_v0  ;;  %v2482_v3 = vld [vmem:[%s3788_s1 + $0x30] sm:$0xff]   ;;  %v2484_v5 = vld [vmem:[%s3788_s1 + $0x28] sm:$0xff]  }
   0x3   :  { %2248 = vmatpush3.bf16.msra.mxu0 %v2480_v1  ;;  %v2485_v6 = vld [vmem:[%s3788_s1 + $0x60] sm:$0xff]   ;;  %v2487_v8 = vld [vmem:[%s3788_s1 + $0x58] sm:$0xff]   ;;  %v2489_v12 = vld [vmem:[%s3788_s1 + $0x50] sm:$0xff]  }
   0x4   :  { %2249 = vmatprep.subr.bf16.mxu0 %v2481_v2  ;;  %v2486_v7 = vld [vmem:[%s3788_s1 + $0x20] sm:$0xff]   ;;  %v2491_v9 = vld [vmem:[%s3788_s1 + $0xf8] sm:$0xff]   ;;  %v2495_v13 = vld [vmem:[%s3788_s1 + $0xf0] sm:$0xff]  }
   0x5   :  { %v2492_v10 = vld [vmem:[%s3788_s1 + $0xb8] sm:$0xff]   ;;  %2305 = vmatprep.subr.bf16.mxu1 %v2491_v9  ;;  %v2496_v14 = vld [vmem:[%s3788_s1 + $0xb0] sm:$0xff]   ;;  %v2493_v16 = vld [vmem:[%s3788_s1 + $0x48] sm:$0xff]  }
   0x6   :  { %v2488_v11 = vld [vmem:[%s3788_s1 + $0x18] sm:$0xff]   ;;  %2306 = vmatpush3.bf16.msra.mxu1 %v2492_v10  ;;  %v2490_v15 = vld [vmem:[%s3788_s1 + $0x10] sm:$0xff]   ;;  %v2499_v17 = vld [vmem:[%s3788_s1 + $0xe8] sm:$0xff]  }
   0x7   :  { %2250 = vmatpush3.bf16.msra.mxu0 %v2482_v3  ;;  %2307 = vmatprep.subr.bf16.mxu1 %v2495_v13  ;;  %v2500_v18 = vld [vmem:[%s3788_s1 + $0xa8] sm:$0xff]   ;;  %v2497_v21 = vld [vmem:[%s3788_s1 + $0x40] sm:$0xff]   ;;  %v2504_v24 = vld [vmem:[%s3788_s1 + $0x178] sm:$0xff]  }
   0x8   :  { %2251 = vmatprep.subr.bf16.mxu0 %v2483_v4  ;;  %v2494_v19 = vld [vmem:[%s3788_s1 + $0x8] sm:$0xff]   ;;  %v2498_v22 = vld [vmem:[%s3788_s1] sm:$0xff]   ;;  %v2508_v26 = vld [vmem:[%s3788_s1 + $0xd8] sm:$0xff]  }
   0x9   :  { %v2503_v20 = vld [vmem:[%s3789_s0 + $0x4] ss:$8 sps:$4 sm:$0xff]   ;;  %v2509_v27 = vld [vmem:[%s3788_s1 + $0x98] sm:$0xff]   ;;  %v2501_v28 = vld [vmem:[%s3789_s0] ss:$8 sps:$4 sm:$0xff]  }
   0xa   :  { %2308 = vmatpush3.bf16.msra.mxu1 %v2496_v14  ;;  %393 = vmatprep.mubr.bf16.mxu0 %v2503_v20  ;;  %v2505_v23 = vld [vmem:[%s3788_s1 + $0xe0] sm:$0xff]   ;;  %v2506_v29 = vld [vmem:[%s3788_s1 + $0x138] sm:$0xff]   ;;  %v2512_v31 = vld [vmem:[%s3788_s1 + $0x170] sm:$0xff]  }
   0xb   :  { %2252 = vmatpush3.bf16.msra.mxu0 %v2484_v5  ;;  %2309 = vmatprep.subr.bf16.mxu1 %v2499_v17  ;;  %v2507_v25 = vld [vmem:[%s3788_s1 + $0xa0] sm:$0xff]   ;;  %v2510_v30 = vld [vmem:[%s3789_s0 + $0x14] ss:$8 sps:$4 sm:$0xff]   ;;  %v2517_v35 = vld [vmem:[%s3788_s1 + $0xc8] sm:$0xff]  }
   0xc   :  { %2253 = vmatprep.subr.bf16.mxu0 %v2485_v6  ;;  %v2514_v32 = vld [vmem:[%s3788_s1 + $0x130] sm:$0xff]   ;;  %v2518_v36 = vld [vmem:[%s3788_s1 + $0x88] sm:$0xff]   ;;  %v2524_v41 = vld [vmem:[%s3788_s1 + $0xc0] sm:$0xff]  }
   0xd   :  { %v2515_v33 = vld [vmem:[%s3788_s1 + $0xd0] sm:$0xff]   ;;  %v2519_v37 = vld [vmem:[%s3788_s1 + $0x168] sm:$0xff]   ;;  %v2525_v42 = vld [vmem:[%s3788_s1 + $0x80] sm:$0xff]  }
   0xe   :  { %2310 = vmatpush3.bf16.msra.mxu1 %v2500_v18  ;;  %v2516_v34 = vld [vmem:[%s3788_s1 + $0x90] sm:$0xff]   ;;  %v2520_v39 = vld [vmem:[%s3789_s0 + $0x24] ss:$8 sps:$4 sm:$0xff]   ;;  %v2523_v47 = vld [vmem:[%s3789_s0 + $0x20] ss:$8 sps:$4 sm:$0xff]  }
   0xf   :  { %2254 = vmatpush3.bf16.msra.mxu0 %v2486_v7  ;;  %2311 = vmatprep.subr.bf16.mxu1 %v2505_v23  ;;  %v2513_v38 = vld [vmem:[%s3789_s0 + $0x10] ss:$8 sps:$4 sm:$0xff]   ;;  %v2522_v40 = vld [vmem:[%s3788_s1 + $0x128] sm:$0xff]   ;;  %v2529_v45 = vld [vmem:[%s3788_s1 + $0x160] sm:$0xff]  }
  0x10   :  { %2255 = vmatprep.subr.bf16.mxu0 %v2487_v8  ;;  %v2526_v43 = vld [vmem:[%s3789_s0 + $0x68] ss:$8 sps:$4 sm:$0xff]   ;;  %v2528_v44 = vld [vmem:[%s3789_s0 + $0x6c] ss:$8 sps:$4 sm:$0xff]   ;;  %v2530_v46 = vld [vmem:[%s3788_s1 + $0x120] sm:$0xff]  }
  0x11   :  { %644 = vmatprep.mubr.bf16.mxu1 %v2528_v44  ;;  %v2531_v48 = vld [vmem:[%s3789_s0 + $0x34] ss:$8 sps:$4 sm:$0xff]   ;;  %v2533_v54 = vld [vmem:[%s3789_s0 + $0x30] ss:$8 sps:$4 sm:$0xff]   ;;  %v2541_v56 = vld [vmem:[%s3789_s0 + $0x44] ss:$8 sps:$4 sm:$0xff]  }
  0x12   :  { %2312 = vmatpush3.bf16.msra.mxu1 %v2507_v25  ;;  %v2534_v49 = vld [vmem:[%s3788_s1 + $0x1f8] sm:$0xff]   ;;  %v2544_v57 = vld [vmem:[%s3788_s1 + $0x1f0] sm:$0xff]   ;;  %v2543_v63 = vld [vmem:[%s3789_s0 + $0x40] ss:$8 sps:$4 sm:$0xff]  }
  0x13   :  { %2256 = vmatpush3.bf16.msra.mxu0 %v2488_v11  ;;  %2313 = vmatprep.subr.bf16.mxu1 %v2508_v26  ;;  %v2535_v50 = vld [vmem:[%s3788_s1 + $0x1b8] sm:$0xff]   ;;  %v2545_v58 = vld [vmem:[%s3788_s1 + $0x1b0] sm:$0xff]   ;;  %v2554_v0 = vld [vmem:[%s3788_s1 + $0x1e8] sm:$0xff]  }
  0x14   :  { %2257 = vmatprep.subr.bf16.mxu0 %v2489_v12  ;;  %v2536_v51 = vld [vmem:[%s3789_s0 + $0x7c] ss:$8 sps:$4 sm:$0xff]   ;;  %v2539_v55 = vld [vmem:[%s3789_s0 + $0x78] ss:$8 sps:$4 sm:$0xff]   ;;  %v2546_v59 = vld [vmem:[%s3788_s1 + $0x150] sm:$0xff]  }
  0x15   :  { %v2538_v52 = vld [vmem:[%s3788_s1 + $0x158] sm:$0xff]   ;;  %v2547_v60 = vld [vmem:[%s3789_s0 + $0x8c] ss:$8 sps:$4 sm:$0xff]   ;;  %v2550_v62 = vld [vmem:[%s3789_s0 + $0x88] ss:$8 sps:$4 sm:$0xff]  }
  0x16   :  { %2314 = vmatpush3.bf16.msra.mxu1 %v2509_v27  ;;  %v2540_v53 = vld [vmem:[%s3788_s1 + $0x118] sm:$0xff]   ;;  %v2549_v61 = vld [vmem:[%s3788_s1 + $0x110] sm:$0xff]   ;;  %v2555_v2 = vld [vmem:[%s3788_s1 + $0x1a8] sm:$0xff]  }
  0x17   :  { %2258 = vmatpush3.bf16.msra.mxu0 %v2490_v15  ;;  %2315 = vmatprep.subr.bf16.mxu1 %v2515_v33  ;;  %v2551_v1 = vld [vmem:[%s3789_s0 + $0x54] ss:$8 sps:$4 sm:$0xff]   ;;  %v2556_v3 = vld [vmem:[%s3788_s1 + $0x148] sm:$0xff]   ;;  %v2560_v6 = vld [vmem:[%s3789_s0 + $0x98] ss:$8 sps:$4 sm:$0xff]  }
  0x18   :  { %2259 = vmatprep.subr.bf16.mxu0 %v2493_v16  ;;  %v2557_v4 = vld [vmem:[%s3788_s1 + $0x108] sm:$0xff]   ;;  %v2558_v5 = vld [vmem:[%s3789_s0 + $0x9c] ss:$8 sps:$4 sm:$0xff]   ;;  %v2553_v12 = vld [vmem:[%s3789_s0 + $0x50] ss:$8 sps:$4 sm:$0xff]  }
  0x19   :  { %v30_v7 = vld [vmem:[%s3789_s0 + $0x60] sm:$0xff]  ;;  %v2567_v13 = vld [vmem:[%s3789_s0 + $0xac] ss:$8 sps:$4 sm:$0xff]   ;;  %v2570_v15 = vld [vmem:[%s3788_s1 + $0x1d8] sm:$0xff]  }
  0x1a   :  { %2316 = vmatpush3.bf16.msra.mxu1 %v2516_v34  ;;  %v2562_v8 = vld [vmem:[%s3788_s1 + $0x1e0] sm:$0xff]   ;;  %v1881_v14 = vcombine.high %v30_v7, %v30_v7  ;;  %v2574_v16 = vld [vmem:[%s3788_s1 + $0x198] sm:$0xff]   ;;  %v2569_v17 = vld [vmem:[%s3789_s0 + $0xa8] ss:$8 sps:$4 sm:$0xff]  }
  0x1b   :  { %2260 = vmatpush3.bf16.msra.mxu0 %v2494_v19  ;;  %2317 = vmatprep.subr.bf16.mxu1 %v2517_v35  ;;  %v2564_v9 = vld [vmem:[%s3788_s1 + $0x1a0] sm:$0xff]   ;;  %v2578_v19 = vld [vmem:[%s3788_s1 + $0x1d0] sm:$0xff]   ;;  %v2584_v23 = vld [vmem:[%s3788_s1 + $0x1c8] sm:$0xff]  }
  0x1c   :  { %2261 = vmatprep.subr.bf16.mxu0 %v2497_v21  ;;  %v2565_v10 = vld [vmem:[%s3788_s1 + $0x140] sm:$0xff]   ;;  %v2579_v20 = vld [vmem:[%s3788_s1 + $0x190] sm:$0xff]   ;;  %v1880_v21 = vcombine.low %v30_v7, %v30_v7  ;;  %v43_v25 = vld [vmem:[%s3789_s0 + $0xc8] sm:$0xff] }
  0x1d   :  { %v2566_v11 = vld [vmem:[%s3788_s1 + $0x100] sm:$0xff]   ;;  %v2587_v35 = vld [vmem:[%s3789_s0 + $0xf4] ss:$8 sps:$4 sm:$0xff]  }
  0x1e   :  { %2318 = vmatpush3.bf16.msra.mxu1 %v2518_v36  ;;  %v2575_v18 = vld [vmem:[%s3789_s0 + $0xbc] ss:$8 sps:$4 sm:$0xff]   ;;  %v2577_v27 = vld [vmem:[%s3789_s0 + $0xb8] ss:$8 sps:$4 sm:$0xff]  }
  0x1f   :  { %2262 = vmatpush3.bf16.msra.mxu0 %v2498_v22  ;;  %2319 = vmatprep.subr.bf16.mxu1 %v2524_v41  ;;  %v2573_v22 = vld [vmem:[%s3789_s0 + $0xd4] ss:$8 sps:$4 sm:$0xff]   ;;  %v2590_v26 = vld [vmem:[%s3788_s1 + $0x1c0] sm:$0xff]  }
  0x20   :  { %2363 = vmatprep.subr.bf16.mxu0 %v2504_v24  ;;  %v2586_v24 = vld [vmem:[%s3788_s1 + $0x188] sm:$0xff]   ;;  %v2594_v33 = vld [vmem:[%s3789_s0 + $0x13c] ss:$8 sps:$4 sm:$0xff]   ;;  %v2592_v36 = vld [vmem:[%s3789_s0 + $0x138] ss:$8 sps:$4 sm:$0xff]  }
  0x21   :  { %v2582_v34 = vld [vmem:[%s3789_s0 + $0xe0] ss:$8 sps:$4 sm:$0xff]   ;;  %v2604_v41 = vld [vmem:[%s3789_s0 + $0x15c] ss:$8 sps:$4 sm:$0xff]  }
  0x22   :  { %394 = vmatmul.mubr.bf16.vlgmr.msra.gmra.mxu0 %v2501_v28  ;;  %2320 = vmatpush3.bf16.msra.mxu1 %v2525_v42  ;;  %v1911_v28 = vcombine.high %v43_v25, %v43_v25  ;;  %v2597_v42 = vld [vmem:[%s3789_s0 + $0x100] ss:$8 sps:$4 sm:$0xff]  }
  0x23   :  { %2364 = vmatpush3.bf16.msra.mxu0 %v2506_v29  ;;  %401 = vmatprep.mubr.bf16.mxu0 %v2510_v30  ;;  %v2591_v29 = vld [vmem:[%s3788_s1 + $0x180] sm:$0xff]   ;;  %v2571_v30 = vld [vmem:[%s3789_s0 + $0xd0] ss:$8 sps:$4 sm:$0xff]  }
  0x24   :  { %2365 = vmatprep.subr.bf16.mxu0 %v2512_v31  ;;  %2421 = vmatprep.subr.bf16.mxu1 %v2534_v49  ;;  %v2580_v31 = vld [vmem:[%s3789_s0 + $0xe4] ss:$8 sps:$4 sm:$0xff]   ;;  %v2606_v44 = vld [vmem:[%s3789_s0 + $0x158] ss:$8 sps:$4 sm:$0xff]   ;;  %v56_v49 = vld [vmem:[%s3789_s0 + $0x130] sm:$0xff] }
  0x25   :  { %645 = vmatmul.mubr.bf16.vlgmr.msra.gmra.mxu1 %v2526_v43  ;;  %v2601_v43 = vld [vmem:[%s3789_s0 + $0x114] ss:$8 sps:$4 sm:$0xff]  }
  0x26   :  { %2422 = vmatpush3.bf16.msra.mxu1 %v2535_v50  ;;  %652 = vmatprep.mubr.bf16.mxu1 %v2536_v51  ;;  %v2615_v50 = vld [vmem:[%s3789_s0 + $0x17c] ss:$8 sps:$4 sm:$0xff]   ;;  %v2609_v51 = vld [vmem:[%s3789_s0 + $0x120] ss:$8 sps:$4 sm:$0xff]  }
  0x27   :  { %2366 = vmatpush3.bf16.msra.mxu0 %v2514_v32  ;;  %2423 = vmatprep.subr.bf16.mxu1 %v2544_v57  ;;  %v1910_v32 = vcombine.low %v43_v25, %v43_v25  ;;  %v2620_v57 = vld [vmem:[%s3789_s0 + $0x188] ss:$8 sps:$4 sm:$0xff]  }
  0x28   :  { %2367 = vmatprep.subr.bf16.mxu0 %v2519_v37  ;;  %v2598_v37 = vld [vmem:[%s3789_s0 + $0x14c] ss:$8 sps:$4 sm:$0xff]  }
  0x2a   :  { %402 = vmatmul.mubr.bf16.gmra.mxu0 %v2513_v38  ;;  %2424 = vmatpush3.bf16.msra.mxu1 %v2545_v58  ;;  %v2589_v38 = vld [vmem:[%s3789_s0 + $0xf0] ss:$8 sps:$4 sm:$0xff]  }
  0x2b   :  { %409 = vmatprep.mubr.bf16.mxu0 %v2520_v39  ;;  %2368 = vmatpush3.bf16.msra.mxu0 %v2522_v40  ;;  %v2595_v39 = vld [vmem:[%s3789_s0 + $0x104] ss:$8 sps:$4 sm:$0xff]   ;;  %v2600_v40 = vld [vmem:[%s3789_s0 + $0x148] ss:$8 sps:$4 sm:$0xff]  }
  0x2c   :  { %2369 = vmatprep.subr.bf16.mxu0 %v2529_v45  ;;  %2425 = vmatprep.subr.bf16.mxu1 %v2554_v0  ;;  %v2610_v45 = vld [vmem:[%s3789_s0 + $0x16c] ss:$8 sps:$4 sm:$0xff]  }
  0x2d   :  { %653 = vmatmul.mubr.bf16.gmra.mxu1 %v2539_v55  ;;  %v1940_v55 = vcombine.low %v56_v49, %v56_v49 }
  0x2e   :  { %660 = vmatprep.mubr.bf16.mxu1 %v2547_v60  ;;  %2426 = vmatpush3.bf16.msra.mxu1 %v2555_v2 }
  0x2f   :  { %2370 = vmatpush3.bf16.msra.mxu0 %v2530_v46  ;;  %2427 = vmatprep.subr.bf16.mxu1 %v2562_v8  ;;  %v2603_v46 = vld [vmem:[%s3789_s0 + $0x110] ss:$8 sps:$4 sm:$0xff]  }
  0x30   :  { %2371 = vmatprep.subr.bf16.mxu0 %v2538_v52  ;;  %v1941_v52 = vcombine.high %v56_v49, %v56_v49 }
  0x32   :  { %410 = vmatmul.mubr.bf16.gmra.mxu0 %v2523_v47  ;;  %2428 = vmatpush3.bf16.msra.mxu1 %v2564_v9  ;;  %v2607_v47 = vld [vmem:[%s3789_s0 + $0x124] ss:$8 sps:$4 sm:$0xff]  }
  0x33   :  { %417 = vmatprep.mubr.bf16.mxu0 %v2531_v48  ;;  %2372 = vmatpush3.bf16.msra.mxu0 %v2540_v53  ;;  %v2612_v48 = vld [vmem:[%s3789_s0 + $0x168] ss:$8 sps:$4 sm:$0xff]   ;;  %v2617_v53 = vld [vmem:[%s3789_s0 + $0x178] ss:$8 sps:$4 sm:$0xff]  }
  0x34   :  { %2373 = vmatprep.subr.bf16.mxu0 %v2546_v59  ;;  %2429 = vmatprep.subr.bf16.mxu1 %v2570_v15 }
  0x35   :  { %661 = vmatmul.mubr.bf16.gmra.mxu1 %v2550_v62 }
  0x36   :  { %668 = vmatprep.mubr.bf16.mxu1 %v2558_v5  ;;  %2430 = vmatpush3.bf16.msra.mxu1 %v2574_v16 }
  0x37   :  { %2374 = vmatpush3.bf16.msra.mxu0 %v2549_v61  ;;  %2431 = vmatprep.subr.bf16.mxu1 %v2578_v19 }
  0x38   :  { %2375 = vmatprep.subr.bf16.mxu0 %v2556_v3 }
  0x3a   :  { %418 = vmatmul.mubr.bf16.gmra.mxu0 %v2533_v54  ;;  %2432 = vmatpush3.bf16.msra.mxu1 %v2579_v20  ;;  %v2618_v54 = vld [vmem:[%s3789_s0 + $0x18c] ss:$8 sps:$4 sm:$0xff]  }
  0x3b   :  { %425 = vmatprep.mubr.bf16.mxu0 %v2541_v56  ;;  %2376 = vmatpush3.bf16.msra.mxu0 %v2557_v4  ;;  %v69_v56 = vld [vmem:[%s3789_s0 + $0x198] sm:$0xff] }
  0x3c   :  { %2377 = vmatprep.subr.bf16.mxu0 %v2565_v10  ;;  %2433 = vmatprep.subr.bf16.mxu1 %v2584_v23  ;;  %v1971_v58 = vcombine.high %v69_v56, %v69_v56  ;;  %v1970_v59 = vcombine.low %v69_v56, %v69_v56 }
  0x3d   :  { %669 = vmatmul.mubr.bf16.gmra.mxu1 %v2560_v6 }
  0x3e   :  { %676 = vmatprep.mubr.bf16.mxu1 %v2567_v13  ;;  %2434 = vmatpush3.bf16.msra.mxu1 %v2586_v24 }
  0x3f   :  { %2378 = vmatpush3.bf16.msra.mxu0 %v2566_v11  ;;  %2435 = vmatprep.subr.bf16.mxu1 %v2590_v26 }
  0x42   :  { %426 = vmatmul.mubr.bf16.gmra.mxu0 %v2543_v63  ;;  %2436 = vmatpush3.bf16.msra.mxu1 %v2591_v29 }
  0x43   :  { %433 = vmatprep.mubr.bf16.mxu0 %v2551_v1 }
  0x45   :  { %677 = vmatmul.mubr.bf16.gmra.mxu1 %v2569_v17 }
  0x46   :  { %684 = vmatprep.mubr.bf16.mxu1 %v2575_v18 }
  0x4a   :  { %434 = vmatmul.mubr.bf16.gmra.mxu0 %v2553_v12 }
  0x4b   :  { %441 = vmatprep.mubr.bf16.mxu0 %v1881_v14 }
  0x4d   :  { %685 = vmatmul.mubr.bf16.gmra.mxu1 %v2577_v27 }
  0x4e   :  { %692 = vmatprep.mubr.bf16.mxu1 %v1911_v28 }
  0x52   :  { %442 = vmatmul.mubr.bf16.gmra.mxu0 %v1880_v21 }
  0x53   :  { %895 = vmatprep.mubr.bf16.mxu0 %v2573_v22 }
  0x55   :  { %693 = vmatmul.mubr.bf16.gmra.mxu1 %v1910_v32 }
  0x56   :  { %1146 = vmatprep.mubr.bf16.mxu1 %v2594_v33 }
  0x5a   :  { %896 = vmatmul.mubr.bf16.vlgmr.msra.gmra.mxu0 %v2571_v30 }
  0x5b   :  { %903 = vmatprep.mubr.bf16.mxu0 %v2580_v31 }
  0x5d   :  { %1147 = vmatmul.mubr.bf16.vlgmr.msra.gmra.mxu1 %v2592_v36 }
  0x5e   :  { %1154 = vmatprep.mubr.bf16.mxu1 %v2598_v37 }
  0x62   :  { %904 = vmatmul.mubr.bf16.gmra.mxu0 %v2582_v34 }
  0x63   :  { %911 = vmatprep.mubr.bf16.mxu0 %v2587_v35 }
  0x65   :  { %1155 = vmatmul.mubr.bf16.gmra.mxu1 %v2600_v40 }
  0x66   :  { %1162 = vmatprep.mubr.bf16.mxu1 %v2604_v41 }
  0x6a   :  { %912 = vmatmul.mubr.bf16.gmra.mxu0 %v2589_v38 }
  0x6b   :  { %919 = vmatprep.mubr.bf16.mxu0 %v2595_v39 }
  0x6d   :  { %1163 = vmatmul.mubr.bf16.gmra.mxu1 %v2606_v44 }
  0x6e   :  { %1170 = vmatprep.mubr.bf16.mxu1 %v2610_v45 }
  0x72   :  { %920 = vmatmul.mubr.bf16.gmra.mxu0 %v2597_v42 }
  0x73   :  { %927 = vmatprep.mubr.bf16.mxu0 %v2601_v43 }
  0x75   :  { %1171 = vmatmul.mubr.bf16.gmra.mxu1 %v2612_v48 }
  0x76   :  { %1178 = vmatprep.mubr.bf16.mxu1 %v2615_v50 }
  0x7a   :  { %928 = vmatmul.mubr.bf16.gmra.mxu0 %v2603_v46 }
  0x7b   :  { %935 = vmatprep.mubr.bf16.mxu0 %v2607_v47 }
  0x7d   :  { %1179 = vmatmul.mubr.bf16.gmra.mxu1 %v2617_v53 }
  0x7e   :  { %1186 = vmatprep.mubr.bf16.mxu1 %v2618_v54 }
  0x82   :  { %936 = vmatmul.mubr.bf16.gmra.mxu0 %v2609_v51 }
  0x83   :  { %943 = vmatprep.mubr.bf16.mxu0 %v1941_v52 }
  0x85   :  { %1187 = vmatmul.mubr.bf16.gmra.mxu1 %v2620_v57 }
  0x86   :  { %1194 = vmatprep.mubr.bf16.mxu1 %v1971_v58 }
  0x8a   :  { %944 = vmatmul.mubr.bf16.gmra.mxu0 %v1940_v55 }
  0x8d   :  { %1195 = vmatmul.mubr.bf16.gmra.mxu1 %v1970_v59 }
  0xe2   :  { %v2263_v60 = vpop.f32.mrf.mxu0 }
  0xe4   :  { %v2264_v61 = vpop.f32.mrf.mxu0 }
  0xe5   :  { %v2998_v62 = vadd.f32 %v2264_v61, %v2263_v60  ;;  %v2321_v7 = vpop.f32.mrf.mxu1 }
  0xe6   :  { %v2266_v63 = vpop.f32.mrf.mxu0 }
  0xe7   :  { %v2322_v10 = vpop.f32.mrf.mxu1  ;;  %v1259_v29 = vmul.f32 %v2998_v62, %v2998_v62 }
  0xe8   :  { %v2267_v0 = vpop.f32.mrf.mxu0  ;;  %v3006_v11 = vadd.f32 %v2322_v10, %v2321_v7 }
  0xe9   :  { %v3000_v1 = vadd.f32 %v2267_v0, %v2266_v63  ;;  %v2324_v13 = vpop.f32.mrf.mxu1 }
  0xea   :  { %v2269_v2 = vpop.f32.mrf.mxu0 }
  0xeb   :  { %v2325_v16 = vpop.f32.mrf.mxu1  ;;  %v1260_v25 = vmul.f32 %v3000_v1, %v3000_v1  ;;  %v1202_v33 = vadd.f32 %v3000_v1, %v2998_v62 }
  0xec   :  { %v2270_v3 = vpop.f32.mrf.mxu0  ;;  %v3010_v17 = vadd.f32 %v2325_v16, %v2324_v13 }
  0xed   :  { %v3002_v4 = vadd.f32 %v2270_v3, %v2269_v2  ;;  %v2327_v19 = vpop.f32.mrf.mxu1  ;;  %v1311_v34 = vadd.f32 %v1260_v25, %v1259_v29 }
  0xee   :  { %v2272_v5 = vpop.f32.mrf.mxu0 }
  0xef   :  { %v2328_v21 = vpop.f32.mrf.mxu1  ;;  %v1261_v30 = vmul.f32 %v3002_v4, %v3002_v4  ;;  %v1203_v39 = vadd.f32 %v3002_v4, %v1202_v33 }
  0xf0   :  { %v2273_v6 = vpop.f32.mrf.mxu0  ;;  %v3012_v22 = vadd.f32 %v2328_v21, %v2327_v19 }
  0xf1   :  { %v3004_v8 = vadd.f32 %v2273_v6, %v2272_v5  ;;  %v2330_v24 = vpop.f32.mrf.mxu1  ;;  %v1312_v41 = vadd.f32 %v1311_v34, %v1261_v30 }
  0xf2   :  { %v2275_v9 = vpop.f32.mrf.mxu0 }
  0xf3   :  { %v2331_v27 = vpop.f32.mrf.mxu1  ;;  %v1262_v35 = vmul.f32 %v3004_v8, %v3004_v8  ;;  %v1204_v45 = vadd.f32 %v3004_v8, %v1203_v39 }
  0xf4   :  { %v2276_v12 = vpop.f32.mrf.mxu0  ;;  %v3016_v28 = vadd.f32 %v2331_v27, %v2330_v24 }
  0xf5   :  { %v3008_v14 = vadd.f32 %v2276_v12, %v2275_v9  ;;  %v2333_v32 = vpop.f32.mrf.mxu1  ;;  %v1313_v47 = vadd.f32 %v1312_v41, %v1262_v35 }
  0xf6   :  { %v2278_v15 = vpop.f32.mrf.mxu0 }
  0xf7   :  { %v2334_v38 = vpop.f32.mrf.mxu1  ;;  %v1263_v42 = vmul.f32 %v3008_v14, %v3008_v14  ;;  %v1205_v51 = vadd.f32 %v3008_v14, %v1204_v45 }
  0xf8   :  { %v2279_v18 = vpop.f32.mrf.mxu0  ;;  %v3029_v40 = vadd.f32 %v2334_v38, %v2333_v32 }
  0xf9   :  { %v3026_v36 = vadd.f32 %v2279_v18, %v2278_v15  ;;  %v2336_v44 = vpop.f32.mrf.mxu1  ;;  %v1314_v54 = vadd.f32 %v1313_v47, %v1263_v42 }
  0xfa   :  { %v2281_v20 = vpop.f32.mrf.mxu0 }
  0xfb   :  { %v1264_v48 = vmul.f32 %v3026_v36, %v3026_v36  ;;  %v2337_v50 = vpop.f32.mrf.mxu1  ;;  %v1206_v57 = vadd.f32 %v3026_v36, %v1205_v51 }
  0xfc   :  { %v2282_v23 = vpop.f32.mrf.mxu0  ;;  %v3041_v53 = vadd.f32 %v2337_v50, %v2336_v44 }
  0xfd   :  { %v3034_v46 = vadd.f32 %v2282_v23, %v2281_v20  ;;  %v2339_v56 = vpop.f32.mrf.mxu1  ;;  %v1315_v60 = vadd.f32 %v1314_v54, %v1264_v48  ;;  %v1272_v54 = vmul.f32 %v3006_v11, %v3006_v11 }
  0xfe   :  { %v2284_v26 = vpop.f32.mrf.mxu0 }
  0xff   :  { %v1265_v58 = vmul.f32 %v3034_v46, %v3034_v46  ;;  %v2340_v63 = vpop.f32.mrf.mxu1  ;;  %v1207_v0 = vadd.f32 %v3034_v46, %v1206_v57 }
 0x100   :  { %v2285_v31 = vpop.f32.mrf.mxu0  ;;  %v3053_v5 = vadd.f32 %v2340_v63, %v2339_v56 }
 0x101   :  { %v3039_v52 = vadd.f32 %v2285_v31, %v2284_v26  ;;  %v2342_v7 = vpop.f32.mrf.mxu1  ;;  %v1316_v9 = vadd.f32 %v1315_v60, %v1265_v58  ;;  %v1273_v60 = vmul.f32 %v3010_v17, %v3010_v17 }
 0x102   :  { %v2287_v37 = vpop.f32.mrf.mxu0 }
 0x103   :  { %v1266_v2 = vmul.f32 %v3039_v52, %v3039_v52  ;;  %v1208_v10 = vadd.f32 %v3039_v52, %v1207_v0  ;;  %v2343_v16 = vpop.f32.mrf.mxu1 }
 0x104   :  { %v2288_v43 = vpop.f32.mrf.mxu0  ;;  %v3063_v21 = vadd.f32 %v2343_v16, %v2342_v7  ;;  %v1274_v7 = vmul.f32 %v3012_v22, %v3012_v22 }
 0x105   :  { %v3046_v59 = vadd.f32 %v2288_v43, %v2287_v37  ;;  %v1317_v18 = vadd.f32 %v1316_v9, %v1266_v2  ;;  %v2345_v24 = vpop.f32.mrf.mxu1 }
 0x106   :  { %v2290_v49 = vpop.f32.mrf.mxu0 }
 0x107   :  { %v1267_v12 = vmul.f32 %v3046_v59, %v3046_v59  ;;  %v1209_v19 = vadd.f32 %v3046_v59, %v1208_v10  ;;  %v2346_v31 = vpop.f32.mrf.mxu1 }
 0x108   :  { %v2291_v55 = vpop.f32.mrf.mxu0  ;;  %v3073_v35 = vadd.f32 %v2346_v31, %v2345_v24 }
 0x109   :  { %v3051_v3 = vadd.f32 %v2291_v55, %v2290_v49  ;;  %v1318_v25 = vadd.f32 %v1317_v18, %v1267_v12  ;;  %v2348_v38 = vpop.f32.mrf.mxu1  ;;  %v1275_v18 = vmul.f32 %v3016_v28, %v3016_v28 }
 0x10a   :  { %v2293_v61 = vpop.f32.mrf.mxu0 }
 0x10b   :  { %v1268_v20 = vmul.f32 %v3051_v3, %v3051_v3  ;;  %v1210_v26 = vadd.f32 %v3051_v3, %v1209_v19  ;;  %v2349_v44 = vpop.f32.mrf.mxu1 }
 0x10c   :  { %v2294_v6 = vpop.f32.mrf.mxu0  ;;  %v3081_v49 = vadd.f32 %v2349_v44, %v2348_v38 }
 0x10d   :  { %v3058_v13 = vadd.f32 %v2294_v6, %v2293_v61  ;;  %v1319_v32 = vadd.f32 %v1318_v25, %v1268_v20  ;;  %v2351_v51 = vpop.f32.mrf.mxu1  ;;  %v1276_v25 = vmul.f32 %v3029_v40, %v3029_v40 }
 0x10e   :  { %v2296_v15 = vpop.f32.mrf.mxu0 }
 0x10f   :  { %v1269_v27 = vmul.f32 %v3058_v13, %v3058_v13  ;;  %v1211_v33 = vadd.f32 %v3058_v13, %v1210_v26  ;;  %v2352_v58 = vpop.f32.mrf.mxu1 }
 0x110   :  { %v2297_v23 = vpop.f32.mrf.mxu0  ;;  %v3089_v0 = vadd.f32 %v2352_v58, %v2351_v51  ;;  %v1279_v51 = vmul.f32 %v3063_v21, %v3063_v21 }
 0x111   :  { %v3068_v29 = vadd.f32 %v2297_v23, %v2296_v15  ;;  %v1320_v39 = vadd.f32 %v1319_v32, %v1269_v27  ;;  %v2354_v6 = vpop.f32.mrf.mxu1 }
 0x112   :  { %v2299_v30 = vpop.f32.mrf.mxu0 }
 0x113   :  { %v1270_v34 = vmul.f32 %v3068_v29, %v3068_v29  ;;  %v1212_v41 = vadd.f32 %v3068_v29, %v1211_v33  ;;  %v2355_v16 = vpop.f32.mrf.mxu1  ;;  %v1277_v33 = vmul.f32 %v3041_v53, %v3041_v53 }
 0x114   :  { %v2300_v37 = vpop.f32.mrf.mxu0 }
 0x115   :  { %v3076_v42 = vadd.f32 %v2300_v37, %v2299_v30  ;;  %v1321_v45 = vadd.f32 %v1320_v39, %v1270_v34  ;;  %v2357_v24 = vpop.f32.mrf.mxu1 }
 0x116   :  { %v2302_v43 = vpop.f32.mrf.mxu0 }
 0x117   :  { %v1213_v47 = vadd.f32 %v3076_v42, %v1212_v41  ;;  %v1271_v48 = vmul.f32 %v3076_v42, %v3076_v42  ;;  %v2358_v32 = vpop.f32.mrf.mxu1  ;;  %v1278_v41 = vmul.f32 %v3053_v5, %v3053_v5 }
 0x118   :  { %v2303_v50 = vpop.f32.mrf.mxu0 }
 0x119   :  { %v1214_v55 = vadd.f32 %v3006_v11, %v1213_v47  ;;  %v1322_v56 = vadd.f32 %v1321_v45, %v1271_v48  ;;  %v2360_v39 = vpop.f32.mrf.mxu1 }
 0x11a   :  { %v2379_v57 = vpop.f32.mrf.mxu0 }
 0x11b   :  { %v1215_v61 = vadd.f32 %v3010_v17, %v1214_v55  ;;  %v1323_v63 = vadd.f32 %v1322_v56, %v1272_v54  ;;  %v2361_v48 = vpop.f32.mrf.mxu1 }
 0x11c   :  { %v2380_v2 = vpop.f32.mrf.mxu0 }
 0x11d   :  { %v1216_v9 = vadd.f32 %v3012_v22, %v1215_v61  ;;  %v1324_v10 = vadd.f32 %v1323_v63, %v1273_v60  ;;  %v3094_v12 = vadd.f32 %v2380_v2, %v2379_v57  ;;  %v2437_v56 = vpop.f32.mrf.mxu1  ;;  %v1280_v60 = vmul.f32 %v3073_v35, %v3073_v35 }
 0x11e   :  { %v2382_v15 = vpop.f32.mrf.mxu0  ;;  %v1281_v61 = vmul.f32 %v3081_v49, %v3081_v49 }
 0x11f   :  { %v1325_v19 = vadd.f32 %v1324_v10, %v1274_v7  ;;  %v1217_v20 = vadd.f32 %v3016_v28, %v1216_v9  ;;  %v2438_v2 = vpop.f32.mrf.mxu1  ;;  %v3121_v10 = vadd.f32 %v2355_v16, %v2354_v6 }
 0x120   :  { %v2383_v23 = vpop.f32.mrf.mxu0 }
 0x121   :  { %v1218_v26 = vadd.f32 %v3029_v40, %v1217_v20  ;;  %v1326_v27 = vadd.f32 %v1325_v19, %v1275_v18  ;;  %v3102_v30 = vadd.f32 %v2383_v23, %v2382_v15  ;;  %v3123_v15 = vadd.f32 %v2438_v2, %v2437_v56  ;;  %v2440_v19 = vpop.f32.mrf.mxu1 }
 0x122   :  { %v2385_v31 = vpop.f32.mrf.mxu0  ;;  %v1283_v6 = vmul.f32 %v3121_v10, %v3121_v10 }
 0x123   :  { %v1219_v34 = vadd.f32 %v3041_v53, %v1218_v26  ;;  %v1327_v37 = vadd.f32 %v1326_v27, %v1276_v25  ;;  %3845 = vst [vmem:[#allocation2_spill] sm:$0xff] %v3123_v15  ;;  %v1282_v25 = vmul.f32 %v3089_v0, %v3089_v0  ;;  %v3128_v26 = vadd.f32 %v2358_v32, %v2357_v24 }
 0x124   :  { %v2386_v38 = vpop.f32.mrf.mxu0 }
 0x125   :  { %v1220_v43 = vadd.f32 %v3053_v5, %v1219_v34  ;;  %v1328_v44 = vadd.f32 %v1327_v37, %v1277_v33  ;;  %v3110_v45 = vadd.f32 %v2386_v38, %v2385_v31  ;;  %v2441_v31 = vpop.f32.mrf.mxu1 }
 0x126   :  { %v2388_v47 = vpop.f32.mrf.mxu0  ;;  %v3133_v16 = vadd.f32 %v2441_v31, %v2440_v19 }
 0x127   :  { %v1221_v50 = vadd.f32 %v3063_v21, %v1220_v43  ;;  %v1329_v54 = vadd.f32 %v1328_v44, %v1278_v41  ;;  %v2443_v38 = vpop.f32.mrf.mxu1  ;;  %v1284_v43 = vmul.f32 %v3128_v26, %v3128_v26  ;;  %v1285_v44 = vmul.f32 %v3094_v12, %v3094_v12 }
 0x128   :  { %v2389_v55 = vpop.f32.mrf.mxu0  ;;  %3846 = vst [vmem:[#allocation3_spill] sm:$0xff] %v3133_v16  ;;  %v1287_v19 = vmul.f32 %v3110_v45, %v3110_v45 }
 0x129   :  { %v1330_v57 = vadd.f32 %v1329_v54, %v1279_v51  ;;  %v1222_v58 = vadd.f32 %v3073_v35, %v1221_v50  ;;  %v2444_v32 = vpop.f32.mrf.mxu1 }
 0x12a   :  { %v2391_v63 = vpop.f32.mrf.mxu0  ;;  %v3141_v51 = vadd.f32 %v2444_v32, %v2443_v38 }
 0x12b   :  { %v1331_v7 = vadd.f32 %v1330_v57, %v1280_v60  ;;  %v1223_v9 = vadd.f32 %v3081_v49, %v1222_v58  ;;  %v2446_v56 = vpop.f32.mrf.mxu1  ;;  %v1286_v57 = vmul.f32 %v3102_v30, %v3102_v30  ;;  %v3145_v58 = vadd.f32 %v2389_v55, %v2388_v47 }
 0x12c   :  { %v2392_v18 = vpop.f32.mrf.mxu0  ;;  %3847 = vst [vmem:[#allocation4_spill] sm:$0xff] %v3141_v51 }
 0x12d   :  { %v1332_v20 = vadd.f32 %v1331_v7, %v1281_v61  ;;  %v1224_v23 = vadd.f32 %v3089_v0, %v1223_v9  ;;  %v3148_v2 = vadd.f32 %v2392_v18, %v2391_v63  ;;  %v2447_v9 = vpop.f32.mrf.mxu1  ;;  %v1288_v47 = vmul.f32 %v3145_v58, %v3145_v58 }
 0x12e   :  { %v2394_v27 = vpop.f32.mrf.mxu0 }
 0x12f   :  { %v1333_v33 = vadd.f32 %v1332_v20, %v1282_v25  ;;  %v1225_v34 = vadd.f32 %v3121_v10, %v1224_v23  ;;  %v3153_v25 = vadd.f32 %v2447_v9, %v2446_v56  ;;  %v1289_v18 = vmul.f32 %v3148_v2, %v3148_v2 }
 0x130   :  { %v2395_v37 = vpop.f32.mrf.mxu0 }
 0x131   :  { %v1334_v39 = vadd.f32 %v1333_v33, %v1283_v6  ;;  %v1226_v41 = vadd.f32 %v3128_v26, %v1225_v34  ;;  %3848 = vst [vmem:[#allocation5_spill] sm:$0xff] %v3153_v25  ;;  %v2449_v33 = vpop.f32.mrf.mxu1  ;;  %v3158_v63 = vadd.f32 %v2395_v37, %v2394_v27 }
 0x132   :  { %v2397_v24 = vpop.f32.mrf.mxu0 }
 0x133   :  { %v1227_v48 = vadd.f32 %v3094_v12, %v1226_v41  ;;  %v1335_v50 = vadd.f32 %v1334_v39, %v1284_v43  ;;  %v2450_v38 = vpop.f32.mrf.mxu1  ;;  %v1290_v27 = vmul.f32 %v3158_v63, %v3158_v63 }
 0x134   :  { %v2398_v54 = vpop.f32.mrf.mxu0  ;;  %v3165_v32 = vadd.f32 %v2450_v38, %v2449_v33 }
 0x135   :  { %v1228_v60 = vadd.f32 %v3102_v30, %v1227_v48  ;;  %v1336_v61 = vadd.f32 %v1335_v50, %v1285_v44  ;;  %v3163_v43 = vadd.f32 %v2398_v54, %v2397_v24  ;;  %v2452_v48 = vpop.f32.mrf.mxu1 }
 0x136   :  { %v2400_v7 = vpop.f32.mrf.mxu0  ;;  %3849 = vst [vmem:[#allocation6_spill] sm:$0xff] %v3165_v32 }
 0x137   :  { %v1337_v20 = vadd.f32 %v1336_v61, %v1286_v57  ;;  %v1229_v23 = vadd.f32 %v3110_v45, %v1228_v60  ;;  %v2453_v61 = vpop.f32.mrf.mxu1  ;;  %v1291_v54 = vmul.f32 %v3163_v43, %v3163_v43 }
 0x138   :  { %v2401_v31 = vpop.f32.mrf.mxu0 }
 0x139   :  { %v1230_v55 = vadd.f32 %v3145_v58, %v1229_v23  ;;  %v1338_v34 = vadd.f32 %v1337_v20, %v1287_v19  ;;  %v3170_v37 = vadd.f32 %v2401_v31, %v2400_v7  ;;  %v3177_v19 = vadd.f32 %v2453_v61, %v2452_v48  ;;  %v2455_v23 = vpop.f32.mrf.mxu1 }
 0x13a   :  { %v2403_v6 = vpop.f32.mrf.mxu0 }
 0x13b   :  { %v1231_v39 = vadd.f32 %v3148_v2, %v1230_v55  ;;  %v1339_v41 = vadd.f32 %v1338_v34, %v1288_v47  ;;  %v1292_v7 = vmul.f32 %v3170_v37, %v3170_v37  ;;  %v2456_v34 = vpop.f32.mrf.mxu1 }
 0x13c   :  { %v2404_v44 = vpop.f32.mrf.mxu0 }
 0x13d   :  { %v1340_v50 = vadd.f32 %v1339_v41, %v1289_v18  ;;  %v1232_v56 = vadd.f32 %v3158_v63, %v1231_v39  ;;  %v3172_v57 = vadd.f32 %v2404_v44, %v2403_v6  ;;  %v3187_v39 = vadd.f32 %v2456_v34, %v2455_v23  ;;  %v2458_v44 = vpop.f32.mrf.mxu1 }
 0x13e   :  { %v2406_v60 = vpop.f32.mrf.mxu0 }
 0x13f   :  { %v1341_v9 = vadd.f32 %v1340_v50, %v1290_v27  ;;  %v1233_v24 = vadd.f32 %v3163_v43, %v1232_v56  ;;  %v1293_v31 = vmul.f32 %v3172_v57, %v3172_v57  ;;  %v2459_v27 = vpop.f32.mrf.mxu1 }
 0x140   :  { %v2407_v20 = vpop.f32.mrf.mxu0 }
 0x141   :  { %v1342_v33 = vadd.f32 %v1341_v9, %v1291_v54  ;;  %v1234_v47 = vadd.f32 %v3170_v37, %v1233_v24  ;;  %v3185_v38 = vadd.f32 %v2407_v20, %v2406_v60  ;;  %v3194_v24 = vadd.f32 %v2459_v27, %v2458_v44 }
 0x142   :  { %v2409_v55 = vpop.f32.mrf.mxu0 }
 0x143   :  { %v1343_v18 = vadd.f32 %v1342_v33, %v1292_v7  ;;  %v1235_v6 = vadd.f32 %v3172_v57, %v1234_v47  ;;  %3850 = vst [vmem:[#allocation7_spill] sm:$0xff] %v3185_v38  ;;  %v1294_v9 = vmul.f32 %v3185_v38, %v3185_v38  ;;  %v2461_v33 = vpop.f32.mrf.mxu1 }
 0x144   :  { %v2410_v41 = vpop.f32.mrf.mxu0 }
 0x145   :  { %v1344_v48 = vadd.f32 %v1343_v18, %v1293_v31  ;;  %v3189_v50 = vadd.f32 %v2410_v41, %v2409_v55  ;;  %v1236_v61 = vadd.f32 %v3185_v38, %v1235_v6  ;;  %v2462_v7 = vpop.f32.mrf.mxu1 }
 0x146   :  { %v2412_v56 = vpop.f32.mrf.mxu0  ;;  %v3203_v34 = vadd.f32 %v2462_v7, %v2461_v33  ;;  %v1298_v33 = vmul.f32 %v3123_v15, %v3123_v15 }
 0x147   :  { %3851 = vst [vmem:[#allocation8_spill] sm:$0xff] %v3189_v50  ;;  %v1345_v60 = vadd.f32 %v1344_v48, %v1294_v9  ;;  %v1295_v20 = vmul.f32 %v3189_v50, %v3189_v50  ;;  %v1237_v31 = vadd.f32 %v3189_v50, %v1236_v61  ;;  %v2464_v6 = vpop.f32.mrf.mxu1 }
 0x148   :  { %v2413_v54 = vpop.f32.mrf.mxu0 }
 0x149   :  { %v3198_v23 = vadd.f32 %v2413_v54, %v2412_v56  ;;  %v1346_v41 = vadd.f32 %v1345_v60, %v1295_v20  ;;  %v2465_v9 = vpop.f32.mrf.mxu1 }
 0x14a   :  { %v2415_v47 = vpop.f32.mrf.mxu0 }
 0x14b   :  { %v1296_v55 = vmul.f32 %v3198_v23, %v3198_v23  ;;  %v1238_v44 = vadd.f32 %v3198_v23, %v1237_v31  ;;  %v2467_v38 = vpop.f32.mrf.mxu1 }
 0x14c   :  { %v2416_v18 = vpop.f32.mrf.mxu0 }
 0x14d   :  { %v3206_v48 = vadd.f32 %v2416_v18, %v2415_v47  ;;  %v1347_v56 = vadd.f32 %v1346_v41, %v1296_v55  ;;  %v2468_v20 = vpop.f32.mrf.mxu1  ;;  %v1299_v47 = vmul.f32 %v3133_v16, %v3133_v16  ;;  %v1300_v41 = vmul.f32 %v3141_v51, %v3141_v51 }
 0x14e   :  { %v2418_v27 = vpop.f32.mrf.mxu0 }
 0x14f   :  { %3852 = vst [vmem:[#allocation9_spill] sm:$0xff] %v3206_v48  ;;  %v1239_v54 = vadd.f32 %v3206_v48, %v1238_v44  ;;  %v1297_v61 = vmul.f32 %v3206_v48, %v3206_v48  ;;  %v2470_v18 = vpop.f32.mrf.mxu1  ;;  %v1301_v48 = vmul.f32 %v3153_v25, %v3153_v25 }
 0x150   :  { %v2419_v50 = vpop.f32.mrf.mxu0 }
 0x151   :  { %v1240_v7 = vadd.f32 %v3123_v15, %v1239_v54  ;;  %v1348_v60 = vadd.f32 %v1347_v56, %v1297_v61  ;;  %v2471_v27 = vpop.f32.mrf.mxu1  ;;  %v1302_v15 = vmul.f32 %v3165_v32, %v3165_v32 }
 0x153   :  { %v1241_v31 = vadd.f32 %v3133_v16, %v1240_v7  ;;  %v1349_v55 = vadd.f32 %v1348_v60, %v1298_v33  ;;  %v2473_v61 = vpop.f32.mrf.mxu1  ;;  %v1303_v16 = vmul.f32 %v3177_v19, %v3177_v19 }
 0x155   :  { %v1242_v50 = vadd.f32 %v3141_v51, %v1241_v31  ;;  %v1350_v44 = vadd.f32 %v1349_v55, %v1299_v47  ;;  %v2474_v60 = vpop.f32.mrf.mxu1 }
 0x157   :  { %v1351_v54 = vadd.f32 %v1350_v44, %v1300_v41  ;;  %v1243_v56 = vadd.f32 %v3153_v25, %v1242_v50  ;;  %v2476_v55 = vpop.f32.mrf.mxu1  ;;  %v1304_v41 = vmul.f32 %v3187_v39, %v3187_v39 }
 0x159   :  { %v1244_v33 = vadd.f32 %v3165_v32, %v1243_v56  ;;  %v1352_v7 = vadd.f32 %v1351_v54, %v1301_v48  ;;  %v2477_v25 = vpop.f32.mrf.mxu1  ;;  %v1305_v48 = vmul.f32 %v3194_v24, %v3194_v24  ;;  %v3235_v56 = vadd.f32 %v2465_v9, %v2464_v6 }
 0x15b   :  { %v1245_v47 = vadd.f32 %v3177_v19, %v1244_v33  ;;  %v1353_v31 = vadd.f32 %v1352_v7, %v1302_v15  ;;  %v1306_v15 = vmul.f32 %v3203_v34, %v3203_v34  ;;  %v3240_v7 = vadd.f32 %v2468_v20, %v2467_v38 }
 0x15c   :  { %v1307_v25 = vmul.f32 %v3235_v56, %v3235_v56 }
 0x15d   :  { %v1246_v50 = vadd.f32 %v3187_v39, %v1245_v47  ;;  %v1354_v44 = vadd.f32 %v1353_v31, %v1303_v16  ;;  %3853 = vst [vmem:[#allocation10_spill] sm:$0xff] %v3240_v7  ;;  %v3245_v47 = vadd.f32 %v2471_v27, %v2470_v18  ;;  %v1308_v9 = vmul.f32 %v3240_v7, %v3240_v7 }
 0x15f   :  { %v1247_v51 = vadd.f32 %v3194_v24, %v1246_v50  ;;  %v1355_v54 = vadd.f32 %v1354_v44, %v1304_v41  ;;  %3854 = vst [vmem:[#allocation11_spill] sm:$0xff] %v3245_v47 }
 0x161   :  { %v1356_v32 = vadd.f32 %v1355_v54, %v1305_v48  ;;  %v1248_v33 = vadd.f32 %v3203_v34, %v1247_v51  ;;  %v3250_v51 = vadd.f32 %v2474_v60, %v2473_v61 }
 0x163   :  { %v1357_v55 = vadd.f32 %v1356_v32, %v1306_v15  ;;  %v1249_v16 = vadd.f32 %v3235_v56, %v1248_v33  ;;  %3855 = vst [vmem:[#allocation12_spill] sm:$0xff] %v3250_v51  ;;  %v1309_v32 = vmul.f32 %v3245_v47, %v3245_v47  ;;  %v1310_v18 = vmul.f32 %v3250_v51, %v3250_v51 }
 0x165   :  { %v1358_v31 = vadd.f32 %v1357_v55, %v1307_v25  ;;  %v1250_v6 = vadd.f32 %v3240_v7, %v1249_v16 }
 0x167   :  { %v1359_v41 = vadd.f32 %v1358_v31, %v1308_v9  ;;  %v1251_v38 = vadd.f32 %v3245_v47, %v1250_v6 }
 0x169   :  { %v1360_v20 = vadd.f32 %v1359_v41, %v1309_v32  ;;  %v1252_v50 = vadd.f32 %v3250_v51, %v1251_v38  ;;  %v1381_v51 = vlaneseq }
 0x16b   :  { %v1253_v27 = vrot.slane %v1252_v50, 4  ;;  %v1361_v44 = vadd.f32 %v1360_v20, %v1310_v18  ;;  %v1382_v20 = vshrl.u32 %v1381_v51, 7 }
 0x16d   :  { %v1254_v48 = vadd.f32 %v1253_v27, %v1252_v50  ;;  %v1362_v54 = vrot.slane %v1361_v44, 4  ;;  %v1373_v50 = vld [vmem:[%s3790_s2] sm:$0x1]  ;;  %v1383_v18 = vsub.s32 0, %v1382_v20  ;;  %v3860_v20 = vld [vmem:[#allocation3_spill] sm:$0xff] }
 0x16f   :  { %v1255_v33 = vrot.slane %v1254_v48, 2  ;;  %v1363_v15 = vadd.f32 %v1362_v54, %v1361_v44 }
 0x171   :  { %v1256_v61 = vadd.f32 %v1255_v33, %v1254_v48  ;;  %v1364_v60 = vrot.slane %v1363_v15, 2  ;;  %v1377_v48 = vld [vmem:[%s3791_s3] sm:$0x1] }
 0x173   :  { %v1257_v55 = vrot.slane %v1256_v61, 1  ;;  %v1365_v16 = vadd.f32 %v1364_v60, %v1363_v15 }
 0x175   :  { %v1258_v25 = vadd.f32 %v1257_v55, %v1256_v61  ;;  %v1366_v31 = vrot.slane %v1365_v16, 1 }
 0x177   :  { %v1367_v6 = vadd.f32 %v1366_v31, %v1365_v16  ;;  %v1368_v9 = vmul.f32 0.0025510204, %v1258_v25 }
 0x179   :  { %v1369_v41 = vmul.f32 0.0025510204, %v1367_v6  ;;  %v1370_v32 = vmul.f32 %v1368_v9, %v1368_v9 }
 0x17b   :  { %v1371_v38 = vsub.f32 %v1369_v41, %v1370_v32  ;;  %v3857_v41 = vld [vmem:[#allocation8_spill] sm:$0xff]  ;;  %v3858_v32 = vld [vmem:[#allocation9_spill] sm:$0xff] }
 0x17d   :  { %v1372_v47 = vmax.f32 %v1371_v38, 0.0  ;;  %v3859_v38 = vld [vmem:[#allocation2_spill] sm:$0xff] }
 0x17f   :  { %v1374_v7 = vadd.f32 1e-05, %v1372_v47 }
 0x181   :  { %2623 = vrsqrt.f32 %v1374_v7 }
 0x18e   :  { %v2624_v27 = vpop.eup %2623 }
 0x18f   :  { %v1376_v44 = vmul.f32 %v2624_v27, %v1373_v50  ;;  %v3861_v27 = vld [vmem:[#allocation4_spill] sm:$0xff] }
 0x191   :  { %v1378_v54 = vmul.f32 %v1376_v44, %v1368_v9  ;;  %v1384_v33 = vrot.slane %v1376_v44, %v1383_v18  ;;  %v3856_v9 = vld [vmem:[#allocation7_spill] sm:$0xff] }
 0x193   :  { %v1379_v15 = vsub.f32 %v1377_v48, %v1378_v54  ;;  %v1386_v61 = vmul.f32 %v2998_v62, %v1384_v33  ;;  %v1387_v7 = vmul.f32 %v3000_v1, %v1384_v33  ;;  %v1388_v47 = vmul.f32 %v3002_v4, %v1384_v33  ;;  %v3862_v48 = vld [vmem:[#allocation5_spill] sm:$0xff] }
 0x194   :  { %v1389_v51 = vmul.f32 %v3004_v8, %v1384_v33  ;;  %v1390_v60 = vmul.f32 %v3008_v14, %v1384_v33  ;;  %v1391_v55 = vmul.f32 %v3026_v36, %v1384_v33  ;;  %v1392_v16 = vmul.f32 %v3034_v46, %v1384_v33 }
 0x195   :  { %v1393_v25 = vmul.f32 %v3039_v52, %v1384_v33  ;;  %v1394_v31 = vmul.f32 %v3046_v59, %v1384_v33  ;;  %v1395_v6 = vmul.f32 %v3051_v3, %v1384_v33  ;;  %v1396_v62 = vmul.f32 %v3058_v13, %v1384_v33 }
 0x196   :  { %v1397_v1 = vmul.f32 %v3068_v29, %v1384_v33  ;;  %v1398_v4 = vmul.f32 %v3076_v42, %v1384_v33  ;;  %v1399_v8 = vmul.f32 %v3006_v11, %v1384_v33  ;;  %v1400_v14 = vmul.f32 %v3010_v17, %v1384_v33 }
 0x197   :  { %v1401_v36 = vmul.f32 %v3012_v22, %v1384_v33  ;;  %v1402_v46 = vmul.f32 %v3016_v28, %v1384_v33  ;;  %v1403_v52 = vmul.f32 %v3029_v40, %v1384_v33  ;;  %v1404_v59 = vmul.f32 %v3041_v53, %v1384_v33 }
 0x198   :  { %v1405_v3 = vmul.f32 %v3053_v5, %v1384_v33  ;;  %v1406_v13 = vmul.f32 %v3063_v21, %v1384_v33  ;;  %v1407_v29 = vmul.f32 %v3073_v35, %v1384_v33  ;;  %v1408_v42 = vmul.f32 %v3081_v49, %v1384_v33 }
 0x199   :  { %v1409_v11 = vmul.f32 %v3089_v0, %v1384_v33  ;;  %v1410_v17 = vmul.f32 %v3121_v10, %v1384_v33  ;;  %v1411_v22 = vmul.f32 %v3128_v26, %v1384_v33  ;;  %v1412_v28 = vmul.f32 %v3094_v12, %v1384_v33 }
 0x19a   :  { %v1413_v40 = vmul.f32 %v3102_v30, %v1384_v33  ;;  %v1414_v53 = vmul.f32 %v3110_v45, %v1384_v33  ;;  %v1415_v5 = vmul.f32 %v3145_v58, %v1384_v33  ;;  %v1416_v21 = vmul.f32 %v3148_v2, %v1384_v33 }
 0x19b   :  { %v1417_v35 = vmul.f32 %v3158_v63, %v1384_v33  ;;  %v1418_v49 = vmul.f32 %v3163_v43, %v1384_v33  ;;  %v1419_v0 = vmul.f32 %v3170_v37, %v1384_v33  ;;  %v1420_v10 = vmul.f32 %v3172_v57, %v1384_v33 }
 0x19c   :  { %v1421_v26 = vmul.f32 %v3856_v9, %v1384_v33  ;;  %v1422_v12 = vmul.f32 %v3857_v41, %v1384_v33  ;;  %v1423_v30 = vmul.f32 %v3198_v23, %v1384_v33  ;;  %v1430_v45 = vmul.f32 %v3177_v19, %v1384_v33  ;;  %v3863_v19 = vld [vmem:[#allocation6_spill] sm:$0xff] }
 0x19d   :  { %v1431_v58 = vmul.f32 %v3187_v39, %v1384_v33  ;;  %v1432_v2 = vmul.f32 %v3194_v24, %v1384_v33  ;;  %v1424_v63 = vmul.f32 %v3858_v32, %v1384_v33  ;;  %v1425_v43 = vmul.f32 %v3859_v38, %v1384_v33  ;;  %v3864_v39 = vld [vmem:[#allocation10_spill] sm:$0xff]  ;;  %v3865_v24 = vld [vmem:[#allocation11_spill] sm:$0xff]  ;;  %v3866_v38 = vld [vmem:[#allocation12_spill] sm:$0xff] }
 0x19e   :  { %v1433_v37 = vmul.f32 %v3203_v34, %v1384_v33  ;;  %v1434_v57 = vmul.f32 %v3235_v56, %v1384_v33  ;;  %v1426_v50 = vmul.f32 %v3860_v20, %v1384_v33  ;;  %v1427_v44 = vmul.f32 %v3861_v27, %v1384_v33 }
 0x19f   :  { %v1428_v23 = vmul.f32 %v3862_v48, %v1384_v33  ;;  %v1442_v54 = vrot.slane %v1379_v15, %v1383_v18  ;;  %v1429_v9 = vmul.f32 %v3863_v19, %v1384_v33  ;;  %v1435_v41 = vmul.f32 %v3864_v39, %v1384_v33 }
 0x1a0   :  { %v1436_v32 = vmul.f32 %v3865_v24, %v1384_v33  ;;  %v1437_v34 = vmul.f32 %v3866_v38, %v1384_v33 }
 0x1a1   :  { %v3316_v56 = vadd.f32 %v1442_v54, %v1386_v61  ;;  %v3318_v20 = vadd.f32 %v1442_v54, %v1387_v7  ;;  %v3320_v27 = vadd.f32 %v1442_v54, %v1388_v47  ;;  %v3322_v48 = vadd.f32 %v1442_v54, %v1389_v51 }
 0x1a2   :  { %v3324_v15 = vadd.f32 %v1442_v54, %v1390_v60  ;;  %v3326_v18 = vadd.f32 %v1442_v54, %v1391_v55  ;;  %v3328_v19 = vadd.f32 %v1442_v54, %v1392_v16  ;;  %v3330_v39 = vadd.f32 %v1442_v54, %v1393_v25 }
 0x1a3   :  { %3867 = vst [vmem:[#allocation7_spill] sm:$0xff] %v3316_v56  ;;  %3868 = vst [vmem:[#allocation8_spill] sm:$0xff] %v3318_v20  ;;  %v3332_v24 = vadd.f32 %v1442_v54, %v1394_v31  ;;  %v3334_v33 = vadd.f32 %v1442_v54, %v1395_v6  ;;  %v3336_v61 = vadd.f32 %v1442_v54, %v1396_v62 }
 0x1a4   :  { %3869 = vst [vmem:[#allocation9_spill] sm:$0xff] %v3320_v27  ;;  %3870 = vst [vmem:[#allocation2_spill] sm:$0xff] %v3322_v48  ;;  %v3338_v7 = vadd.f32 %v1442_v54, %v1397_v1  ;;  %v3340_v47 = vadd.f32 %v1442_v54, %v1398_v4  ;;  %v3342_v51 = vadd.f32 %v1442_v54, %v1399_v8 }
 0x1a5   :  { %3871 = vst [vmem:[#allocation3_spill] sm:$0xff] %v3324_v15  ;;  %3872 = vst [vmem:[#allocation4_spill] sm:$0xff] %v3326_v18  ;;  %v3344_v60 = vadd.f32 %v1442_v54, %v1400_v14  ;;  %v3346_v55 = vadd.f32 %v1442_v54, %v1401_v36  ;;  %v3348_v16 = vadd.f32 %v1442_v54, %v1402_v46  ;;  %v3450_v38 = vmul.f32 0.2, %v3334_v33 }
 0x1a6   :  { %3873 = vst [vmem:[#allocation5_spill] sm:$0xff] %v3328_v19  ;;  %3874 = vst [vmem:[#allocation6_spill] sm:$0xff] %v3330_v39  ;;  %v3350_v25 = vadd.f32 %v1442_v54, %v1403_v52  ;;  %v3352_v31 = vadd.f32 %v1442_v54, %v1404_v59  ;;  %v3354_v6 = vadd.f32 %v1442_v54, %v1405_v3 }
 0x1a7   :  { %3875 = vst [vmem:[#allocation10_spill] sm:$0xff] %v3332_v24  ;;  %3876 = vst [vmem:[#allocation11_spill] sm:$0xff] %v3334_v33  ;;  %v3356_v62 = vadd.f32 %v1442_v54, %v1406_v13  ;;  %v3358_v1 = vadd.f32 %v1442_v54, %v1407_v29  ;;  %v3360_v4 = vadd.f32 %v1442_v54, %v1408_v42 }
 0x1a8   :  { %3877 = vst [vmem:[#allocation12_spill] sm:$0xff] %v3344_v60  ;;  %3878 = vst [vmem:[#allocation13_spill] sm:$0xff] %v3350_v25  ;;  %v3362_v8 = vadd.f32 %v1442_v54, %v1409_v11  ;;  %v3364_v14 = vadd.f32 %v1442_v54, %v1410_v17  ;;  %v3366_v36 = vadd.f32 %v1442_v54, %v1411_v22 }
 0x1a9   :  { %3879 = vst [vmem:[#allocation14_spill] sm:$0xff] %v3356_v62  ;;  %v3368_v46 = vadd.f32 %v1442_v54, %v1412_v28  ;;  %v3370_v52 = vadd.f32 %v1442_v54, %v1413_v40  ;;  %v3372_v59 = vadd.f32 %v1442_v54, %v1414_v53  ;;  %v3374_v3 = vadd.f32 %v1442_v54, %v1415_v5 }
 0x1aa   :  { %3880 = vst [vmem:[#allocation15_spill] sm:$0xff] %v3362_v8  ;;  %v3376_v13 = vadd.f32 %v1442_v54, %v1416_v21  ;;  %v3378_v29 = vadd.f32 %v1442_v54, %v1417_v35  ;;  %v3380_v42 = vadd.f32 %v1442_v54, %v1418_v49  ;;  %v3382_v11 = vadd.f32 %v1442_v54, %v1419_v0 }
 0x1ab   :  { %3881 = vst [vmem:[#allocation16_spill] sm:$0xff] %v3368_v46  ;;  %3882 = vst [vmem:[#allocation17_spill] sm:$0xff] %v3374_v3  ;;  %v3384_v17 = vadd.f32 %v1442_v54, %v1420_v10  ;;  %v3386_v22 = vadd.f32 %v1442_v54, %v1421_v26  ;;  %v3388_v28 = vadd.f32 %v1442_v54, %v1422_v12 }
 0x1ac   :  { %3883 = vst [vmem:[#allocation18_spill] sm:$0xff] %v3380_v42  ;;  %v3390_v40 = vadd.f32 %v1442_v54, %v1423_v30  ;;  %v3392_v53 = vadd.f32 %v1442_v54, %v1424_v63  ;;  %v3394_v5 = vadd.f32 %v1442_v54, %v1425_v43  ;;  %v3396_v21 = vadd.f32 %v1442_v54, %v1426_v50 }
 0x1ad   :  { %3884 = vst [vmem:[#allocation19_spill] sm:$0xff] %v3386_v22  ;;  %v3398_v35 = vadd.f32 %v1442_v54, %v1427_v44  ;;  %v3400_v49 = vadd.f32 %v1442_v54, %v1428_v23  ;;  %v3402_v0 = vadd.f32 %v1442_v54, %v1429_v9  ;;  %v3404_v10 = vadd.f32 %v1442_v54, %v1430_v45 }
 0x1ae   :  { %3885 = vst [vmem:[#allocation20_spill] sm:$0xff] %v3392_v53  ;;  %3886 = vst [vmem:[#allocation21_spill] sm:$0xff] %v3396_v21  ;;  %v3406_v26 = vadd.f32 %v1442_v54, %v1431_v58  ;;  %v3408_v12 = vadd.f32 %v1442_v54, %v1432_v2  ;;  %v3410_v30 = vadd.f32 %v1442_v54, %v1433_v37  ;;  %v3421_v23 = vmul.f32 0.2, %v3316_v56 }
 0x1af   :  { %3887 = vst [vmem:[#allocation22_spill] sm:$0xff] %v3398_v35  ;;  %3888 = vst [vmem:[#allocation23_spill] sm:$0xff] %v3400_v49  ;;  %v3412_v63 = vadd.f32 %v1442_v54, %v1434_v57  ;;  %v3414_v43 = vadd.f32 %v1442_v54, %v1435_v41  ;;  %v3416_v50 = vadd.f32 %v1442_v54, %v1436_v32  ;;  %v3424_v45 = vmul.f32 0.2, %v3318_v20 }
 0x1b0   :  { %3889 = vst [vmem:[#allocation24_spill] sm:$0xff] %v3402_v0  ;;  %3890 = vst [vmem:[#allocation25_spill] sm:$0xff] %v3404_v10  ;;  %v3418_v44 = vadd.f32 %v1442_v54, %v1437_v34  ;;  %v3427_v58 = vmul.f32 0.2, %v3320_v27  ;;  %v3430_v2 = vmul.f32 0.2, %v3322_v48 }
 0x1b1   :  { %3891 = vst [vmem:[#allocation26_spill] sm:$0xff] %v3406_v26  ;;  %3892 = vst [vmem:[#allocation27_spill] sm:$0xff] %v3408_v12  ;;  %v3433_v37 = vmul.f32 0.2, %v3324_v15  ;;  %v3436_v57 = vmul.f32 0.2, %v3326_v18 }
 0x1b2   :  { %3893 = vst [vmem:[#allocation28_spill] sm:$0xff] %v3410_v30  ;;  %3894 = vst [vmem:[#allocation29_spill] sm:$0xff] %v3412_v63  ;;  %v3439_v54 = vmul.f32 0.2, %v3328_v19  ;;  %v3442_v9 = vmul.f32 0.2, %v3330_v39 }
 0x1b3   :  { %3895 = vst [vmem:[#allocation30_spill] sm:$0xff] %v3414_v43  ;;  %3896 = vst [vmem:[#allocation31_spill] sm:$0xff] %v3416_v50  ;;  %v3445_v41 = vmul.f32 0.2, %v3332_v24  ;;  %v3453_v34 = vmul.f32 0.2, %v3336_v61 }
 0x1b4   :  { %3897 = vst [vmem:[#allocation32_spill] sm:$0xff] %v3418_v44  ;;  %3898 = vst [vmem:[#allocation33_spill] sm:$0xff] %v3421_v23  ;;  %v3456_v44 = vmul.f32 0.2, %v3338_v7  ;;  %v3461_v43 = vmul.f32 0.2, %v3340_v47 }
 0x1b5   :  { %3899 = vst [vmem:[#allocation34_spill] sm:$0xff] %v3424_v45  ;;  %3900 = vst [vmem:[#allocation35_spill] sm:$0xff] %v3427_v58  ;;  %v3464_v63 = vmul.f32 0.2, %v3342_v51  ;;  %v3467_v32 = vmul.f32 0.2, %v3344_v60 }
 0x1b6   :  { %3901 = vst [vmem:[#allocation36_spill] sm:$0xff] %v3430_v2  ;;  %3902 = vst [vmem:[#allocation37_spill] sm:$0xff] %v3433_v37  ;;  %v3472_v56 = vmul.f32 0.2, %v3346_v55  ;;  %v3475_v30 = vmul.f32 0.2, %v3348_v16 }
 0x1b7   :  { %3903 = vst [vmem:[#allocation38_spill] sm:$0xff] %v3436_v57  ;;  %3904 = vst [vmem:[#allocation39_spill] sm:$0xff] %v3439_v54  ;;  %v3478_v50 = vmul.f32 0.2, %v3350_v25  ;;  %v3483_v20 = vmul.f32 0.2, %v3352_v31 }
 0x1b8   :  { %3905 = vst [vmem:[#allocation40_spill] sm:$0xff] %v3442_v9  ;;  %3906 = vst [vmem:[#allocation41_spill] sm:$0xff] %v3445_v41  ;;  %v3486_v60 = vmul.f32 0.2, %v3354_v6  ;;  %v3489_v23 = vmul.f32 0.2, %v3356_v62  ;;  %v1558_v41 = vmax.f32 %v3336_v61, %v3453_v34  ;;  %v1560_v34 = vmax.f32 %v3340_v47, %v3461_v43 }
 0x1b9   :  { %3907 = vst [vmem:[#allocation42_spill] sm:$0xff] %v3450_v38  ;;  %v3494_v27 = vmul.f32 0.2, %v3358_v1  ;;  %v3497_v25 = vmul.f32 0.2, %v3360_v4  ;;  %v1559_v38 = vmax.f32 %v3338_v7, %v3456_v44  ;;  %v1561_v44 = vmax.f32 %v3342_v51, %v3464_v63  ;;  %v3916_v43 = vld [vmem:[#allocation12_spill] sm:$0xff] }
 0x1ba   :  { %v3500_v45 = vmul.f32 0.2, %v3362_v8  ;;  %v3505_v48 = vmul.f32 0.2, %v3364_v14  ;;  %v3508_v62 = vmul.f32 0.2, %v3366_v36  ;;  %v1564_v51 = vmax.f32 %v3348_v16, %v3475_v30 }
 0x1bb   :  { %v3511_v58 = vmul.f32 0.2, %v3368_v46  ;;  %v3516_v15 = vmul.f32 0.2, %v3370_v52  ;;  %v3519_v8 = vmul.f32 0.2, %v3372_v59 }
 0x1bc   :  { %v3522_v2 = vmul.f32 0.2, %v3374_v3  ;;  %v3527_v18 = vmul.f32 0.2, %v3376_v13  ;;  %v3530_v46 = vmul.f32 0.2, %v3378_v29  ;;  %v1572_v30 = vmax.f32 %v3364_v14, %v3505_v48 }
 0x1bd   :  { %v3533_v37 = vmul.f32 0.2, %v3380_v42  ;;  %v3538_v19 = vmul.f32 0.2, %v3382_v11  ;;  %v3541_v3 = vmul.f32 0.2, %v3384_v17 }
 0x1be   :  { %v3544_v57 = vmul.f32 0.2, %v3386_v22  ;;  %v3549_v39 = vmul.f32 0.2, %v3388_v28  ;;  %v3552_v42 = vmul.f32 0.2, %v3390_v40  ;;  %v1579_v48 = vmax.f32 %v3378_v29, %v3530_v46 }
 0x1bf   :  { %v3555_v54 = vmul.f32 0.2, %v3392_v53  ;;  %v3560_v24 = vmul.f32 0.2, %v3394_v5  ;;  %v3563_v22 = vmul.f32 0.2, %v3396_v21 }
 0x1c0   :  { %v3566_v9 = vmul.f32 0.2, %v3398_v35  ;;  %v3571_v33 = vmul.f32 0.2, %v3400_v49  ;;  %v3574_v53 = vmul.f32 0.2, %v3402_v0 }
 0x1c1   :  { %v3577_v61 = vmul.f32 0.2, %v3404_v10  ;;  %v3582_v21 = vmul.f32 0.2, %v3406_v26  ;;  %v3585_v35 = vmul.f32 0.2, %v3408_v12  ;;  %v1562_v26 = vmax.f32 %v3916_v43, %v3467_v32 }
 0x1c2   :  { %3908 = vst [vmem:[#allocation43_spill] sm:$0xff] %v3566_v9  ;;  %3909 = vst [vmem:[#allocation44_spill] sm:$0xff] %v3574_v53  ;;  %v3912_v9 = vld [vmem:[#allocation28_spill] sm:$0xff]  ;;  %v3913_v0 = vld [vmem:[#allocation29_spill] sm:$0xff]  ;;  %v1587_v29 = vmax.f32 %v3394_v5, %v3560_v24 }
 0x1c3   :  { %3910 = vst [vmem:[#allocation45_spill] sm:$0xff] %v3577_v61  ;;  %3911 = vst [vmem:[#allocation46_spill] sm:$0xff] %v3585_v35  ;;  %v3588_v7 = vmul.f32 0.2, %v3912_v9  ;;  %v3593_v53 = vmul.f32 0.2, %v3913_v0  ;;  %v1563_v9 = vmax.f32 %v3346_v55, %v3472_v56  ;;  %v1570_v56 = vmax.f32 %v3360_v4, %v3497_v25 }
 0x1c4   :  { %v3914_v10 = vld [vmem:[#allocation30_spill] sm:$0xff]  ;;  %v3915_v49 = vld [vmem:[#allocation31_spill] sm:$0xff]  ;;  %v3917_v12 = vld [vmem:[#allocation32_spill] sm:$0xff]  ;;  %v1578_v4 = vmax.f32 %v3376_v13, %v3527_v18  ;;  %v1585_v18 = vmax.f32 %v3390_v40, %v3552_v42 }
 0x1c5   :  { %v3596_v61 = vmul.f32 0.2, %v3914_v10  ;;  %v3599_v47 = vmul.f32 0.2, %v3915_v49  ;;  %v3604_v35 = vmul.f32 0.2, %v3917_v12  ;;  %v1566_v10 = vmax.f32 %v3352_v31, %v3483_v20 }
 0x1c6   :  { %v3918_v63 = vld [vmem:[#allocation13_spill] sm:$0xff]  ;;  %v1567_v49 = vmax.f32 %v3354_v6, %v3486_v60  ;;  %v3919_v32 = vld [vmem:[#allocation14_spill] sm:$0xff]  ;;  %v1569_v12 = vmax.f32 %v3358_v1, %v3494_v27  ;;  %v3920_v55 = vld [vmem:[#allocation15_spill] sm:$0xff]  ;;  %v1573_v20 = vmax.f32 %v3366_v36, %v3508_v62  ;;  %v1575_v6 = vmax.f32 %v3370_v52, %v3516_v15 }
 0x1c7   :  { %v1565_v0 = vmax.f32 %v3918_v63, %v3478_v50  ;;  %v1568_v43 = vmax.f32 %v3919_v32, %v3489_v23  ;;  %v1571_v16 = vmax.f32 %v3920_v55, %v3500_v45  ;;  %v3921_v60 = vld [vmem:[#allocation16_spill] sm:$0xff]  ;;  %v1576_v27 = vmax.f32 %v3372_v59, %v3519_v8  ;;  %v3922_v25 = vld [vmem:[#allocation17_spill] sm:$0xff]  ;;  %v3923_v62 = vld [vmem:[#allocation18_spill] sm:$0xff] }
 0x1c8   :  { %v1574_v31 = vmax.f32 %v3921_v60, %v3511_v58  ;;  %v1577_v1 = vmax.f32 %v3922_v25, %v3522_v2  ;;  %v1580_v14 = vmax.f32 %v3923_v62, %v3533_v37  ;;  %v1581_v36 = vmax.f32 %v3382_v11, %v3538_v19  ;;  %v3924_v8 = vld [vmem:[#allocation19_spill] sm:$0xff]  ;;  %v3925_v46 = vld [vmem:[#allocation20_spill] sm:$0xff]  ;;  %v3926_v19 = vld [vmem:[#allocation21_spill] sm:$0xff] }
 0x1c9   :  { %v1582_v15 = vmax.f32 %v3384_v17, %v3541_v3  ;;  %v1583_v52 = vmax.f32 %v3924_v8, %v3544_v57  ;;  %v1584_v59 = vmax.f32 %v3388_v28, %v3549_v39  ;;  %v1586_v13 = vmax.f32 %v3925_v46, %v3555_v54  ;;  %v3927_v50 = vld [vmem:[#allocation43_spill] sm:$0xff]  ;;  %v3928_v3 = vld [vmem:[#allocation22_spill] sm:$0xff]  ;;  %v3930_v58 = vld [vmem:[#allocation44_spill] sm:$0xff] }
 0x1ca   :  { %v1588_v11 = vmax.f32 %v3926_v19, %v3563_v22  ;;  %v1589_v17 = vmax.f32 %v3928_v3, %v3927_v50  ;;  %v3929_v23 = vld [vmem:[#allocation23_spill] sm:$0xff]  ;;  %v3931_v39 = vld [vmem:[#allocation24_spill] sm:$0xff]  ;;  %v3932_v2 = vld [vmem:[#allocation45_spill] sm:$0xff] }
 0x1cb   :  { %v1590_v45 = vmax.f32 %v3929_v23, %v3571_v33  ;;  %v1591_v28 = vmax.f32 %v3931_v39, %v3930_v58  ;;  %v3933_v42 = vld [vmem:[#allocation25_spill] sm:$0xff]  ;;  %v3934_v37 = vld [vmem:[#allocation26_spill] sm:$0xff]  ;;  %v3936_v24 = vld [vmem:[#allocation27_spill] sm:$0xff] }
 0x1cc   :  { %v1592_v40 = vmax.f32 %v3933_v42, %v3932_v2  ;;  %v1593_v57 = vmax.f32 %v3934_v37, %v3582_v21  ;;  %v3935_v54 = vld [vmem:[#allocation46_spill] sm:$0xff]  ;;  %v3937_v22 = vld [vmem:[#allocation28_spill] sm:$0xff]  ;;  %v3938_v32 = vld [vmem:[#allocation29_spill] sm:$0xff] }
 0x1cd   :  { %v1594_v5 = vmax.f32 %v3936_v24, %v3935_v54  ;;  %v1595_v63 = vmax.f32 %v3937_v22, %v3588_v7  ;;  %v1596_v55 = vmax.f32 %v3938_v32, %v3593_v53  ;;  %v3939_v33 = vld [vmem:[#allocation30_spill] sm:$0xff]  ;;  %v3940_v25 = vld [vmem:[#allocation31_spill] sm:$0xff]  ;;  %v3941_v8 = vld [vmem:[#allocation32_spill] sm:$0xff] }
 0x1ce   :  { %v1597_v60 = vmax.f32 %v3939_v33, %v3596_v61  ;;  %v1598_v62 = vmax.f32 %v3940_v25, %v3599_v47  ;;  %v1599_v46 = vmax.f32 %v3941_v8, %v3604_v35  ;;  %v3942_v19 = vld [vmem:[#allocation7_spill] sm:$0xff]  ;;  %v3943_v21 = vld [vmem:[#allocation33_spill] sm:$0xff]  ;;  %v3945_v3 = vld [vmem:[#allocation8_spill] sm:$0xff] }
 0x1cf   :  { %v3944_v50 = vmax.f32 %v3942_v19, %v3943_v21  ;;  %v3946_v23 = vld [vmem:[#allocation34_spill] sm:$0xff]  ;;  %v3948_v7 = vld [vmem:[#allocation9_spill] sm:$0xff]  ;;  %v3949_v2 = vld [vmem:[#allocation35_spill] sm:$0xff] }
 0x1d0   :  { %v3947_v58 = vmax.f32 %v3945_v3, %v3946_v23  ;;  %v3950_v42 = vmax.f32 %v3948_v7, %v3949_v2  ;;  %v3951_v53 = vld [vmem:[#allocation2_spill] sm:$0xff]  ;;  %v3952_v37 = vld [vmem:[#allocation36_spill] sm:$0xff]  ;;  %v3954_v24 = vld [vmem:[#allocation3_spill] sm:$0xff] }
 0x1d1   :  { %v3953_v54 = vmax.f32 %v3951_v53, %v3952_v37  ;;  %v3955_v22 = vld [vmem:[#allocation37_spill] sm:$0xff]  ;;  %v3957_v32 = vld [vmem:[#allocation4_spill] sm:$0xff]  ;;  %v3958_v33 = vld [vmem:[#allocation38_spill] sm:$0xff] }
 0x1d2   :  { %v2095_v39 = vpack.c.bf16 %v3947_v58, %v3944_v50  ;;  %v3956_v47 = vmax.f32 %v3954_v24, %v3955_v22  ;;  %v3959_v35 = vmax.f32 %v3957_v32, %v3958_v33  ;;  %v3960_v8 = vld [vmem:[#allocation5_spill] sm:$0xff]  ;;  %v3961_v19 = vld [vmem:[#allocation39_spill] sm:$0xff]  ;;  %v3963_v3 = vld [vmem:[#allocation6_spill] sm:$0xff]  ;;  %v2120_v24 = vpack.c.bf16 %v1559_v38, %v1558_v41 }
 0x1d3   :  { %v2100_v61 = vpack.c.bf16 %v3953_v54, %v3950_v42  ;;  %v3962_v21 = vmax.f32 %v3960_v8, %v3961_v19  ;;  %v3964_v23 = vld [vmem:[#allocation40_spill] sm:$0xff]  ;;  %v3966_v2 = vld [vmem:[#allocation10_spill] sm:$0xff]  ;;  %v3967_v7 = vld [vmem:[#allocation41_spill] sm:$0xff]  ;;  %v2130_v32 = vpack.c.bf16 %v1563_v9, %v1562_v26  ;;  %v2135_v33 = vpack.c.bf16 %v1565_v0, %v1564_v51 }
 0x1d4   :  { %v2105_v25 = vpack.c.bf16 %v3959_v35, %v3956_v47  ;;  %v3965_v50 = vmax.f32 %v3963_v3, %v3964_v23  ;;  %v3968_v37 = vmax.f32 %v3966_v2, %v3967_v7  ;;  %v3969_v53 = vld [vmem:[#allocation11_spill] sm:$0xff]  ;;  %v3970_v42 = vld [vmem:[#allocation42_spill] sm:$0xff]  ;;  %2096 = vst [vmem:[%s3792_s4] sm:$0xff] %v2095_v39   ;;  %v2125_v47 = vpack.c.bf16 %v1561_v44, %v1560_v34 }
 0x1d5   :  { %v3971_v54 = vmax.f32 %v3969_v53, %v3970_v42  ;;  %2222 = vst [vmem:[%s3792_s4 + $0x8] sm:$0xff] %v2100_v61   ;;  %v2140_v35 = vpack.c.bf16 %v1567_v49, %v1566_v10  ;;  %2226 = vst [vmem:[%s3792_s4 + $0x28] sm:$0xff] %v2120_v24   ;;  %v2145_v41 = vpack.c.bf16 %v1569_v12, %v1568_v43 }
 0x1d6   :  { %v2110_v58 = vpack.c.bf16 %v3965_v50, %v3962_v21  ;;  %2223 = vst [vmem:[%s3792_s4 + $0x10] sm:$0xff] %v2105_v25   ;;  %v2150_v26 = vpack.c.bf16 %v1571_v16, %v1570_v56  ;;  %v2155_v0 = vpack.c.bf16 %v1573_v20, %v1572_v30  ;;  %v2160_v49 = vpack.c.bf16 %v1575_v6, %v1574_v31 }
 0x1d7   :  { %v2115_v22 = vpack.c.bf16 %v3971_v54, %v3968_v37  ;;  %2227 = vst [vmem:[%s3792_s4 + $0x30] sm:$0xff] %v2125_v47   ;;  %2228 = vst [vmem:[%s3792_s4 + $0x38] sm:$0xff] %v2130_v32   ;;  %v2165_v10 = vpack.c.bf16 %v1577_v1, %v1576_v27  ;;  %v2170_v12 = vpack.c.bf16 %v1579_v48, %v1578_v4 }
 0x1d8   :  { %2224 = vst [vmem:[%s3792_s4 + $0x18] sm:$0xff] %v2110_v58   ;;  %2229 = vst [vmem:[%s3792_s4 + $0x40] sm:$0xff] %v2135_v33   ;;  %v2175_v9 = vpack.c.bf16 %v1581_v36, %v1580_v14  ;;  %v2180_v38 = vpack.c.bf16 %v1583_v52, %v1582_v15  ;;  %v2185_v34 = vpack.c.bf16 %v1585_v18, %v1584_v59 }
 0x1d9   :  { %2225 = vst [vmem:[%s3792_s4 + $0x20] sm:$0xff] %v2115_v22   ;;  %2230 = vst [vmem:[%s3792_s4 + $0x48] sm:$0xff] %v2140_v35   ;;  %v2190_v44 = vpack.c.bf16 %v1587_v29, %v1586_v13  ;;  %v2195_v51 = vpack.c.bf16 %v1589_v17, %v1588_v11  ;;  %v2200_v43 = vpack.c.bf16 %v1591_v28, %v1590_v45 }
 0x1da   :  { %2231 = vst [vmem:[%s3792_s4 + $0x50] sm:$0xff] %v2145_v41   ;;  %2232 = vst [vmem:[%s3792_s4 + $0x58] sm:$0xff] %v2150_v26   ;;  %v2205_v56 = vpack.c.bf16 %v1593_v57, %v1592_v40  ;;  %v2210_v16 = vpack.c.bf16 %v1595_v63, %v1594_v5  ;;  %v2215_v30 = vpack.c.bf16 %v1597_v60, %v1596_v55 }
 0x1db   :  { %2233 = vst [vmem:[%s3792_s4 + $0x60] sm:$0xff] %v2155_v0   ;;  %2234 = vst [vmem:[%s3792_s4 + $0x68] sm:$0xff] %v2160_v49   ;;  %v2220_v20 = vpack.c.bf16 %v1599_v46, %v1598_v62 }
 0x1dc   :  { %2235 = vst [vmem:[%s3792_s4 + $0x70] sm:$0xff] %v2165_v10   ;;  %2236 = vst [vmem:[%s3792_s4 + $0x78] sm:$0xff] %v2170_v12  }
 0x1dd   :  { %2237 = vst [vmem:[%s3792_s4 + $0x80] sm:$0xff] %v2175_v9   ;;  %2238 = vst [vmem:[%s3792_s4 + $0x88] sm:$0xff] %v2180_v38  }
 0x1de   :  { %2239 = vst [vmem:[%s3792_s4 + $0x90] sm:$0xff] %v2185_v34   ;;  %2240 = vst [vmem:[%s3792_s4 + $0x98] sm:$0xff] %v2190_v44  }
 0x1df   :  { %2241 = vst [vmem:[%s3792_s4 + $0xa0] sm:$0xff] %v2195_v51   ;;  %2242 = vst [vmem:[%s3792_s4 + $0xa8] sm:$0xff] %v2200_v43  }
 0x1e0   :  { %2243 = vst [vmem:[%s3792_s4 + $0xb0] sm:$0xff] %v2205_v56   ;;  %2244 = vst [vmem:[%s3792_s4 + $0xb8] sm:$0xff] %v2210_v16  }
 0x1e1   :  { %2245 = vst [vmem:[%s3792_s4 + $0xc0] sm:$0xff] %v2215_v30   ;;  %2246 = vst [vmem:[%s3792_s4 + $0xc8] sm:$0xff] %v2220_v20  }

// kernel: a_call__.7
= control target key start
LH: loop header
LB: loop body
LE: loop exit
PB: predicated region body
PF: predicated region fallthrough
CT: control target
= control target key end

     0   :  { %v1744_v0 = vmov 0   ;;  %v1745_v2 = vmov 0.0   ;;  %vm1746_vm0 = vmmov 0   ;;  %vm634_vm1 = vcmask 261120   ;;  %s2472_s1 = inlined_call_operand.vmem [shape: bf16[288,128], index: 1, kind: input, shape index: {}]   ;;  %s2473_s0 = inlined_call_operand.vmem [shape: bf16[392,288], index: 0, kind: input, shape index: {}]   ;;  %s2474_s2 = inlined_call_operand.vmem [shape: f32[1,128], index: 2, kind: input, shape index: {}]   ;;  %s2475_s3 = inlined_call_operand.vmem [shape: f32[392,128], index: 3, kind: output, shape index: {}]  }
   0x1   :  { %710 = vmatprep.subr.bf16.mxu0 %v1744_v0  ;;  %v1529_v1 = vld [vmem:[%s2472_s1 + $0x38] sm:$0xff]   ;;  %1422 = vmatprep.subr.bf16.mxu1 %v1745_v2  ;;  %v1530_v3 = vld [vmem:[%s2472_s1 + $0x30] sm:$0xff]   ;;  %v1531_v4 = vld [vmem:[%s2472_s1 + $0x28] sm:$0xff]  }
   0x2   :  { %1426 = vmatprep.mubr.msk.bf16.mxu1 %vm1746_vm0, %v1745_v2  ;;  %711 = vmatpush1.bf16.msra.mxu0 %v1529_v1  ;;  %v1532_v5 = vld [vmem:[%s2472_s1 + $0x20] sm:$0xff]   ;;  %v1533_v6 = vld [vmem:[%s2472_s1 + $0x18] sm:$0xff]   ;;  %v1543_v7 = vld [vmem:[%s2472_s1 + $0x88] sm:$0xff]  }
   0x3   :  { %712 = vmatprep.subr.bf16.mxu0 %v1744_v0  ;;  %1423 = vmatpush3.bf16.msra.mxu1 %v1543_v7  ;;  %v1545_v8 = vld [vmem:[%s2472_s1 + $0x80] sm:$0xff]   ;;  %v1534_v9 = vld [vmem:[%s2472_s1 + $0x10] sm:$0xff]   ;;  %v1535_v12 = vld [vmem:[%s2472_s1 + $0x8] sm:$0xff]  }
   0x4   :  { %1424 = vmatprep.subr.bf16.mxu1 %v1745_v2  ;;  %v1546_v10 = vld [vmem:[%s2473_s0 + $0x8] ss:$12 sps:$4 sm:$0xff]   ;;  %v1550_v11 = vld [vmem:[%s2473_s0 + $0x4] ss:$12 sps:$4 sm:$0xff]   ;;  %v1551_v14 = vld [vmem:[%s2473_s0 + $0x20] ss:$12 sps:$4 sm:$0xff]  }
   0x5   :  { %742 = vmatprep.mubr.bf16.mxu0 %v1550_v11  ;;  %v1536_v13 = vld [vmem:[%s2472_s1] sm:$0xff]   ;;  %v1537_v15 = vld [vmem:[%s2472_s1 + $0x78] sm:$0xff]   ;;  %v1538_v16 = vld [vmem:[%s2472_s1 + $0x70] sm:$0xff]  }
   0x6   :  { %713 = vmatpush1.bf16.msra.mxu0 %v1530_v3  ;;  %v1555_v17 = vld [vmem:[%s2473_s0 + $0x38] ss:$12 sps:$4 sm:$0xff]   ;;  %v1539_v18 = vld [vmem:[%s2472_s1 + $0x68] sm:$0xff]   ;;  %v1559_v20 = vld [vmem:[%s2473_s0 + $0x50] ss:$12 sps:$4 sm:$0xff]  }
   0x7   :  { %714 = vmatprep.subr.bf16.mxu0 %v1744_v0  ;;  %1425 = vmatpush3.bf16.msra.mxu1 %v1545_v8  ;;  %v1540_v19 = vld [vmem:[%s2472_s1 + $0x60] sm:$0xff]   ;;  %v1541_v21 = vld [vmem:[%s2472_s1 + $0x58] sm:$0xff]   ;;  %v1542_v22 = vld [vmem:[%s2472_s1 + $0x50] sm:$0xff]  }
   0x8   :  { %v1563_v23 = vld [vmem:[%s2473_s0 + $0x68] ss:$12 sps:$4 sm:$0xff]   ;;  %v1547_v25 = vld [vmem:[%s2472_s1 + $0x40] sm:$0xff]   ;;  %v1575_v32 = vld [vmem:[%s2473_s0 + $0xb0] ss:$12 sps:$4 sm:$0xff]  }
   0x9   :  { %v1544_v24 = vld [vmem:[%s2472_s1 + $0x48] sm:$0xff]   ;;  %v1571_v29 = vld [vmem:[%s2473_s0 + $0x98] ss:$12 sps:$4 sm:$0xff]   ;;  %v1556_v31 = vld [vmem:[%s2473_s0 + $0x34] ss:$12 sps:$4 sm:$0xff]  }
   0xa   :  { %715 = vmatpush1.bf16.msra.mxu0 %v1531_v4  ;;  %1427 = vmatmul.mubr.msk.bf16.vlgmr.msra.gmra.mxu1 %vm634_vm1, %v1546_v10  ;;  %v1567_v26 = vld [vmem:[%s2473_s0 + $0x80] ss:$12 sps:$4 sm:$0xff]   ;;  %v1552_v28 = vld [vmem:[%s2473_s0 + $0x1c] ss:$12 sps:$4 sm:$0xff]   ;;  %v1554_v30 = vld [vmem:[%s2473_s0 + $0x18] ss:$12 sps:$4 sm:$0xff]  }
   0xb   :  { %716 = vmatprep.subr.bf16.mxu0 %v1744_v0  ;;  %1430 = vmatprep.mubr.msk.bf16.mxu1 %vm1746_vm0, %v1745_v2  ;;  %v1548_v27 = vld [vmem:[%s2473_s0] ss:$12 sps:$4 sm:$0xff]   ;;  %v1558_v33 = vld [vmem:[%s2473_s0 + $0x30] ss:$12 sps:$4 sm:$0xff]   ;;  %v1579_v35 = vld [vmem:[%s2473_s0 + $0xc8] ss:$12 sps:$4 sm:$0xff]  }
   0xc   :  { %v1560_v34 = vld [vmem:[%s2473_s0 + $0x4c] ss:$12 sps:$4 sm:$0xff]   ;;  %v1562_v36 = vld [vmem:[%s2473_s0 + $0x48] ss:$12 sps:$4 sm:$0xff]   ;;  %v1564_v37 = vld [vmem:[%s2473_s0 + $0x64] ss:$12 sps:$4 sm:$0xff]  }
   0xd   :  { %v1583_v38 = vld [vmem:[%s2473_s0 + $0xe0] ss:$12 sps:$4 sm:$0xff]   ;;  %v1568_v40 = vld [vmem:[%s2473_s0 + $0x7c] ss:$12 sps:$4 sm:$0xff]   ;;  %v1587_v41 = vld [vmem:[%s2473_s0 + $0xf8] ss:$12 sps:$4 sm:$0xff]  }
   0xe   :  { %717 = vmatpush1.bf16.msra.mxu0 %v1532_v5  ;;  %v1566_v39 = vld [vmem:[%s2473_s0 + $0x60] ss:$12 sps:$4 sm:$0xff]   ;;  %v1570_v42 = vld [vmem:[%s2473_s0 + $0x78] ss:$12 sps:$4 sm:$0xff]   ;;  %v1591_v44 = vld [vmem:[%s2473_s0 + $0x110] ss:$12 sps:$4 sm:$0xff]  }
   0xf   :  { %718 = vmatprep.subr.bf16.mxu0 %v1744_v0  ;;  %v1572_v43 = vld [vmem:[%s2473_s0 + $0x94] ss:$12 sps:$4 sm:$0xff]   ;;  %v1574_v45 = vld [vmem:[%s2473_s0 + $0x90] ss:$12 sps:$4 sm:$0xff]   ;;  %v1576_v46 = vld [vmem:[%s2473_s0 + $0xac] ss:$12 sps:$4 sm:$0xff]  }
  0x10   :  { %v1595_v47 = vld [vmem:[%s2473_s0 + $0x128] ss:$12 sps:$4 sm:$0xff]   ;;  %v1580_v49 = vld [vmem:[%s2473_s0 + $0xc4] ss:$12 sps:$4 sm:$0xff]   ;;  %v1599_v50 = vld [vmem:[%s2473_s0 + $0x140] ss:$12 sps:$4 sm:$0xff]  }
  0x11   :  { %v1578_v48 = vld [vmem:[%s2473_s0 + $0xa8] ss:$12 sps:$4 sm:$0xff]   ;;  %v1582_v51 = vld [vmem:[%s2473_s0 + $0xc0] ss:$12 sps:$4 sm:$0xff]   ;;  %v1603_v53 = vld [vmem:[%s2473_s0 + $0x158] ss:$12 sps:$4 sm:$0xff]  }
  0x12   :  { %719 = vmatpush1.bf16.msra.mxu0 %v1533_v6  ;;  %1431 = vmatmul.mubr.msk.bf16.gmra.mxu1 %vm634_vm1, %v1551_v14  ;;  %v1584_v52 = vld [vmem:[%s2473_s0 + $0xdc] ss:$12 sps:$4 sm:$0xff]   ;;  %v1586_v54 = vld [vmem:[%s2473_s0 + $0xd8] ss:$12 sps:$4 sm:$0xff]   ;;  %v1588_v55 = vld [vmem:[%s2473_s0 + $0xf4] ss:$12 sps:$4 sm:$0xff]  }
  0x13   :  { %720 = vmatprep.subr.bf16.mxu0 %v1744_v0  ;;  %1434 = vmatprep.mubr.msk.bf16.mxu1 %vm1746_vm0, %v1745_v2  ;;  %v1607_v56 = vld [vmem:[%s2473_s0 + $0x170] ss:$12 sps:$4 sm:$0xff]   ;;  %v1592_v58 = vld [vmem:[%s2473_s0 + $0x10c] ss:$12 sps:$4 sm:$0xff]   ;;  %v1611_v59 = vld [vmem:[%s2473_s0 + $0x188] ss:$12 sps:$4 sm:$0xff]  }
  0x14   :  { %v1590_v57 = vld [vmem:[%s2473_s0 + $0xf0] ss:$12 sps:$4 sm:$0xff]   ;;  %v1594_v60 = vld [vmem:[%s2473_s0 + $0x108] ss:$12 sps:$4 sm:$0xff]   ;;  %v1615_v62 = vld [vmem:[%s2473_s0 + $0x1a0] ss:$12 sps:$4 sm:$0xff]  }
  0x15   :  { %v1596_v61 = vld [vmem:[%s2473_s0 + $0x124] ss:$12 sps:$4 sm:$0xff]   ;;  %v1598_v63 = vld [vmem:[%s2473_s0 + $0x120] ss:$12 sps:$4 sm:$0xff]   ;;  %v1627_v8 = vld [vmem:[%s2473_s0 + $0x1e8] ss:$12 sps:$4 sm:$0xff]  }
  0x16   :  { %721 = vmatpush1.bf16.msra.mxu0 %v1534_v9  ;;  %v1619_v1 = vld [vmem:[%s2473_s0 + $0x1b8] ss:$12 sps:$4 sm:$0xff]   ;;  %v1604_v4 = vld [vmem:[%s2473_s0 + $0x154] ss:$12 sps:$4 sm:$0xff]   ;;  %v1623_v5 = vld [vmem:[%s2473_s0 + $0x1d0] ss:$12 sps:$4 sm:$0xff]  }
  0x17   :  { %722 = vmatprep.subr.bf16.mxu0 %v1744_v0  ;;  %v1602_v3 = vld [vmem:[%s2473_s0 + $0x138] ss:$12 sps:$4 sm:$0xff]   ;;  %v1606_v6 = vld [vmem:[%s2473_s0 + $0x150] ss:$12 sps:$4 sm:$0xff]   ;;  %v1610_v9 = vld [vmem:[%s2473_s0 + $0x168] ss:$12 sps:$4 sm:$0xff]  }
  0x18   :  { %v1608_v7 = vld [vmem:[%s2473_s0 + $0x16c] ss:$12 sps:$4 sm:$0xff]   ;;  %v1612_v10 = vld [vmem:[%s2473_s0 + $0x184] ss:$12 sps:$4 sm:$0xff]  }
  0x19   :  { %v1631_v11 = vld [vmem:[%s2473_s0 + $0x200] ss:$12 sps:$4 sm:$0xff]   ;;  %v1635_v14 = vld [vmem:[%s2473_s0 + $0x218] ss:$12 sps:$4 sm:$0xff]  }
  0x1a   :  { %723 = vmatpush1.bf16.msra.mxu0 %v1535_v12  ;;  %1435 = vmatmul.mubr.msk.bf16.gmra.mxu1 %vm634_vm1, %v1555_v17  ;;  %v1614_v12 = vld [vmem:[%s2473_s0 + $0x180] ss:$12 sps:$4 sm:$0xff]   ;;  %v1639_v17 = vld [vmem:[%s2473_s0 + $0x230] ss:$12 sps:$4 sm:$0xff]  }
  0x1b   :  { %724 = vmatprep.subr.bf16.mxu0 %v1744_v0  ;;  %1438 = vmatprep.mubr.msk.bf16.mxu1 %vm1746_vm0, %v1745_v2 }
  0x1e   :  { %725 = vmatpush1.bf16.msra.mxu0 %v1536_v13  ;;  %v1616_v13 = vld [vmem:[%s2473_s0 + $0x19c] ss:$12 sps:$4 sm:$0xff]  }
  0x1f   :  { %726 = vmatprep.subr.bf16.mxu0 %v1744_v0 }
  0x22   :  { %727 = vmatpush2.bf16.msra.mxu0 %v1537_v15  ;;  %1439 = vmatmul.mubr.msk.bf16.gmra.mxu1 %vm634_vm1, %v1559_v20  ;;  %v1618_v15 = vld [vmem:[%s2473_s0 + $0x198] ss:$12 sps:$4 sm:$0xff]   ;;  %v1643_v20 = vld [vmem:[%s2473_s0 + $0x248] ss:$0 sps:$4 sm:$0xff]  }
  0x23   :  { %728 = vmatprep.subr.bf16.mxu0 %v1744_v0  ;;  %1442 = vmatprep.mubr.msk.bf16.mxu1 %vm1746_vm0, %v1745_v2 }
  0x26   :  { %729 = vmatpush2.bf16.msra.mxu0 %v1538_v16  ;;  %v1620_v16 = vld [vmem:[%s2473_s0 + $0x1b4] ss:$12 sps:$4 sm:$0xff]  }
  0x27   :  { %730 = vmatprep.subr.bf16.mxu0 %v1744_v0 }
  0x2a   :  { %731 = vmatpush2.bf16.msra.mxu0 %v1539_v18  ;;  %1443 = vmatmul.mubr.msk.bf16.gmra.mxu1 %vm634_vm1, %v1563_v23  ;;  %v1622_v18 = vld [vmem:[%s2473_s0 + $0x1b0] ss:$12 sps:$4 sm:$0xff]  }
  0x2b   :  { %732 = vmatprep.subr.bf16.mxu0 %v1744_v0  ;;  %1446 = vmatprep.mubr.msk.bf16.mxu1 %vm1746_vm0, %v1745_v2 }
  0x2e   :  { %733 = vmatpush2.bf16.msra.mxu0 %v1540_v19  ;;  %v1624_v19 = vld [vmem:[%s2473_s0 + $0x1cc] ss:$12 sps:$4 sm:$0xff]  }
  0x2f   :  { %734 = vmatprep.subr.bf16.mxu0 %v1744_v0 }
  0x32   :  { %735 = vmatpush2.bf16.msra.mxu0 %v1541_v21  ;;  %1447 = vmatmul.mubr.msk.bf16.gmra.mxu1 %vm634_vm1, %v1567_v26  ;;  %v1626_v21 = vld [vmem:[%s2473_s0 + $0x1c8] ss:$12 sps:$4 sm:$0xff]  }
  0x33   :  { %736 = vmatprep.subr.bf16.mxu0 %v1744_v0  ;;  %1450 = vmatprep.mubr.msk.bf16.mxu1 %vm1746_vm0, %v1745_v2 }
  0x36   :  { %737 = vmatpush2.bf16.msra.mxu0 %v1542_v22  ;;  %v1628_v22 = vld [vmem:[%s2473_s0 + $0x1e4] ss:$12 sps:$4 sm:$0xff]  }
  0x37   :  { %738 = vmatprep.subr.bf16.mxu0 %v1744_v0 }
  0x3a   :  { %739 = vmatpush2.bf16.msra.mxu0 %v1544_v24  ;;  %1451 = vmatmul.mubr.msk.bf16.gmra.mxu1 %vm634_vm1, %v1571_v29 }
  0x3b   :  { %740 = vmatprep.subr.bf16.mxu0 %v1744_v0  ;;  %1454 = vmatprep.mubr.msk.bf16.mxu1 %vm1746_vm0, %v1745_v2  ;;  %v1600_v0 = vld [vmem:[%s2473_s0 + $0x13c] ss:$12 sps:$4 sm:$0xff]  }
  0x3e   :  { %741 = vmatpush2.bf16.msra.mxu0 %v1547_v25  ;;  %v1630_v25 = vld [vmem:[%s2473_s0 + $0x1e0] ss:$12 sps:$4 sm:$0xff]  }
  0x41   :  { %743 = vmatmul.mubr.bf16.vlgmr.msra.gmra.mxu0 %v1548_v27  ;;  %v1632_v27 = vld [vmem:[%s2473_s0 + $0x1fc] ss:$12 sps:$4 sm:$0xff]  }
  0x42   :  { %750 = vmatprep.mubr.bf16.mxu0 %v1552_v28  ;;  %1455 = vmatmul.mubr.msk.bf16.gmra.mxu1 %vm634_vm1, %v1575_v32 }
  0x43   :  { %1458 = vmatprep.mubr.msk.bf16.mxu1 %vm1746_vm0, %v1745_v2 }
  0x49   :  { %751 = vmatmul.mubr.bf16.gmra.mxu0 %v1554_v30 }
  0x4a   :  { %758 = vmatprep.mubr.bf16.mxu0 %v1556_v31  ;;  %1459 = vmatmul.mubr.msk.bf16.gmra.mxu1 %vm634_vm1, %v1579_v35  ;;  %v1634_v31 = vld [vmem:[%s2473_s0 + $0x1f8] ss:$12 sps:$4 sm:$0xff]  }
  0x4b   :  { %1462 = vmatprep.mubr.msk.bf16.mxu1 %vm1746_vm0, %v1745_v2 }
  0x51   :  { %759 = vmatmul.mubr.bf16.gmra.mxu0 %v1558_v33  ;;  %v1636_v33 = vld [vmem:[%s2473_s0 + $0x214] ss:$12 sps:$4 sm:$0xff]  }
  0x52   :  { %766 = vmatprep.mubr.bf16.mxu0 %v1560_v34  ;;  %1463 = vmatmul.mubr.msk.bf16.gmra.mxu1 %vm634_vm1, %v1583_v38 }
  0x53   :  { %1466 = vmatprep.mubr.msk.bf16.mxu1 %vm1746_vm0, %v1745_v2 }
  0x59   :  { %767 = vmatmul.mubr.bf16.gmra.mxu0 %v1562_v36 }
  0x5a   :  { %774 = vmatprep.mubr.bf16.mxu0 %v1564_v37  ;;  %1467 = vmatmul.mubr.msk.bf16.gmra.mxu1 %vm634_vm1, %v1587_v41  ;;  %v1638_v37 = vld [vmem:[%s2473_s0 + $0x210] ss:$12 sps:$4 sm:$0xff]  }
  0x5b   :  { %1470 = vmatprep.mubr.msk.bf16.mxu1 %vm1746_vm0, %v1745_v2 }
  0x61   :  { %775 = vmatmul.mubr.bf16.gmra.mxu0 %v1566_v39  ;;  %v1640_v39 = vld [vmem:[%s2473_s0 + $0x22c] ss:$12 sps:$4 sm:$0xff]  }
  0x62   :  { %782 = vmatprep.mubr.bf16.mxu0 %v1568_v40  ;;  %1471 = vmatmul.mubr.msk.bf16.gmra.mxu1 %vm634_vm1, %v1591_v44  ;;  %v1642_v44 = vld [vmem:[%s2473_s0 + $0x228] ss:$12 sps:$4 sm:$0xff]  }
  0x63   :  { %1474 = vmatprep.mubr.msk.bf16.mxu1 %vm1746_vm0, %v1745_v2 }
  0x69   :  { %783 = vmatmul.mubr.bf16.gmra.mxu0 %v1570_v42  ;;  %v111_v42 = vld [vmem:[%s2473_s0 + $0x240] sm:$0xff] }
  0x6a   :  { %790 = vmatprep.mubr.bf16.mxu0 %v1572_v43  ;;  %1475 = vmatmul.mubr.msk.bf16.gmra.mxu1 %vm634_vm1, %v1595_v47 }
  0x6b   :  { %1478 = vmatprep.mubr.msk.bf16.mxu1 %vm1746_vm0, %v1745_v2 }
  0x71   :  { %791 = vmatmul.mubr.bf16.gmra.mxu0 %v1574_v45 }
  0x72   :  { %798 = vmatprep.mubr.bf16.mxu0 %v1576_v46  ;;  %1479 = vmatmul.mubr.msk.bf16.gmra.mxu1 %vm634_vm1, %v1599_v50  ;;  %v1350_v46 = vcombine.high %v111_v42, %v111_v42  ;;  %v1349_v50 = vcombine.low %v111_v42, %v111_v42 }
  0x73   :  { %1482 = vmatprep.mubr.msk.bf16.mxu1 %vm1746_vm0, %v1745_v2 }
  0x79   :  { %799 = vmatmul.mubr.bf16.gmra.mxu0 %v1578_v48 }
  0x7a   :  { %806 = vmatprep.mubr.bf16.mxu0 %v1580_v49  ;;  %1483 = vmatmul.mubr.msk.bf16.gmra.mxu1 %vm634_vm1, %v1603_v53 }
  0x7b   :  { %1486 = vmatprep.mubr.msk.bf16.mxu1 %vm1746_vm0, %v1745_v2 }
  0x81   :  { %807 = vmatmul.mubr.bf16.gmra.mxu0 %v1582_v51 }
  0x82   :  { %814 = vmatprep.mubr.bf16.mxu0 %v1584_v52  ;;  %1487 = vmatmul.mubr.msk.bf16.gmra.mxu1 %vm634_vm1, %v1607_v56  ;;  %v2151_v52 = vld [vmem:[%s2474_s2] ss:$0 sm:$0xff] }
  0x83   :  { %1490 = vmatprep.mubr.msk.bf16.mxu1 %vm1746_vm0, %v1745_v2 }
  0x89   :  { %815 = vmatmul.mubr.bf16.gmra.mxu0 %v1586_v54 }
  0x8a   :  { %822 = vmatprep.mubr.bf16.mxu0 %v1588_v55  ;;  %1491 = vmatmul.mubr.msk.bf16.gmra.mxu1 %vm634_vm1, %v1611_v59 }
  0x8b   :  { %1494 = vmatprep.mubr.msk.bf16.mxu1 %vm1746_vm0, %v1745_v2 }
  0x91   :  { %823 = vmatmul.mubr.bf16.gmra.mxu0 %v1590_v57 }
  0x92   :  { %830 = vmatprep.mubr.bf16.mxu0 %v1592_v58  ;;  %1495 = vmatmul.mubr.msk.bf16.gmra.mxu1 %vm634_vm1, %v1615_v62 }
  0x93   :  { %1498 = vmatprep.mubr.msk.bf16.mxu1 %vm1746_vm0, %v1745_v2 }
  0x99   :  { %831 = vmatmul.mubr.bf16.gmra.mxu0 %v1594_v60 }
  0x9a   :  { %838 = vmatprep.mubr.bf16.mxu0 %v1596_v61  ;;  %1499 = vmatmul.mubr.msk.bf16.gmra.mxu1 %vm634_vm1, %v1619_v1 }
  0x9b   :  { %1502 = vmatprep.mubr.msk.bf16.mxu1 %vm1746_vm0, %v1745_v2 }
  0xa1   :  { %839 = vmatmul.mubr.bf16.gmra.mxu0 %v1598_v63 }
  0xa2   :  { %846 = vmatprep.mubr.bf16.mxu0 %v1600_v0  ;;  %1503 = vmatmul.mubr.msk.bf16.gmra.mxu1 %vm634_vm1, %v1623_v5 }
  0xa3   :  { %1506 = vmatprep.mubr.msk.bf16.mxu1 %vm1746_vm0, %v1745_v2 }
  0xa9   :  { %847 = vmatmul.mubr.bf16.gmra.mxu0 %v1602_v3 }
  0xaa   :  { %854 = vmatprep.mubr.bf16.mxu0 %v1604_v4  ;;  %1507 = vmatmul.mubr.msk.bf16.gmra.mxu1 %vm634_vm1, %v1627_v8 }
  0xab   :  { %1510 = vmatprep.mubr.msk.bf16.mxu1 %vm1746_vm0, %v1745_v2 }
  0xb1   :  { %855 = vmatmul.mubr.bf16.gmra.mxu0 %v1606_v6 }
  0xb2   :  { %862 = vmatprep.mubr.bf16.mxu0 %v1608_v7  ;;  %1511 = vmatmul.mubr.msk.bf16.gmra.mxu1 %vm634_vm1, %v1631_v11 }
  0xb3   :  { %1514 = vmatprep.mubr.msk.bf16.mxu1 %vm1746_vm0, %v1745_v2 }
  0xb9   :  { %863 = vmatmul.mubr.bf16.gmra.mxu0 %v1610_v9 }
  0xba   :  { %870 = vmatprep.mubr.bf16.mxu0 %v1612_v10  ;;  %1515 = vmatmul.mubr.msk.bf16.gmra.mxu1 %vm634_vm1, %v1635_v14 }
  0xbb   :  { %1518 = vmatprep.mubr.msk.bf16.mxu1 %vm1746_vm0, %v1745_v2 }
  0xc1   :  { %871 = vmatmul.mubr.bf16.gmra.mxu0 %v1614_v12 }
  0xc2   :  { %878 = vmatprep.mubr.bf16.mxu0 %v1616_v13  ;;  %1519 = vmatmul.mubr.msk.bf16.gmra.mxu1 %vm634_vm1, %v1639_v17 }
  0xc3   :  { %1522 = vmatprep.mubr.msk.bf16.mxu1 %vm1746_vm0, %v1745_v2 }
  0xc9   :  { %879 = vmatmul.mubr.bf16.gmra.mxu0 %v1618_v15 }
  0xca   :  { %886 = vmatprep.mubr.bf16.mxu0 %v1620_v16  ;;  %v976_v23 = vpop.f32.mrf.mxu1  ;;  %1523 = vmatmul.mubr.msk.bf16.gmra.mxu1 %vm634_vm1, %v1643_v20 }
  0xcc   :  { %v1428_v24 = vpop.f32.mrf.mxu1 }
  0xce   :  { %v979_v2 = vpop.f32.mrf.mxu1 }
  0xd0   :  { %v1429_v26 = vpop.f32.mrf.mxu1 }
  0xd1   :  { %887 = vmatmul.mubr.bf16.gmra.mxu0 %v1622_v18 }
  0xd2   :  { %894 = vmatprep.mubr.bf16.mxu0 %v1624_v19  ;;  %v984_v28 = vpop.f32.mrf.mxu1 }
  0xd4   :  { %v1432_v29 = vpop.f32.mrf.mxu1 }
  0xd6   :  { %v987_v30 = vpop.f32.mrf.mxu1 }
  0xd8   :  { %v1433_v32 = vpop.f32.mrf.mxu1 }
  0xd9   :  { %895 = vmatmul.mubr.bf16.gmra.mxu0 %v1626_v21 }
  0xda   :  { %902 = vmatprep.mubr.bf16.mxu0 %v1628_v22  ;;  %v2124_v34 = vpop.f32.mrf.mxu1 }
  0xdc   :  { %v1436_v35 = vpop.f32.mrf.mxu1 }
  0xde   :  { %v2126_v36 = vpop.f32.mrf.mxu1 }
  0xe0   :  { %v1437_v38 = vpop.f32.mrf.mxu1 }
  0xe1   :  { %903 = vmatmul.mubr.bf16.gmra.mxu0 %v1630_v25 }
  0xe2   :  { %910 = vmatprep.mubr.bf16.mxu0 %v1632_v27  ;;  %v2134_v40 = vpop.f32.mrf.mxu1 }
  0xe4   :  { %v1440_v41 = vpop.f32.mrf.mxu1 }
  0xe6   :  { %v2139_v43 = vpop.f32.mrf.mxu1 }
  0xe8   :  { %v1441_v45 = vpop.f32.mrf.mxu1 }
  0xe9   :  { %911 = vmatmul.mubr.bf16.gmra.mxu0 %v1634_v31 }
  0xea   :  { %918 = vmatprep.mubr.bf16.mxu0 %v1636_v33  ;;  %v2144_v47 = vpop.f32.mrf.mxu1 }
  0xec   :  { %v1444_v48 = vpop.f32.mrf.mxu1 }
  0xee   :  { %v2146_v49 = vpop.f32.mrf.mxu1 }
  0xf0   :  { %v1445_v51 = vpop.f32.mrf.mxu1 }
  0xf1   :  { %919 = vmatmul.mubr.bf16.gmra.mxu0 %v1638_v37 }
  0xf2   :  { %926 = vmatprep.mubr.bf16.mxu0 %v1640_v39  ;;  %v2153_v53 = vpop.f32.mrf.mxu1 }
  0xf4   :  { %v1448_v55 = vpop.f32.mrf.mxu1 }
  0xf6   :  { %v2156_v58 = vpop.f32.mrf.mxu1 }
  0xf8   :  { %v1449_v61 = vpop.f32.mrf.mxu1 }
  0xf9   :  { %927 = vmatmul.mubr.bf16.gmra.mxu0 %v1642_v44 }
  0xfa   :  { %934 = vmatprep.mubr.bf16.mxu0 %v1350_v46  ;;  %v2159_v0 = vpop.f32.mrf.mxu1 }
  0xfc   :  { %v1452_v4 = vpop.f32.mrf.mxu1 }
  0xfe   :  { %v2162_v7 = vpop.f32.mrf.mxu1 }
 0x100   :  { %v1453_v10 = vpop.f32.mrf.mxu1 }
 0x101   :  { %v744_v54 = vpop.f32.mrf.mxu0  ;;  %935 = vmatmul.mubr.bf16.gmra.mxu0 %v1349_v50 }
 0x102   :  { %v745_v56 = vadd.f32 %v2151_v52, %v744_v54  ;;  %v2165_v13 = vpop.f32.mrf.mxu1 }
 0x103   :  { %v746_v57 = vpop.f32.mrf.mxu0 }
 0x104   :  { %v977_v59 = vadd.f32 %v976_v23, %v745_v56  ;;  %v1456_v16 = vpop.f32.mrf.mxu1 }
 0x105   :  { %v747_v60 = vpop.f32.mrf.mxu0 }
 0x106   :  { %1646 = vtanh.f32 %v977_v59  ;;  %v748_v62 = vadd.f32 %v2151_v52, %v747_v60  ;;  %v2168_v20 = vpop.f32.mrf.mxu1 }
 0x107   :  { %v749_v63 = vpop.f32.mrf.mxu0 }
 0x108   :  { %v980_v1 = vadd.f32 %v979_v2, %v748_v62  ;;  %v1457_v23 = vpop.f32.mrf.mxu1 }
 0x109   :  { %v752_v3 = vpop.f32.mrf.mxu0 }
 0x10a   :  { %1648 = vtanh.f32 %v980_v1  ;;  %v753_v5 = vadd.f32 %v2151_v52, %v752_v3  ;;  %v2175_v26 = vpop.f32.mrf.mxu1 }
 0x10b   :  { %v754_v6 = vpop.f32.mrf.mxu0 }
 0x10c   :  { %v985_v8 = vadd.f32 %v984_v28, %v753_v5  ;;  %v1460_v29 = vpop.f32.mrf.mxu1 }
 0x10d   :  { %v755_v9 = vpop.f32.mrf.mxu0 }
 0x10e   :  { %1650 = vtanh.f32 %v985_v8  ;;  %v756_v11 = vadd.f32 %v2151_v52, %v755_v9  ;;  %v2182_v33 = vpop.f32.mrf.mxu1 }
 0x10f   :  { %v757_v12 = vpop.f32.mrf.mxu0 }
 0x110   :  { %v988_v14 = vadd.f32 %v987_v30, %v756_v11  ;;  %v1461_v37 = vpop.f32.mrf.mxu1 }
 0x111   :  { %v760_v15 = vpop.f32.mrf.mxu0 }
 0x112   :  { %1652 = vtanh.f32 %v988_v14  ;;  %v761_v17 = vadd.f32 %v2151_v52, %v760_v15  ;;  %v2189_v41 = vpop.f32.mrf.mxu1 }
 0x113   :  { %v1647_v18 = vpop.eup %1646  ;;  %v762_v19 = vpop.f32.mrf.mxu0 }
 0x114   :  { %1223 = vst [vmem:[%s2475_s3] sm:$0xff] %v1647_v18  ;;  %v993_v21 = vadd.f32 %v2124_v34, %v761_v17  ;;  %v1464_v45 = vpop.f32.mrf.mxu1 }
 0x115   :  { %v763_v22 = vpop.f32.mrf.mxu0 }
 0x116   :  { %1654 = vtanh.f32 %v993_v21  ;;  %v764_v24 = vadd.f32 %v2151_v52, %v763_v22  ;;  %v2196_v50 = vpop.f32.mrf.mxu1 }
 0x117   :  { %v1649_v2 = vpop.eup %1648  ;;  %v765_v25 = vpop.f32.mrf.mxu0 }
 0x118   :  { %1224 = vst [vmem:[%s2475_s3 + $0x8] sm:$0xff] %v1649_v2  ;;  %v996_v27 = vadd.f32 %v2126_v36, %v764_v24  ;;  %v1465_v55 = vpop.f32.mrf.mxu1 }
 0x119   :  { %v768_v28 = vpop.f32.mrf.mxu0 }
 0x11a   :  { %1656 = vtanh.f32 %v996_v27  ;;  %v769_v30 = vadd.f32 %v2151_v52, %v768_v28  ;;  %v2203_v59 = vpop.f32.mrf.mxu1 }
 0x11b   :  { %v1651_v31 = vpop.eup %1650  ;;  %v770_v32 = vpop.f32.mrf.mxu0 }
 0x11c   :  { %1225 = vst [vmem:[%s2475_s3 + $0x10] sm:$0xff] %v1651_v31  ;;  %v1001_v34 = vadd.f32 %v2134_v40, %v769_v30  ;;  %v1468_v62 = vpop.f32.mrf.mxu1 }
 0x11d   :  { %v771_v35 = vpop.f32.mrf.mxu0 }
 0x11e   :  { %1658 = vtanh.f32 %v1001_v34  ;;  %v772_v36 = vadd.f32 %v2151_v52, %v771_v35  ;;  %v2210_v3 = vpop.f32.mrf.mxu1 }
 0x11f   :  { %v1653_v38 = vpop.eup %1652  ;;  %v773_v39 = vpop.f32.mrf.mxu0 }
 0x120   :  { %1226 = vst [vmem:[%s2475_s3 + $0x18] sm:$0xff] %v1653_v38  ;;  %v1004_v42 = vadd.f32 %v2139_v43, %v772_v36  ;;  %v1469_v6 = vpop.f32.mrf.mxu1 }
 0x121   :  { %v776_v44 = vpop.f32.mrf.mxu0 }
 0x122   :  { %1660 = vtanh.f32 %v1004_v42  ;;  %v777_v40 = vadd.f32 %v2151_v52, %v776_v44  ;;  %v2217_v10 = vpop.f32.mrf.mxu1 }
 0x123   :  { %v1655_v46 = vpop.eup %1654  ;;  %v778_v48 = vpop.f32.mrf.mxu0 }
 0x124   :  { %1227 = vst [vmem:[%s2475_s3 + $0x20] sm:$0xff] %v1655_v46  ;;  %v1009_v51 = vadd.f32 %v2144_v47, %v777_v40  ;;  %v1472_v14 = vpop.f32.mrf.mxu1 }
 0x125   :  { %v779_v54 = vpop.f32.mrf.mxu0 }
 0x126   :  { %1662 = vtanh.f32 %v1009_v51  ;;  %v780_v43 = vadd.f32 %v2151_v52, %v779_v54  ;;  %v2224_v17 = vpop.f32.mrf.mxu1 }
 0x127   :  { %v1657_v56 = vpop.eup %1656  ;;  %v781_v57 = vpop.f32.mrf.mxu0 }
 0x128   :  { %1228 = vst [vmem:[%s2475_s3 + $0x28] sm:$0xff] %v1657_v56  ;;  %v1012_v60 = vadd.f32 %v2146_v49, %v780_v43  ;;  %v1473_v21 = vpop.f32.mrf.mxu1 }
 0x129   :  { %v784_v61 = vpop.f32.mrf.mxu0 }
 0x12a   :  { %1664 = vtanh.f32 %v1012_v60  ;;  %v785_v47 = vadd.f32 %v2151_v52, %v784_v61  ;;  %v2231_v24 = vpop.f32.mrf.mxu1 }
 0x12b   :  { %v1659_v63 = vpop.eup %1658  ;;  %v786_v1 = vpop.f32.mrf.mxu0 }
 0x12c   :  { %1229 = vst [vmem:[%s2475_s3 + $0x30] sm:$0xff] %v1659_v63  ;;  %v1017_v4 = vadd.f32 %v2153_v53, %v785_v47  ;;  %v1476_v27 = vpop.f32.mrf.mxu1 }
 0x12d   :  { %v787_v5 = vpop.f32.mrf.mxu0 }
 0x12e   :  { %1666 = vtanh.f32 %v1017_v4  ;;  %v788_v49 = vadd.f32 %v2151_v52, %v787_v5  ;;  %v2238_v30 = vpop.f32.mrf.mxu1 }
 0x12f   :  { %v1661_v8 = vpop.eup %1660  ;;  %v789_v9 = vpop.f32.mrf.mxu0 }
 0x130   :  { %1230 = vst [vmem:[%s2475_s3 + $0x38] sm:$0xff] %v1661_v8  ;;  %v1020_v11 = vadd.f32 %v2156_v58, %v788_v49  ;;  %v1477_v34 = vpop.f32.mrf.mxu1 }
 0x131   :  { %v792_v12 = vpop.f32.mrf.mxu0 }
 0x132   :  { %1668 = vtanh.f32 %v1020_v11  ;;  %v793_v53 = vadd.f32 %v2151_v52, %v792_v12  ;;  %v2245_v36 = vpop.f32.mrf.mxu1 }
 0x133   :  { %v1663_v15 = vpop.eup %1662  ;;  %v794_v16 = vpop.f32.mrf.mxu0 }
 0x134   :  { %1231 = vst [vmem:[%s2475_s3 + $0x40] sm:$0xff] %v1663_v15  ;;  %v1025_v18 = vadd.f32 %v2159_v0, %v793_v53  ;;  %v1480_v42 = vpop.f32.mrf.mxu1 }
 0x135   :  { %v795_v19 = vpop.f32.mrf.mxu0 }
 0x136   :  { %1670 = vtanh.f32 %v1025_v18  ;;  %v796_v58 = vadd.f32 %v2151_v52, %v795_v19  ;;  %v2252_v40 = vpop.f32.mrf.mxu1 }
 0x137   :  { %v1665_v22 = vpop.eup %1664  ;;  %v797_v23 = vpop.f32.mrf.mxu0 }
 0x138   :  { %1232 = vst [vmem:[%s2475_s3 + $0x48] sm:$0xff] %v1665_v22  ;;  %v1028_v2 = vadd.f32 %v2162_v7, %v796_v58  ;;  %v1481_v51 = vpop.f32.mrf.mxu1 }
 0x139   :  { %v800_v25 = vpop.f32.mrf.mxu0 }
 0x13a   :  { %1672 = vtanh.f32 %v1028_v2  ;;  %v801_v0 = vadd.f32 %v2151_v52, %v800_v25  ;;  %v2259_v43 = vpop.f32.mrf.mxu1 }
 0x13b   :  { %v1667_v28 = vpop.eup %1666  ;;  %v802_v29 = vpop.f32.mrf.mxu0 }
 0x13c   :  { %1233 = vst [vmem:[%s2475_s3 + $0x50] sm:$0xff] %v1667_v28  ;;  %v1033_v31 = vadd.f32 %v2165_v13, %v801_v0  ;;  %v1484_v60 = vpop.f32.mrf.mxu1 }
 0x13d   :  { %v803_v32 = vpop.f32.mrf.mxu0 }
 0x13e   :  { %1674 = vtanh.f32 %v1033_v31  ;;  %v804_v7 = vadd.f32 %v2151_v52, %v803_v32  ;;  %v2266_v47 = vpop.f32.mrf.mxu1 }
 0x13f   :  { %v1669_v35 = vpop.eup %1668  ;;  %v805_v37 = vpop.f32.mrf.mxu0 }
 0x140   :  { %1234 = vst [vmem:[%s2475_s3 + $0x58] sm:$0xff] %v1669_v35  ;;  %v1036_v38 = vadd.f32 %v2168_v20, %v804_v7  ;;  %v1485_v4 = vpop.f32.mrf.mxu1 }
 0x141   :  { %v808_v39 = vpop.f32.mrf.mxu0 }
 0x142   :  { %1676 = vtanh.f32 %v1036_v38  ;;  %v809_v13 = vadd.f32 %v2151_v52, %v808_v39  ;;  %v2273_v49 = vpop.f32.mrf.mxu1 }
 0x143   :  { %v1671_v44 = vpop.eup %1670  ;;  %v810_v45 = vpop.f32.mrf.mxu0 }
 0x144   :  { %1235 = vst [vmem:[%s2475_s3 + $0x60] sm:$0xff] %v1671_v44  ;;  %v1041_v46 = vadd.f32 %v2175_v26, %v809_v13  ;;  %v1488_v11 = vpop.f32.mrf.mxu1 }
 0x145   :  { %v811_v48 = vpop.f32.mrf.mxu0 }
 0x146   :  { %1678 = vtanh.f32 %v1041_v46  ;;  %v812_v20 = vadd.f32 %v2151_v52, %v811_v48  ;;  %v2280_v53 = vpop.f32.mrf.mxu1 }
 0x147   :  { %v1673_v54 = vpop.eup %1672  ;;  %v813_v55 = vpop.f32.mrf.mxu0 }
 0x148   :  { %1236 = vst [vmem:[%s2475_s3 + $0x68] sm:$0xff] %v1673_v54  ;;  %v1044_v56 = vadd.f32 %v2182_v33, %v812_v20  ;;  %v1489_v18 = vpop.f32.mrf.mxu1 }
 0x149   :  { %v816_v57 = vpop.f32.mrf.mxu0 }
 0x14a   :  { %1680 = vtanh.f32 %v1044_v56  ;;  %v817_v26 = vadd.f32 %v2151_v52, %v816_v57  ;;  %v2287_v58 = vpop.f32.mrf.mxu1 }
 0x14b   :  { %v1675_v61 = vpop.eup %1674  ;;  %v818_v62 = vpop.f32.mrf.mxu0 }
 0x14c   :  { %1237 = vst [vmem:[%s2475_s3 + $0x70] sm:$0xff] %v1675_v61  ;;  %v1049_v63 = vadd.f32 %v2189_v41, %v817_v26  ;;  %v1492_v2 = vpop.f32.mrf.mxu1 }
 0x14d   :  { %v819_v1 = vpop.f32.mrf.mxu0 }
 0x14e   :  { %1682 = vtanh.f32 %v1049_v63  ;;  %v820_v33 = vadd.f32 %v2151_v52, %v819_v1  ;;  %v2294_v0 = vpop.f32.mrf.mxu1 }
 0x14f   :  { %v1677_v5 = vpop.eup %1676  ;;  %v821_v6 = vpop.f32.mrf.mxu0 }
 0x150   :  { %1238 = vst [vmem:[%s2475_s3 + $0x78] sm:$0xff] %v1677_v5  ;;  %v1052_v8 = vadd.f32 %v2196_v50, %v820_v33  ;;  %v1493_v31 = vpop.f32.mrf.mxu1 }
 0x151   :  { %v824_v9 = vpop.f32.mrf.mxu0 }
 0x152   :  { %1684 = vtanh.f32 %v1052_v8  ;;  %v825_v41 = vadd.f32 %v2151_v52, %v824_v9  ;;  %v2301_v7 = vpop.f32.mrf.mxu1 }
 0x153   :  { %v1679_v12 = vpop.eup %1678  ;;  %v826_v14 = vpop.f32.mrf.mxu0 }
 0x154   :  { %1239 = vst [vmem:[%s2475_s3 + $0x80] sm:$0xff] %v1679_v12  ;;  %v1057_v15 = vadd.f32 %v2203_v59, %v825_v41  ;;  %v1496_v38 = vpop.f32.mrf.mxu1 }
 0x155   :  { %v827_v16 = vpop.f32.mrf.mxu0 }
 0x156   :  { %1686 = vtanh.f32 %v1057_v15  ;;  %v828_v50 = vadd.f32 %v2151_v52, %v827_v16  ;;  %v2308_v13 = vpop.f32.mrf.mxu1 }
 0x157   :  { %v1681_v19 = vpop.eup %1680  ;;  %v829_v21 = vpop.f32.mrf.mxu0 }
 0x158   :  { %1240 = vst [vmem:[%s2475_s3 + $0x88] sm:$0xff] %v1681_v19  ;;  %v1060_v22 = vadd.f32 %v2210_v3, %v828_v50  ;;  %v1497_v46 = vpop.f32.mrf.mxu1 }
 0x159   :  { %v832_v23 = vpop.f32.mrf.mxu0 }
 0x15a   :  { %1688 = vtanh.f32 %v1060_v22  ;;  %v833_v59 = vadd.f32 %v2151_v52, %v832_v23  ;;  %v2315_v20 = vpop.f32.mrf.mxu1 }
 0x15b   :  { %v1683_v25 = vpop.eup %1682  ;;  %v834_v27 = vpop.f32.mrf.mxu0 }
 0x15c   :  { %1241 = vst [vmem:[%s2475_s3 + $0x90] sm:$0xff] %v1683_v25  ;;  %v1065_v28 = vadd.f32 %v2217_v10, %v833_v59  ;;  %v1500_v56 = vpop.f32.mrf.mxu1 }
 0x15d   :  { %v835_v29 = vpop.f32.mrf.mxu0 }
 0x15e   :  { %1690 = vtanh.f32 %v1065_v28  ;;  %v836_v3 = vadd.f32 %v2151_v52, %v835_v29  ;;  %v2322_v26 = vpop.f32.mrf.mxu1 }
 0x15f   :  { %v1685_v32 = vpop.eup %1684  ;;  %v837_v34 = vpop.f32.mrf.mxu0 }
 0x160   :  { %1242 = vst [vmem:[%s2475_s3 + $0x98] sm:$0xff] %v1685_v32  ;;  %v1068_v35 = vadd.f32 %v2224_v17, %v836_v3  ;;  %v1501_v63 = vpop.f32.mrf.mxu1 }
 0x161   :  { %v840_v37 = vpop.f32.mrf.mxu0 }
 0x162   :  { %1692 = vtanh.f32 %v1068_v35  ;;  %v841_v10 = vadd.f32 %v2151_v52, %v840_v37  ;;  %v2329_v33 = vpop.f32.mrf.mxu1 }
 0x163   :  { %v1687_v39 = vpop.eup %1686  ;;  %v842_v42 = vpop.f32.mrf.mxu0 }
 0x164   :  { %1243 = vst [vmem:[%s2475_s3 + $0xa0] sm:$0xff] %v1687_v39  ;;  %v1073_v44 = vadd.f32 %v2231_v24, %v841_v10  ;;  %v1504_v8 = vpop.f32.mrf.mxu1 }
 0x165   :  { %v843_v45 = vpop.f32.mrf.mxu0 }
 0x166   :  { %1694 = vtanh.f32 %v1073_v44  ;;  %v844_v17 = vadd.f32 %v2151_v52, %v843_v45  ;;  %v2336_v41 = vpop.f32.mrf.mxu1 }
 0x167   :  { %v1689_v48 = vpop.eup %1688  ;;  %v845_v51 = vpop.f32.mrf.mxu0 }
 0x168   :  { %1244 = vst [vmem:[%s2475_s3 + $0xa8] sm:$0xff] %v1689_v48  ;;  %v1076_v54 = vadd.f32 %v2238_v30, %v844_v17  ;;  %v1505_v15 = vpop.f32.mrf.mxu1 }
 0x169   :  { %v848_v55 = vpop.f32.mrf.mxu0 }
 0x16a   :  { %1696 = vtanh.f32 %v1076_v54  ;;  %v849_v24 = vadd.f32 %v2151_v52, %v848_v55  ;;  %v2343_v50 = vpop.f32.mrf.mxu1 }
 0x16b   :  { %v1691_v57 = vpop.eup %1690  ;;  %v850_v60 = vpop.f32.mrf.mxu0 }
 0x16c   :  { %1245 = vst [vmem:[%s2475_s3 + $0xb0] sm:$0xff] %v1691_v57  ;;  %v1081_v61 = vadd.f32 %v2245_v36, %v849_v24  ;;  %v1508_v22 = vpop.f32.mrf.mxu1 }
 0x16d   :  { %v851_v62 = vpop.f32.mrf.mxu0 }
 0x16e   :  { %1698 = vtanh.f32 %v1081_v61  ;;  %v852_v30 = vadd.f32 %v2151_v52, %v851_v62  ;;  %v2350_v59 = vpop.f32.mrf.mxu1 }
 0x16f   :  { %v1693_v1 = vpop.eup %1692  ;;  %v853_v4 = vpop.f32.mrf.mxu0 }
 0x170   :  { %1246 = vst [vmem:[%s2475_s3 + $0xb8] sm:$0xff] %v1693_v1  ;;  %v1084_v5 = vadd.f32 %v2252_v40, %v852_v30  ;;  %v1509_v28 = vpop.f32.mrf.mxu1 }
 0x171   :  { %v856_v6 = vpop.f32.mrf.mxu0 }
 0x172   :  { %1700 = vtanh.f32 %v1084_v5  ;;  %v857_v36 = vadd.f32 %v2151_v52, %v856_v6  ;;  %v2357_v3 = vpop.f32.mrf.mxu1 }
 0x173   :  { %v1695_v9 = vpop.eup %1694  ;;  %v858_v11 = vpop.f32.mrf.mxu0 }
 0x174   :  { %1247 = vst [vmem:[%s2475_s3 + $0xc0] sm:$0xff] %v1695_v9  ;;  %v1089_v12 = vadd.f32 %v2259_v43, %v857_v36  ;;  %v1512_v35 = vpop.f32.mrf.mxu1 }
 0x175   :  { %v859_v14 = vpop.f32.mrf.mxu0 }
 0x176   :  { %1702 = vtanh.f32 %v1089_v12  ;;  %v860_v40 = vadd.f32 %v2151_v52, %v859_v14  ;;  %v2364_v10 = vpop.f32.mrf.mxu1 }
 0x177   :  { %v1697_v16 = vpop.eup %1696  ;;  %v861_v18 = vpop.f32.mrf.mxu0 }
 0x178   :  { %1248 = vst [vmem:[%s2475_s3 + $0xc8] sm:$0xff] %v1697_v16  ;;  %v1092_v19 = vadd.f32 %v2266_v47, %v860_v40  ;;  %v1513_v44 = vpop.f32.mrf.mxu1 }
 0x179   :  { %v864_v21 = vpop.f32.mrf.mxu0 }
 0x17a   :  { %1704 = vtanh.f32 %v1092_v19  ;;  %v865_v43 = vadd.f32 %v2151_v52, %v864_v21  ;;  %v2371_v17 = vpop.f32.mrf.mxu1 }
 0x17b   :  { %v1699_v23 = vpop.eup %1698  ;;  %v866_v2 = vpop.f32.mrf.mxu0 }
 0x17c   :  { %1249 = vst [vmem:[%s2475_s3 + $0xd0] sm:$0xff] %v1699_v23  ;;  %v1097_v25 = vadd.f32 %v2273_v49, %v865_v43  ;;  %v1516_v54 = vpop.f32.mrf.mxu1 }
 0x17d   :  { %v867_v27 = vpop.f32.mrf.mxu0 }
 0x17e   :  { %1706 = vtanh.f32 %v1097_v25  ;;  %v868_v47 = vadd.f32 %v2151_v52, %v867_v27  ;;  %v2378_v24 = vpop.f32.mrf.mxu1 }
 0x17f   :  { %v1701_v29 = vpop.eup %1700  ;;  %v869_v31 = vpop.f32.mrf.mxu0 }
 0x180   :  { %1250 = vst [vmem:[%s2475_s3 + $0xd8] sm:$0xff] %v1701_v29  ;;  %v1100_v32 = vadd.f32 %v2280_v53, %v868_v47  ;;  %v1517_v61 = vpop.f32.mrf.mxu1 }
 0x181   :  { %v872_v34 = vpop.f32.mrf.mxu0 }
 0x182   :  { %1708 = vtanh.f32 %v1100_v32  ;;  %v873_v49 = vadd.f32 %v2151_v52, %v872_v34  ;;  %v2385_v30 = vpop.f32.mrf.mxu1 }
 0x183   :  { %v1703_v37 = vpop.eup %1702  ;;  %v874_v38 = vpop.f32.mrf.mxu0 }
 0x184   :  { %1251 = vst [vmem:[%s2475_s3 + $0xe0] sm:$0xff] %v1703_v37  ;;  %v1105_v39 = vadd.f32 %v2287_v58, %v873_v49  ;;  %v1520_v5 = vpop.f32.mrf.mxu1 }
 0x185   :  { %v875_v42 = vpop.f32.mrf.mxu0 }
 0x186   :  { %1710 = vtanh.f32 %v1105_v39  ;;  %v876_v53 = vadd.f32 %v2151_v52, %v875_v42  ;;  %v2392_v36 = vpop.f32.mrf.mxu1 }
 0x187   :  { %v1705_v45 = vpop.eup %1704  ;;  %v877_v46 = vpop.f32.mrf.mxu0 }
 0x188   :  { %1252 = vst [vmem:[%s2475_s3 + $0xe8] sm:$0xff] %v1705_v45  ;;  %v1108_v48 = vadd.f32 %v2294_v0, %v876_v53  ;;  %v1521_v12 = vpop.f32.mrf.mxu1 }
 0x189   :  { %v880_v51 = vpop.f32.mrf.mxu0 }
 0x18a   :  { %1712 = vtanh.f32 %v1108_v48  ;;  %v881_v58 = vadd.f32 %v2151_v52, %v880_v51  ;;  %v2399_v40 = vpop.f32.mrf.mxu1 }
 0x18b   :  { %v1707_v55 = vpop.eup %1706  ;;  %v882_v56 = vpop.f32.mrf.mxu0 }
 0x18c   :  { %1253 = vst [vmem:[%s2475_s3 + $0xf0] sm:$0xff] %v1707_v55  ;;  %v1113_v57 = vadd.f32 %v2301_v7, %v881_v58  ;;  %v1524_v19 = vpop.f32.mrf.mxu1 }
 0x18d   :  { %v883_v60 = vpop.f32.mrf.mxu0 }
 0x18e   :  { %1714 = vtanh.f32 %v1113_v57  ;;  %v884_v0 = vadd.f32 %v2151_v52, %v883_v60  ;;  %v1171_v43 = vpop.f32.mrf.mxu1 }
 0x18f   :  { %v1709_v62 = vpop.eup %1708  ;;  %v885_v63 = vpop.f32.mrf.mxu0 }
 0x190   :  { %1254 = vst [vmem:[%s2475_s3 + $0xf8] sm:$0xff] %v1709_v62  ;;  %v1116_v1 = vadd.f32 %v2308_v13, %v884_v0  ;;  %v1525_v25 = vpop.f32.mrf.mxu1 }
 0x191   :  { %v888_v4 = vpop.f32.mrf.mxu0 }
 0x192   :  { %1716 = vtanh.f32 %v1116_v1  ;;  %v889_v7 = vadd.f32 %v2151_v52, %v888_v4 }
 0x193   :  { %v1711_v6 = vpop.eup %1710  ;;  %v890_v8 = vpop.f32.mrf.mxu0 }
 0x194   :  { %1255 = vst [vmem:[%s2475_s3 + $0x100] sm:$0xff] %v1711_v6  ;;  %v1121_v9 = vadd.f32 %v2315_v20, %v889_v7 }
 0x195   :  { %v891_v11 = vpop.f32.mrf.mxu0 }
 0x196   :  { %1718 = vtanh.f32 %v1121_v9  ;;  %v892_v13 = vadd.f32 %v2151_v52, %v891_v11 }
 0x197   :  { %v1713_v14 = vpop.eup %1712  ;;  %v893_v15 = vpop.f32.mrf.mxu0 }
 0x198   :  { %1256 = vst [vmem:[%s2475_s3 + $0x108] sm:$0xff] %v1713_v14  ;;  %v1124_v16 = vadd.f32 %v2322_v26, %v892_v13 }
 0x199   :  { %v896_v18 = vpop.f32.mrf.mxu0 }
 0x19a   :  { %1720 = vtanh.f32 %v1124_v16  ;;  %v897_v20 = vadd.f32 %v2151_v52, %v896_v18 }
 0x19b   :  { %v1715_v21 = vpop.eup %1714  ;;  %v898_v22 = vpop.f32.mrf.mxu0 }
 0x19c   :  { %1257 = vst [vmem:[%s2475_s3 + $0x110] sm:$0xff] %v1715_v21  ;;  %v1129_v23 = vadd.f32 %v2329_v33, %v897_v20 }
 0x19d   :  { %v899_v2 = vpop.f32.mrf.mxu0 }
 0x19e   :  { %1722 = vtanh.f32 %v1129_v23  ;;  %v900_v27 = vadd.f32 %v2151_v52, %v899_v2 }
 0x19f   :  { %v1717_v26 = vpop.eup %1716  ;;  %v901_v28 = vpop.f32.mrf.mxu0 }
 0x1a0   :  { %1258 = vst [vmem:[%s2475_s3 + $0x118] sm:$0xff] %v1717_v26  ;;  %v1132_v47 = vadd.f32 %v2336_v41, %v900_v27 }
 0x1a1   :  { %v904_v29 = vpop.f32.mrf.mxu0 }
 0x1a2   :  { %1724 = vtanh.f32 %v1132_v47  ;;  %v905_v31 = vadd.f32 %v2151_v52, %v904_v29 }
 0x1a3   :  { %v1719_v32 = vpop.eup %1718  ;;  %v906_v34 = vpop.f32.mrf.mxu0 }
 0x1a4   :  { %1259 = vst [vmem:[%s2475_s3 + $0x120] sm:$0xff] %v1719_v32  ;;  %v1137_v33 = vadd.f32 %v2343_v50, %v905_v31 }
 0x1a5   :  { %v907_v35 = vpop.f32.mrf.mxu0 }
 0x1a6   :  { %1726 = vtanh.f32 %v1137_v33  ;;  %v908_v49 = vadd.f32 %v2151_v52, %v907_v35 }
 0x1a7   :  { %v1721_v37 = vpop.eup %1720  ;;  %v909_v38 = vpop.f32.mrf.mxu0 }
 0x1a8   :  { %1260 = vst [vmem:[%s2475_s3 + $0x128] sm:$0xff] %v1721_v37  ;;  %v1140_v41 = vadd.f32 %v2350_v59, %v908_v49 }
 0x1a9   :  { %v912_v39 = vpop.f32.mrf.mxu0 }
 0x1aa   :  { %1728 = vtanh.f32 %v1140_v41  ;;  %v913_v42 = vadd.f32 %v2151_v52, %v912_v39 }
 0x1ab   :  { %v1723_v44 = vpop.eup %1722  ;;  %v914_v53 = vpop.f32.mrf.mxu0 }
 0x1ac   :  { %1261 = vst [vmem:[%s2475_s3 + $0x130] sm:$0xff] %v1723_v44  ;;  %v1145_v50 = vadd.f32 %v2357_v3, %v913_v42 }
 0x1ad   :  { %v915_v45 = vpop.f32.mrf.mxu0 }
 0x1ae   :  { %1730 = vtanh.f32 %v1145_v50  ;;  %v916_v46 = vadd.f32 %v2151_v52, %v915_v45 }
 0x1af   :  { %v1725_v48 = vpop.eup %1724  ;;  %v917_v51 = vpop.f32.mrf.mxu0 }
 0x1b0   :  { %1262 = vst [vmem:[%s2475_s3 + $0x138] sm:$0xff] %v1725_v48  ;;  %v1148_v59 = vadd.f32 %v2364_v10, %v916_v46 }
 0x1b1   :  { %v920_v54 = vpop.f32.mrf.mxu0 }
 0x1b2   :  { %1732 = vtanh.f32 %v1148_v59  ;;  %v921_v58 = vadd.f32 %v2151_v52, %v920_v54 }
 0x1b3   :  { %v1727_v55 = vpop.eup %1726  ;;  %v922_v56 = vpop.f32.mrf.mxu0 }
 0x1b4   :  { %1263 = vst [vmem:[%s2475_s3 + $0x140] sm:$0xff] %v1727_v55  ;;  %v1153_v3 = vadd.f32 %v2371_v17, %v921_v58 }
 0x1b5   :  { %v923_v57 = vpop.f32.mrf.mxu0 }
 0x1b6   :  { %1734 = vtanh.f32 %v1153_v3  ;;  %v924_v60 = vadd.f32 %v2151_v52, %v923_v57 }
 0x1b7   :  { %v1729_v61 = vpop.eup %1728  ;;  %v925_v0 = vpop.f32.mrf.mxu0 }
 0x1b8   :  { %1264 = vst [vmem:[%s2475_s3 + $0x148] sm:$0xff] %v1729_v61  ;;  %v1156_v10 = vadd.f32 %v2378_v24, %v924_v60 }
 0x1b9   :  { %v928_v62 = vpop.f32.mrf.mxu0 }
 0x1ba   :  { %1736 = vtanh.f32 %v1156_v10  ;;  %v929_v63 = vadd.f32 %v2151_v52, %v928_v62 }
 0x1bb   :  { %v1731_v1 = vpop.eup %1730  ;;  %v930_v4 = vpop.f32.mrf.mxu0 }
 0x1bc   :  { %1265 = vst [vmem:[%s2475_s3 + $0x150] sm:$0xff] %v1731_v1  ;;  %v1161_v17 = vadd.f32 %v2385_v30, %v929_v63 }
 0x1bd   :  { %v931_v5 = vpop.f32.mrf.mxu0 }
 0x1be   :  { %1738 = vtanh.f32 %v1161_v17  ;;  %v932_v7 = vadd.f32 %v2151_v52, %v931_v5 }
 0x1bf   :  { %v1733_v6 = vpop.eup %1732  ;;  %v933_v8 = vpop.f32.mrf.mxu0 }
 0x1c0   :  { %1266 = vst [vmem:[%s2475_s3 + $0x158] sm:$0xff] %v1733_v6  ;;  %v1164_v24 = vadd.f32 %v2392_v36, %v932_v7 }
 0x1c1   :  { %v936_v9 = vpop.f32.mrf.mxu0 }
 0x1c2   :  { %1740 = vtanh.f32 %v1164_v24  ;;  %v937_v11 = vadd.f32 %v2151_v52, %v936_v9 }
 0x1c3   :  { %v1735_v12 = vpop.eup %1734  ;;  %v938_v13 = vpop.f32.mrf.mxu0 }
 0x1c4   :  { %1267 = vst [vmem:[%s2475_s3 + $0x160] sm:$0xff] %v1735_v12  ;;  %v1169_v30 = vadd.f32 %v2399_v40, %v937_v11 }
 0x1c5   :  { %v939_v14 = vpop.f32.mrf.mxu0 }
 0x1c6   :  { %1742 = vtanh.f32 %v1169_v30 }
 0x1c7   :  { %v1737_v15 = vpop.eup %1736  ;;  %v940_v16 = vpop.f32.mrf.mxu0 }
 0x1c8   :  { %1268 = vst [vmem:[%s2475_s3 + $0x168] sm:$0xff] %v1737_v15 }
 0x1cb   :  { %v1739_v36 = vpop.eup %1738 }
 0x1cc   :  { %1269 = vst [vmem:[%s2475_s3 + $0x170] sm:$0xff] %v1739_v36 }
 0x1cf   :  { %v1741_v52 = vpop.eup %1740 }
 0x1d0   :  { %1270 = vst [vmem:[%s2475_s3 + $0x178] sm:$0xff] %v1741_v52 }
 0x1d3   :  { %v1743_v18 = vpop.eup %1742 }
 0x1d4   :  { %1271 = vst [vmem:[%s2475_s3 + $0x180] sm:$0xff] %v1743_v18 }

</bundles_post_ra>
